<compile_context>
chip_gen: v5e
topology: v5e:2x2
jax: 0.10.0
libtpu: 0.0.40
codegen_flags: <defaults>
</compile_context>

<pallas_src>
import functools

import jax
import jax.numpy as jnp
from jax.experimental import pallas as pl
from jax.experimental.pallas import tpu as pltpu


# ----------------------------------------------------------------------------
# Pallas kernels
# ----------------------------------------------------------------------------
def _gemm_kernel(a_ref, w_ref, b_ref, *out_refs, out_tanh, want_stats):
    """One tap-stacked MXU GEMM per grid step: (tm, K) @ (K, cout).

    Fused epilogue: bias add, optional per-tile BatchNorm partial sums
    (sum / sum-of-squares of the pre-activation), optional tanh.
    """
    tm, k = a_ref.shape[-2], a_ref.shape[-1]
    cout = w_ref.shape[-1]
    a = a_ref[...].reshape(tm, k)
    w = w_ref[...].reshape(k, cout)
    acc = jnp.dot(a, w, preferred_element_type=jnp.float32)   # single K-stacked dot
    acc = acc + b_ref[...]                                     # (1, cout) broadcast
    if want_stats:
        y_ref, s1_ref, s2_ref = out_refs
        s1_ref[0] = jnp.sum(acc, axis=0, keepdims=True)
        s2_ref[0] = jnp.sum(acc * acc, axis=0, keepdims=True)
    else:
        (y_ref,) = out_refs
    if out_tanh:
        acc = jnp.tanh(acc)
    y_ref[...] = acc.reshape(y_ref.shape).astype(y_ref.dtype)


def _mid_kernel(a_ref, wm_ref, wu_ref, bu_ref, y_ref):
    """Fused midrelu1 -> midcon -> midrelu2 -> (up1 || upf1) for one sample.

    a_ref : (1, 1, 4*C)  LeakyReLU(BN(x5)) flattened over its 2x2 spatial grid.
    wm_ref: (4*C, Cm)    midcon interior taps (padded borders of the 2x2 are 0).
    wu_ref: (Cm, 4*Cu)   up1/upf1 centre taps, parity-major output columns.
    bu_ref: (1, 4*Cu)    up1/upf1 bias, tiled per parity.
    """
    h = jnp.dot(a_ref[0], wm_ref[...], preferred_element_type=jnp.float32)
    h = jnp.maximum(h, 0.0).astype(jnp.bfloat16)               # midrelu2 (ReLU)
    o = jnp.dot(h, wu_ref[...], preferred_element_type=jnp.float32)
    y_ref[0] = (o + bu_ref[...]).astype(y_ref.dtype)


# ----------------------------------------------------------------------------
# Weight re-organisation (torch layouts -> K-stacked tap matrices)
# ----------------------------------------------------------------------------
def _reorg_conv_w(w):
    """Conv2d weight (Cout,Cin,4,4) -> (16*Cin, Cout); row = kh*4*Cin + kw*Cin + ci."""
    cout, cin = int(w.shape[0]), int(w.shape[1])
    wt = jnp.transpose(w, (2, 3, 1, 0))                        # (4, 4, Cin, Cout)
    return wt.reshape(16 * cin, cout)


def _reorg_convT_w(w):
    """ConvTranspose2d weight (Cin,Cout,4,4) -> (4, 4*Cin, Cout), parity-major.

    Output parity (oy,ox), tap (ty,tx) uses kernel position (3-oy-2ty, 3-ox-2tx).
    """
    mats = []
    for oy in range(2):
        for ox in range(2):
            taps = [w[:, :, 3 - oy - 2 * ty, 3 - ox - 2 * tx]
                    for ty in range(2) for tx in range(2)]
            mats.append(jnp.concatenate(taps, axis=0))         # (4*Cin, Cout)
    return jnp.stack(mats, axis=0)


# ----------------------------------------------------------------------------
# Fused prologue: per-channel affine (BN) + per-channel leak slope (act), concat.
# XLA fuses this with the pad / tap-gather that builds the GEMM A operand.
# ----------------------------------------------------------------------------
def _prologue(groups):
    parts = []
    for t, sc, sh, sl in groups:
        z = t.astype(jnp.float32) * sc[None, None, None, :] + sh[None, None, None, :]
        z = jnp.where(z >= 0.0, z, z * sl[None, None, None, :])
        parts.append(z)
    x = parts[0] if len(parts) == 1 else jnp.concatenate(parts, axis=-1)
    return x.astype(jnp.bfloat16)


def _m_tile(m, cap=256):
    """Largest row-tile <= cap that divides M (spatial sizes here are powers of 2)."""
    if m <= cap:
        return m
    t = cap
    while m % t:
        t //= 2
    return t if t >= 8 else m


# ----------------------------------------------------------------------------
# Layer wrappers
# ----------------------------------------------------------------------------
def pallas_conv4x4s2(groups, w_torch, bias, *, want_stats=True, out_tanh=False,
                     out_dtype=jnp.bfloat16):
    """PyTorch Conv2d(k=4,s=2,p=1) on NHWC input; returns (y, sum_c, sumsq_c)."""
    x = _prologue(groups)                                      # (N, H, W, cin) bf16
    N, H, W, cin = x.shape
    OH, OW = H // 2, W // 2
    M = OH * OW
    K = 16 * cin
    cout = int(w_torch.shape[0])

    # Tap-stacked A operand (im2col for k=4,s=2 is exactly 4x the activation),
    # built by XLA fused with the affine/leak prologue above.
    xp = jnp.pad(x, ((0, 0), (1, 1), (1, 1), (0, 0)))
    cols = [xp[:, kh:kh + 2 * OH:2, kw:kw + 2 * OW:2, :]
            for kh in range(4) for kw in range(4)]
    a = jnp.concatenate(cols, axis=-1).reshape(N, M, K)

    wk = _reorg_conv_w(w_torch).astype(jnp.bfloat16)           # (K, cout)
    b = (jnp.zeros((1, cout), jnp.float32) if bias is None
         else bias.reshape(1, cout).astype(jnp.float32))

    tm = _m_tile(M)
    n_mt = M // tm
    grid = (N, n_mt)

    out_shape = [jax.ShapeDtypeStruct((N, M, cout), out_dtype)]
    out_specs = [pl.BlockSpec((1, tm, cout), lambda n, mt: (n, mt, 0))]
    if want_stats:
        out_shape += [jax.ShapeDtypeStruct((N * n_mt, 1, cout), jnp.float32)] * 2
        stat_spec = pl.BlockSpec((1, 1, cout), lambda n, mt: (n * n_mt + mt, 0, 0))
        out_specs += [stat_spec, stat_spec]

    cost = pl.CostEstimate(
        flops=2 * N * M * K * cout,
        transcendentals=(N * M * cout) if out_tanh else 0,
        bytes_accessed=int(a.size * 2 + wk.size * 2
                           + N * M * cout * jnp.dtype(out_dtype).itemsize))

    res = pl.pallas_call(
        functools.partial(_gemm_kernel, out_tanh=out_tanh, want_stats=want_stats),
        out_shape=tuple(out_shape),
        grid=grid,
        in_specs=[
            pl.BlockSpec((1, tm, K), lambda n, mt: (n, mt, 0)),
            # TODO(synk): weight/bias blocks are grid-invariant; pl.Buffered(1)
            # would halve their VMEM footprint once single-buffering is safe.
            pl.BlockSpec((K, cout), lambda n, mt: (0, 0)),
            pl.BlockSpec((1, cout), lambda n, mt: (0, 0)),
        ],
        out_specs=tuple(out_specs),
        compiler_params=pltpu.CompilerParams(
            dimension_semantics=("parallel", "parallel")),
        cost_estimate=cost,
    )(a, wk, b)

    if want_stats:
        y, s1, s2 = res
    else:
        y = res[0] if isinstance(res, (tuple, list)) else res
        s1 = s2 = None
    return y.reshape(N, OH, OW, cout), s1, s2


def pallas_convT4x4s2(groups, w_torch, bias, *, want_stats=True, out_tanh=False,
                      out_dtype=jnp.bfloat16, pad_cout=None):
    """PyTorch ConvTranspose2d(k=4,s=2,p=1) on NHWC input; returns (y, sum, sumsq)."""
    x = _prologue(groups)                                      # (N, H, W, cin) bf16
    N, H, W, cin = x.shape
    M = H * W
    K = 4 * cin
    cout = int(w_torch.shape[1])

    # Per-output-parity tap-stacked A operand (sub-pixel decomposition).
    xp = jnp.pad(x, ((0, 0), (1, 1), (1, 1), (0, 0)))          # (N, H+2, W+2, cin)
    par = []
    for oy in range(2):
        for ox in range(2):
            taps = [xp[:, oy + ty:oy + ty + H, ox + tx:ox + tx + W, :]
                    for ty in range(2) for tx in range(2)]
            par.append(jnp.concatenate(taps, axis=-1))         # (N, H, W, 4*cin)
    a = jnp.stack(par, axis=1).reshape(N, 4, M, K)

    wk = _reorg_convT_w(w_torch).astype(jnp.bfloat16)          # (4, K, cout)
    b = (jnp.zeros((cout,), jnp.float32) if bias is None
         else bias.astype(jnp.float32))
    ce = cout
    if pad_cout is not None and pad_cout > cout:               # lane-dense store
        wk = jnp.pad(wk, ((0, 0), (0, 0), (0, pad_cout - cout)))
        b = jnp.pad(b, (0, pad_cout - cout))
        ce = pad_cout
    b = b.reshape(1, ce)

    tm = _m_tile(M)
    n_mt = M // tm
    grid = (N, 4, n_mt)

    out_shape = [jax.ShapeDtypeStruct((N, 4, M, ce), out_dtype)]
    out_specs = [pl.BlockSpec((1, 1, tm, ce), lambda n, p, mt: (n, p, mt, 0))]
    if want_stats:
        out_shape += [jax.ShapeDtypeStruct((N * 4 * n_mt, 1, ce), jnp.float32)] * 2
        stat_spec = pl.BlockSpec(
            (1, 1, ce), lambda n, p, mt: ((n * 4 + p) * n_mt + mt, 0, 0))
        out_specs += [stat_spec, stat_spec]

    cost = pl.CostEstimate(
        flops=2 * N * 4 * M * K * ce,
        transcendentals=(N * 4 * M * ce) if out_tanh else 0,
        bytes_accessed=int(a.size * 2 + wk.size * 2
                           + N * 4 * M * ce * jnp.dtype(out_dtype).itemsize))

    res = pl.pallas_call(
        functools.partial(_gemm_kernel, out_tanh=out_tanh, want_stats=want_stats),
        out_shape=tuple(out_shape),
        grid=grid,
        in_specs=[
            pl.BlockSpec((1, 1, tm, K), lambda n, p, mt: (n, p, mt, 0)),
            pl.BlockSpec((1, K, ce), lambda n, p, mt: (p, 0, 0)),
            pl.BlockSpec((1, ce), lambda n, p, mt: (0, 0)),
        ],
        out_specs=tuple(out_specs),
        compiler_params=pltpu.CompilerParams(
            dimension_semantics=("parallel", "parallel", "parallel")),
        cost_estimate=cost,
    )(a, wk, b)

    if want_stats:
        y, s1, s2 = res
    else:
        y = res[0] if isinstance(res, (tuple, list)) else res
        s1 = s2 = None

    if ce != cout:                                             # drop padded channels
        y = y[..., :cout]
    # pixel-shuffle the 4 output parities: (N, 4, H*W, C) -> (N, 2H, 2W, C)
    y = y.reshape(N, 2, 2, H, W, cout).transpose(0, 3, 1, 4, 2, 5)
    y = y.reshape(N, 2 * H, 2 * W, cout)
    return y, s1, s2


def pallas_mid_fused(y5, sc5, sh5, w_mid, w_up1, b_up1, w_upf1, b_upf1):
    """Fused midrelu1 -> midcon -> midrelu2 -> (up1 || upf1): 2x2 -> 1x1 -> 2x2."""
    N, H, W, C = y5.shape                                      # H == W == 2
    x6 = _prologue([(y5, sc5, sh5, jnp.full((C,), 0.2, jnp.float32))])
    a = x6.reshape(N, 1, 4 * C)                                # (dh, dw, ci) row-major

    # midcon: only the 4 interior taps of the 1-padded 2x2 input are non-zero.
    cm = int(w_mid.shape[0])
    wm = jnp.concatenate(
        [jnp.transpose(w_mid[:, :, 1 + dh, 1 + dw], (1, 0))
         for dh in range(2) for dw in range(2)],
        axis=0).astype(jnp.bfloat16)                           # (4*C, cm)

    # up1 / upf1 on a 1x1 input: output parity (oy,ox) uses kernel tap (1+oy,1+ox).
    w_cat = jnp.concatenate([w_up1, w_upf1], axis=1)           # (cm, Cu, 4, 4)
    cu = int(w_cat.shape[1])
    wu = jnp.concatenate([w_cat[:, :, 1 + oy, 1 + ox]
                          for oy in range(2) for ox in range(2)],
                         axis=1).astype(jnp.bfloat16)          # (cm, 4*Cu)
    bu = jnp.tile(jnp.concatenate([b_up1, b_upf1], axis=0).astype(jnp.float32),
                  (4,)).reshape(1, 4 * cu)

    cost = pl.CostEstimate(
        flops=2 * N * (4 * C * cm + cm * 4 * cu),
        transcendentals=0,
        bytes_accessed=int(a.size * 2 + wm.size * 2 + wu.size * 2 + N * 4 * cu * 4))

    y = pl.pallas_call(
        _mid_kernel,
        out_shape=jax.ShapeDtypeStruct((N, 1, 4 * cu), jnp.float32),
        grid=(N,),
        in_specs=[
            pl.BlockSpec((1, 1, 4 * C), lambda n: (n, 0, 0)),
            pl.BlockSpec((4 * C, cm), lambda n: (0, 0)),
            pl.BlockSpec((cm, 4 * cu), lambda n: (0, 0)),
            pl.BlockSpec((1, 4 * cu), lambda n: (0, 0)),
        ],
        out_specs=pl.BlockSpec((1, 1, 4 * cu), lambda n: (n, 0, 0)),
        compiler_params=pltpu.CompilerParams(dimension_semantics=("parallel",)),
        cost_estimate=cost,
    )(a, wm, wu, bu)
    # parity index == output spatial position for a 1x1 input
    return y.reshape(N, 2, 2, cu)


# ----------------------------------------------------------------------------
# Parameters (deterministic synthetic init, PyTorch layouts)
# ----------------------------------------------------------------------------
def init_params(key, input_nc, output_nc, ngf):
    params = {}

    def nxt(shape, scale=0.05):
        nonlocal key
        key, sub = jax.random.split(key)
        return scale * jax.random.normal(sub, shape, dtype=jnp.float32)

    def add_block_d(name, inc, ouc):  # LeakyReLU -> Conv(bias) -> BN
        params[name + ".w"] = nxt((ouc, inc, 4, 4))
        params[name + ".b"] = nxt((ouc,))
        params[name + ".gamma"] = 1.0 + nxt((ouc,))
        params[name + ".beta"] = nxt((ouc,))

    def add_block_w(name, inc, ouc):  # ReLU -> ConvT(bias) -> BN
        params[name + ".w"] = nxt((inc, ouc, 4, 4))
        params[name + ".b"] = nxt((ouc,))
        params[name + ".gamma"] = 1.0 + nxt((ouc,))
        params[name + ".beta"] = nxt((ouc,))

    params["first_con.w"] = nxt((ngf, input_nc, 4, 4))         # bias=False
    add_block_d("down1", ngf, ngf * 2)
    add_block_d("down2", ngf * 2, ngf * 4)
    add_block_d("down3", ngf * 4, ngf * 8)
    add_block_d("down4", ngf * 8, ngf * 8)
    params["midcon.w"] = nxt((ngf * 8, ngf * 8, 4, 4))         # bias=False

    params["up1.w"] = nxt((ngf * 8, ngf * 8, 4, 4))
    params["up1.b"] = nxt((ngf * 8,))
    params["up2.gamma"] = 1.0 + nxt((ngf * 8,))
    params["up2.beta"] = nxt((ngf * 8,))
    add_block_w("upw1", ngf * 16, ngf * 8)
    add_block_w("upw2", ngf * 16, ngf * 4)
    add_block_w("upw3", ngf * 8, ngf * 2)
    add_block_w("upw4", ngf * 4, ngf)
    params["upw6.w"] = nxt((ngf * 2, output_nc, 4, 4))
    params["upw6.b"] = nxt((output_nc,))

    params["upf1.w"] = nxt((ngf * 8, ngf * 8, 4, 4))
    params["upf1.b"] = nxt((ngf * 8,))
    params["upf2.gamma"] = 1.0 + nxt((ngf * 8,))
    params["upf2.beta"] = nxt((ngf * 8,))
    add_block_w("upwf1", ngf * 16, ngf * 8)
    add_block_w("upwf2", ngf * 16, ngf * 4)
    add_block_w("upwf3", ngf * 8, ngf * 2)
    add_block_w("upwf4", ngf * 4, ngf)
    params["upwf6.w"] = nxt((ngf * 2, 34, 4, 4))
    params["upwf6.b"] = nxt((34,))
    return params


# ----------------------------------------------------------------------------
# Forward pass (mirrors cheng_UnetGenerator.forward, BatchNorm in train mode)
# ----------------------------------------------------------------------------
def forward(params, x_nchw):
    p = params
    f32 = jnp.float32
    x = jnp.transpose(x_nchw, (0, 2, 3, 1))                    # NHWC

    def ident_affine(C):
        return jnp.ones((C,), f32), jnp.zeros((C,), f32)

    def grp(y, sc, sh, slope):
        # (tensor, BN scale, BN shift, leak slope): 1.0=identity, 0.0=ReLU,
        # 0.2=LeakyReLU(0.2), all applied AFTER the affine.
        return (y, sc, sh, jnp.full((y.shape[-1],), slope, f32))

    def bn_affine(s1, s2, count, gamma, beta, eps=1e-5):
        # PyTorch training-mode BN: batch statistics, biased variance.
        # TODO(synk): one-pass E[x^2]-E[x]^2 can cancel when |mean| >> std.
        tot = jnp.sum(s1, axis=(0, 1))
        tot2 = jnp.sum(s2, axis=(0, 1))
        mean = tot / count
        var = jnp.maximum(tot2 / count - mean * mean, 0.0)
        scale = gamma / jnp.sqrt(var + eps)
        shift = beta - mean * scale
        return scale, shift

    # ---------------- encoder ----------------
    sc0, sh0 = ident_affine(x.shape[-1])
    y1, _, _ = pallas_conv4x4s2([grp(x, sc0, sh0, 1.0)], p["first_con.w"], None,
                                want_stats=False)
    sc1, sh1 = ident_affine(y1.shape[-1])                      # x1 has no BN

    def down(name, y_prev, sc_prev, sh_prev):                  # LReLU -> Conv -> BN
        y, s1, s2 = pallas_conv4x4s2([grp(y_prev, sc_prev, sh_prev, 0.2)],
                                     p[name + ".w"], p[name + ".b"])
        n_, oh, ow, _ = y.shape
        sc, sh = bn_affine(s1, s2, n_ * oh * ow,
                           p[name + ".gamma"], p[name + ".beta"])
        return y, sc, sh

    y2, sc2, sh2 = down("down1", y1, sc1, sh1)
    y3, sc3, sh3 = down("down2", y2, sc2, sh2)
    y4, sc4, sh4 = down("down3", y3, sc3, sh3)
    y5, sc5, sh5 = down("down4", y4, sc4, sh4)

    # ---- fused mid: LReLU(BN(x5)) -> midcon -> ReLU -> (up1 || upf1) ----
    y9 = pallas_mid_fused(y5, sc5, sh5, p["midcon.w"],
                          p["up1.w"], p["up1.b"], p["upf1.w"], p["upf1.b"])
    gamma9 = jnp.concatenate([p["up2.gamma"], p["upf2.gamma"]], axis=0)
    beta9 = jnp.concatenate([p["up2.beta"], p["upf2.beta"]], axis=0)
    mean9 = jnp.mean(y9, axis=(0, 1, 2))                       # tiny (N*4 per channel)
    var9 = jnp.maximum(jnp.mean(y9 * y9, axis=(0, 1, 2)) - mean9 * mean9, 0.0)
    sc9 = gamma9 / jnp.sqrt(var9 + 1e-5)
    sh9 = beta9 - mean9 * sc9

    cw = p["up1.b"].shape[0]                                   # ngf*8
    y9w, y9f = y9[..., :cw], y9[..., cw:]
    sc9w, sh9w, sc9f, sh9f = sc9[:cw], sh9[:cw], sc9[cw:], sh9[cw:]

    def up_block(name, y_a, sc_a, sh_a, y_b, sc_b, sh_b):
        # ReLU(concat(BN(y_a), BN(y_b))) -> ConvT -> BN
        y, s1, s2 = pallas_convT4x4s2(
            [grp(y_a, sc_a, sh_a, 0.0), grp(y_b, sc_b, sh_b, 0.0)],
            p[name + ".w"], p[name + ".b"])
        n2, oh, ow, _ = y.shape
        sc, sh = bn_affine(s1, s2, n2 * oh * ow,
                           p[name + ".gamma"], p[name + ".beta"])
        return y, sc, sh

    # ---- main (w) decoder ----
    y11, sc11, sh11 = up_block("upw1", y9w, sc9w, sh9w, y5, sc5, sh5)
    y12, sc12, sh12 = up_block("upw2", y11, sc11, sh11, y4, sc4, sh4)
    y13, sc13, sh13 = up_block("upw3", y12, sc12, sh12, y3, sc3, sh3)
    y14, sc14, sh14 = up_block("upw4", y13, sc13, sh13, y2, sc2, sh2)
    # x15 = ReLU(BN(y14)); concat raw x1; x16 = upw6(.); x17 = tanh(x16)
    x17, _, _ = pallas_convT4x4s2(
        [grp(y14, sc14, sh14, 0.0), grp(y1, sc1, sh1, 1.0)],
        p["upw6.w"], p["upw6.b"], want_stats=False, out_tanh=True,
        out_dtype=jnp.float32, pad_cout=128)

    # ---- flow (f) decoder ----
    yf11, scf11, shf11 = up_block("upwf1", y9f, sc9f, sh9f, y5, sc5, sh5)
    yf12, scf12, shf12 = up_block("upwf2", yf11, scf11, shf11, y4, sc4, sh4)
    yf13, scf13, shf13 = up_block("upwf3", yf12, scf12, shf12, y3, sc3, sh3)
    yf14, scf14, shf14 = up_block("upwf4", yf13, scf13, shf13, y2, sc2, sh2)
    xf17, _, _ = pallas_convT4x4s2(
        [grp(yf14, scf14, shf14, 0.0), grp(y1, sc1, sh1, 1.0)],
        p["upwf6.w"], p["upwf6.b"], want_stats=False, out_tanh=True,
        out_dtype=jnp.float32, pad_cout=128)

    # channel softmax on the (fast) lane axis, then back to NCHW like PyTorch
    sx = jax.nn.softmax(xf17[..., 0:17], axis=-1)
    sy = jax.nn.softmax(xf17[..., 17:34], axis=-1)
    to_nchw = lambda t: jnp.transpose(t, (0, 3, 1, 2))
    return to_nchw(sx), to_nchw(sy), to_nchw(x17)


# ----------------------------------------------------------------------------
if __name__ == "__main__":
    # 6 hard-wired downsamplings in the reference module require H = W >= 64.
    batch, input_nc, output_nc, ngf = 2, 3, 3, 8
    H = W = 64

    key = jax.random.PRNGKey(0)
    kx, kp = jax.random.split(key)
    x = jax.random.normal(kx, (batch, input_nc, H, W), dtype=jnp.float32)
    params = init_params(kp, input_nc, output_nc, ngf)

    fwd = jax.jit(forward)
    sx, sy, x17 = fwd(params, x)
    jax.block_until_ready((sx, sy, x17))

    assert sx.shape == (batch, 17, H, W)
    assert sy.shape == (batch, 17, H, W)
    assert x17.shape == (batch, output_nc, H, W)
    print("KERNEL_OK")
</pallas_src>

<mosaic_0001>
module attributes {stable_mosaic.version = 11 : i64} {
  func.func @_gemm_kernel(%arg0: i32, %arg1: i32, %arg2: memref<1x256x48xbf16, #tpu.memory_space<vmem>>, %arg3: memref<48x8xbf16, #tpu.memory_space<vmem>>, %arg4: memref<1x8xf32, #tpu.memory_space<vmem>>, %arg5: memref<1x256x8xbf16, #tpu.memory_space<vmem>>) attributes {dimension_semantics = [#tpu.dimension_semantics<parallel>, #tpu.dimension_semantics<parallel>], iteration_bounds = array<i64: 2, 4>, scalar_prefetch = 0 : i64, scratch_operands = 0 : i64, tpu.core_type = #tpu.core_type<tc>, window_params = [{transform_indices = @transform_0, window_bounds = array<i64: 1, 256, 48>}, {pipeline_mode = #tpu.pipeline_mode<synchronous>, transform_indices = @transform_1, window_bounds = array<i64: 48, 8>}, {pipeline_mode = #tpu.pipeline_mode<synchronous>, transform_indices = @transform_2, window_bounds = array<i64: 1, 8>}, {transform_indices = @transform_3, window_bounds = array<i64: 1, 256, 8>}]} {
    %c0 = arith.constant 0 : index
    %c0_0 = arith.constant 0 : index
    %c0_1 = arith.constant 0 : index
    %0 = vector.load %arg2[%c0, %c0_0, %c0_1] : memref<1x256x48xbf16, #tpu.memory_space<vmem>>, vector<1x256x48xbf16>
    %1 = vector.shape_cast %0 : vector<1x256x48xbf16> to vector<256x48xbf16>
    %c0_2 = arith.constant 0 : index
    %c0_3 = arith.constant 0 : index
    %2 = vector.load %arg3[%c0_2, %c0_3] : memref<48x8xbf16, #tpu.memory_space<vmem>>, vector<48x8xbf16>
    %cst = arith.constant dense<0.000000e+00> : vector<256x8xf32>
    %3 = tpu.matmul %1, %2, %cst {dimension_numbers = #tpu.dot_dimension_numbers<[1], [0], [0], [1], [0, 0, 1, 1], [], []>} : vector<256x48xbf16>, vector<48x8xbf16>, vector<256x8xf32> -> vector<256x8xf32>
    %c0_4 = arith.constant 0 : index
    %c0_5 = arith.constant 0 : index
    %4 = vector.load %arg4[%c0_4, %c0_5] : memref<1x8xf32, #tpu.memory_space<vmem>>, vector<1x8xf32>
    %5 = vector.broadcast %4 : vector<1x8xf32> to vector<256x8xf32>
    %6 = arith.addf %3, %5 : vector<256x8xf32>
    %7 = vector.shape_cast %6 : vector<256x8xf32> to vector<1x256x8xf32>
    %8 = arith.truncf %7 : vector<1x256x8xf32> to vector<1x256x8xbf16>
    %c0_6 = arith.constant 0 : index
    %c0_7 = arith.constant 0 : index
    %c0_8 = arith.constant 0 : index
    %9 = vector.load %arg5[%c0_6, %c0_7, %c0_8] : memref<1x256x8xbf16, #tpu.memory_space<vmem>>, vector<1x256x8xbf16>
    tpu.vector_store %arg5[%c0_6, %c0_7, %c0_8], %8 {strides = array<i32>} : memref<1x256x8xbf16, #tpu.memory_space<vmem>>, vector<1x256x8xbf16>,
    return
  }
  func.func @transform_0(%arg0: i32, %arg1: i32) -> (i32, i32, i32) {
    %c0_i32 = arith.constant 0 : i32
    %c0_i32_0 = arith.constant 0 : i32
    return %arg0, %arg1, %c0_i32 : i32, i32, i32
  }
  func.func @transform_1(%arg0: i32, %arg1: i32) -> (i32, i32) {
    %c0_i32 = arith.constant 0 : i32
    %c0_i32_0 = arith.constant 0 : i32
    %c0_i32_1 = arith.constant 0 : i32
    return %c0_i32, %c0_i32_0 : i32, i32
  }
  func.func @transform_2(%arg0: i32, %arg1: i32) -> (i32, i32) {
    %c0_i32 = arith.constant 0 : i32
    %c0_i32_0 = arith.constant 0 : i32
    %c0_i32_1 = arith.constant 0 : i32
    return %c0_i32, %c0_i32_0 : i32, i32
  }
  func.func @transform_3(%arg0: i32, %arg1: i32) -> (i32, i32, i32) {
    %c0_i32 = arith.constant 0 : i32
    %c0_i32_0 = arith.constant 0 : i32
    return %arg0, %arg1, %c0_i32 : i32, i32, i32
  }
}

module attributes {stable_mosaic.version = 11 : i64} {
  func.func @_gemm_kernel(%arg0: i32, %arg1: i32, %arg2: memref<1x256x128xbf16, #tpu.memory_space<vmem>>, %arg3: memref<128x16xbf16, #tpu.memory_space<vmem>>, %arg4: memref<1x16xf32, #tpu.memory_space<vmem>>, %arg5: memref<1x256x16xbf16, #tpu.memory_space<vmem>>, %arg6: memref<1x1x16xf32, #tpu.memory_space<vmem>>, %arg7: memref<1x1x16xf32, #tpu.memory_space<vmem>>) attributes {dimension_semantics = [#tpu.dimension_semantics<parallel>, #tpu.dimension_semantics<parallel>], iteration_bounds = array<i64: 2, 1>, scalar_prefetch = 0 : i64, scratch_operands = 0 : i64, tpu.core_type = #tpu.core_type<tc>, window_params = [{transform_indices = @transform_0, window_bounds = array<i64: 1, 256, 128>}, {pipeline_mode = #tpu.pipeline_mode<synchronous>, transform_indices = @transform_1, window_bounds = array<i64: 128, 16>}, {pipeline_mode = #tpu.pipeline_mode<synchronous>, transform_indices = @transform_2, window_bounds = array<i64: 1, 16>}, {transform_indices = @transform_3, window_bounds = array<i64: 1, 256, 16>}, {transform_indices = @transform_4, window_bounds = array<i64: 1, 1, 16>}, {transform_indices = @transform_5, window_bounds = array<i64: 1, 1, 16>}]} {
    %c0 = arith.constant 0 : index
    %c0_0 = arith.constant 0 : index
    %c0_1 = arith.constant 0 : index
    %0 = vector.load %arg2[%c0, %c0_0, %c0_1] : memref<1x256x128xbf16, #tpu.memory_space<vmem>>, vector<1x256x128xbf16>
    %1 = vector.shape_cast %0 : vector<1x256x128xbf16> to vector<256x128xbf16>
    %c0_2 = arith.constant 0 : index
    %c0_3 = arith.constant 0 : index
    %2 = vector.load %arg3[%c0_2, %c0_3] : memref<128x16xbf16, #tpu.memory_space<vmem>>, vector<128x16xbf16>
    %cst = arith.constant dense<0.000000e+00> : vector<256x16xf32>
    %3 = tpu.matmul %1, %2, %cst {dimension_numbers = #tpu.dot_dimension_numbers<[1], [0], [0], [1], [0, 0, 1, 1], [], []>} : vector<256x128xbf16>, vector<128x16xbf16>, vector<256x16xf32> -> vector<256x16xf32>
    %c0_4 = arith.constant 0 : index
    %c0_5 = arith.constant 0 : index
    %4 = vector.load %arg4[%c0_4, %c0_5] : memref<1x16xf32, #tpu.memory_space<vmem>>, vector<1x16xf32>
    %5 = vector.broadcast %4 : vector<1x16xf32> to vector<256x16xf32>
    %6 = arith.addf %3, %5 : vector<256x16xf32>
    %cst_6 = arith.constant dense<0.000000e+00> : vector<16xf32>
    %7 = vector.multi_reduction <add>, %6, %cst_6 [0] : vector<256x16xf32> to vector<16xf32>
    %8 = vector.shape_cast %7 : vector<16xf32> to vector<1x16xf32>
    %c0_7 = arith.constant 0 : index
    %c0_8 = arith.constant 0 : index
    %c0_9 = arith.constant 0 : index
    %9 = vector.load %arg6[%c0_7, %c0_8, %c0_9] : memref<1x1x16xf32, #tpu.memory_space<vmem>>, vector<1x1x16xf32>
    %10 = vector.shape_cast %9 : vector<1x1x16xf32> to vector<1x16xf32>
    %11 = vector.shape_cast %8 : vector<1x16xf32> to vector<1x1x16xf32>
    tpu.vector_store %arg6[%c0_7, %c0_8, %c0_9], %11 {strides = array<i32>} : memref<1x1x16xf32, #tpu.memory_space<vmem>>, vector<1x1x16xf32>,
    %12 = arith.mulf %6, %6 : vector<256x16xf32>
    %cst_10 = arith.constant dense<0.000000e+00> : vector<16xf32>
    %13 = vector.multi_reduction <add>, %12, %cst_10 [0] : vector<256x16xf32> to vector<16xf32>
    %14 = vector.shape_cast %13 : vector<16xf32> to vector<1x16xf32>
    %c0_11 = arith.constant 0 : index
    %c0_12 = arith.constant 0 : index
    %c0_13 = arith.constant 0 : index
    %15 = vector.load %arg7[%c0_11, %c0_12, %c0_13] : memref<1x1x16xf32, #tpu.memory_space<vmem>>, vector<1x1x16xf32>
    %16 = vector.shape_cast %15 : vector<1x1x16xf32> to vector<1x16xf32>
    %17 = vector.shape_cast %14 : vector<1x16xf32> to vector<1x1x16xf32>
    tpu.vector_store %arg7[%c0_11, %c0_12, %c0_13], %17 {strides = array<i32>} : memref<1x1x16xf32, #tpu.memory_space<vmem>>, vector<1x1x16xf32>,
    %18 = vector.shape_cast %6 : vector<256x16xf32> to vector<1x256x16xf32>
    %19 = arith.truncf %18 : vector<1x256x16xf32> to vector<1x256x16xbf16>
    %c0_14 = arith.constant 0 : index
    %c0_15 = arith.constant 0 : index
    %c0_16 = arith.constant 0 : index
    %20 = vector.load %arg5[%c0_14, %c0_15, %c0_16] : memref<1x256x16xbf16, #tpu.memory_space<vmem>>, vector<1x256x16xbf16>
    tpu.vector_store %arg5[%c0_14, %c0_15, %c0_16], %19 {strides = array<i32>} : memref<1x256x16xbf16, #tpu.memory_space<vmem>>, vector<1x256x16xbf16>,
    return
  }
  func.func @transform_0(%arg0: i32, %arg1: i32) -> (i32, i32, i32) {
    %c0_i32 = arith.constant 0 : i32
    %c0_i32_0 = arith.constant 0 : i32
    return %arg0, %arg1, %c0_i32 : i32, i32, i32
  }
  func.func @transform_1(%arg0: i32, %arg1: i32) -> (i32, i32) {
    %c0_i32 = arith.constant 0 : i32
    %c0_i32_0 = arith.constant 0 : i32
    %c0_i32_1 = arith.constant 0 : i32
    return %c0_i32, %c0_i32_0 : i32, i32
  }
  func.func @transform_2(%arg0: i32, %arg1: i32) -> (i32, i32) {
    %c0_i32 = arith.constant 0 : i32
    %c0_i32_0 = arith.constant 0 : i32
    %c0_i32_1 = arith.constant 0 : i32
    return %c0_i32, %c0_i32_0 : i32, i32
  }
  func.func @transform_3(%arg0: i32, %arg1: i32) -> (i32, i32, i32) {
    %c0_i32 = arith.constant 0 : i32
    %c0_i32_0 = arith.constant 0 : i32
    return %arg0, %arg1, %c0_i32 : i32, i32, i32
  }
  func.func @transform_4(%arg0: i32, %arg1: i32) -> (i32, i32, i32) {
    %c1_i32 = arith.constant 1 : i32
    %0 = arith.muli %arg0, %c1_i32 : i32
    %1 = arith.addi %0, %arg1 : i32
    %c0_i32 = arith.constant 0 : i32
    %c0_i32_0 = arith.constant 0 : i32
    %c0_i32_1 = arith.constant 0 : i32
    return %1, %c0_i32, %c0_i32_0 : i32, i32, i32
  }
  func.func @transform_5(%arg0: i32, %arg1: i32) -> (i32, i32, i32) {
    %c1_i32 = arith.constant 1 : i32
    %0 = arith.muli %arg0, %c1_i32 : i32
    %1 = arith.addi %0, %arg1 : i32
    %c0_i32 = arith.constant 0 : i32
    %c0_i32_0 = arith.constant 0 : i32
    %c0_i32_1 = arith.constant 0 : i32
    return %1, %c0_i32, %c0_i32_0 : i32, i32, i32
  }
}

module attributes {stable_mosaic.version = 11 : i64} {
  func.func @_gemm_kernel(%arg0: i32, %arg1: i32, %arg2: memref<1x64x256xbf16, #tpu.memory_space<vmem>>, %arg3: memref<256x32xbf16, #tpu.memory_space<vmem>>, %arg4: memref<1x32xf32, #tpu.memory_space<vmem>>, %arg5: memref<1x64x32xbf16, #tpu.memory_space<vmem>>, %arg6: memref<1x1x32xf32, #tpu.memory_space<vmem>>, %arg7: memref<1x1x32xf32, #tpu.memory_space<vmem>>) attributes {dimension_semantics = [#tpu.dimension_semantics<parallel>, #tpu.dimension_semantics<parallel>], iteration_bounds = array<i64: 2, 1>, scalar_prefetch = 0 : i64, scratch_operands = 0 : i64, tpu.core_type = #tpu.core_type<tc>, window_params = [{transform_indices = @transform_0, window_bounds = array<i64: 1, 64, 256>}, {pipeline_mode = #tpu.pipeline_mode<synchronous>, transform_indices = @transform_1, window_bounds = array<i64: 256, 32>}, {pipeline_mode = #tpu.pipeline_mode<synchronous>, transform_indices = @transform_2, window_bounds = array<i64: 1, 32>}, {transform_indices = @transform_3, window_bounds = array<i64: 1, 64, 32>}, {transform_indices = @transform_4, window_bounds = array<i64: 1, 1, 32>}, {transform_indices = @transform_5, window_bounds = array<i64: 1, 1, 32>}]} {
    %c0 = arith.constant 0 : index
    %c0_0 = arith.constant 0 : index
    %c0_1 = arith.constant 0 : index
    %0 = vector.load %arg2[%c0, %c0_0, %c0_1] : memref<1x64x256xbf16, #tpu.memory_space<vmem>>, vector<1x64x256xbf16>
    %1 = vector.shape_cast %0 : vector<1x64x256xbf16> to vector<64x256xbf16>
    %c0_2 = arith.constant 0 : index
    %c0_3 = arith.constant 0 : index
    %2 = vector.load %arg3[%c0_2, %c0_3] : memref<256x32xbf16, #tpu.memory_space<vmem>>, vector<256x32xbf16>
    %cst = arith.constant dense<0.000000e+00> : vector<64x32xf32>
    %3 = tpu.matmul %1, %2, %cst {dimension_numbers = #tpu.dot_dimension_numbers<[1], [0], [0], [1], [0, 0, 1, 1], [], []>} : vector<64x256xbf16>, vector<256x32xbf16>, vector<64x32xf32> -> vector<64x32xf32>
    %c0_4 = arith.constant 0 : index
    %c0_5 = arith.constant 0 : index
    %4 = vector.load %arg4[%c0_4, %c0_5] : memref<1x32xf32, #tpu.memory_space<vmem>>, vector<1x32xf32>
    %5 = vector.broadcast %4 : vector<1x32xf32> to vector<64x32xf32>
    %6 = arith.addf %3, %5 : vector<64x32xf32>
    %cst_6 = arith.constant dense<0.000000e+00> : vector<32xf32>
    %7 = vector.multi_reduction <add>, %6, %cst_6 [0] : vector<64x32xf32> to vector<32xf32>
    %8 = vector.shape_cast %7 : vector<32xf32> to vector<1x32xf32>
    %c0_7 = arith.constant 0 : index
    %c0_8 = arith.constant 0 : index
    %c0_9 = arith.constant 0 : index
    %9 = vector.load %arg6[%c0_7, %c0_8, %c0_9] : memref<1x1x32xf32, #tpu.memory_space<vmem>>, vector<1x1x32xf32>
    %10 = vector.shape_cast %9 : vector<1x1x32xf32> to vector<1x32xf32>
    %11 = vector.shape_cast %8 : vector<1x32xf32> to vector<1x1x32xf32>
    tpu.vector_store %arg6[%c0_7, %c0_8, %c0_9], %11 {strides = array<i32>} : memref<1x1x32xf32, #tpu.memory_space<vmem>>, vector<1x1x32xf32>,
    %12 = arith.mulf %6, %6 : vector<64x32xf32>
    %cst_10 = arith.constant dense<0.000000e+00> : vector<32xf32>
    %13 = vector.multi_reduction <add>, %12, %cst_10 [0] : vector<64x32xf32> to vector<32xf32>
    %14 = vector.shape_cast %13 : vector<32xf32> to vector<1x32xf32>
    %c0_11 = arith.constant 0 : index
    %c0_12 = arith.constant 0 : index
    %c0_13 = arith.constant 0 : index
    %15 = vector.load %arg7[%c0_11, %c0_12, %c0_13] : memref<1x1x32xf32, #tpu.memory_space<vmem>>, vector<1x1x32xf32>
    %16 = vector.shape_cast %15 : vector<1x1x32xf32> to vector<1x32xf32>
    %17 = vector.shape_cast %14 : vector<1x32xf32> to vector<1x1x32xf32>
    tpu.vector_store %arg7[%c0_11, %c0_12, %c0_13], %17 {strides = array<i32>} : memref<1x1x32xf32, #tpu.memory_space<vmem>>, vector<1x1x32xf32>,
    %18 = vector.shape_cast %6 : vector<64x32xf32> to vector<1x64x32xf32>
    %19 = arith.truncf %18 : vector<1x64x32xf32> to vector<1x64x32xbf16>
    %c0_14 = arith.constant 0 : index
    %c0_15 = arith.constant 0 : index
    %c0_16 = arith.constant 0 : index
    %20 = vector.load %arg5[%c0_14, %c0_15, %c0_16] : memref<1x64x32xbf16, #tpu.memory_space<vmem>>, vector<1x64x32xbf16>
    tpu.vector_store %arg5[%c0_14, %c0_15, %c0_16], %19 {strides = array<i32>} : memref<1x64x32xbf16, #tpu.memory_space<vmem>>, vector<1x64x32xbf16>,
    return
  }
  func.func @transform_0(%arg0: i32, %arg1: i32) -> (i32, i32, i32) {
    %c0_i32 = arith.constant 0 : i32
    %c0_i32_0 = arith.constant 0 : i32
    return %arg0, %arg1, %c0_i32 : i32, i32, i32
  }
  func.func @transform_1(%arg0: i32, %arg1: i32) -> (i32, i32) {
    %c0_i32 = arith.constant 0 : i32
    %c0_i32_0 = arith.constant 0 : i32
    %c0_i32_1 = arith.constant 0 : i32
    return %c0_i32, %c0_i32_0 : i32, i32
  }
  func.func @transform_2(%arg0: i32, %arg1: i32) -> (i32, i32) {
    %c0_i32 = arith.constant 0 : i32
    %c0_i32_0 = arith.constant 0 : i32
    %c0_i32_1 = arith.constant 0 : i32
    return %c0_i32, %c0_i32_0 : i32, i32
  }
  func.func @transform_3(%arg0: i32, %arg1: i32) -> (i32, i32, i32) {
    %c0_i32 = arith.constant 0 : i32
    %c0_i32_0 = arith.constant 0 : i32
    return %arg0, %arg1, %c0_i32 : i32, i32, i32
  }
  func.func @transform_4(%arg0: i32, %arg1: i32) -> (i32, i32, i32) {
    %c1_i32 = arith.constant 1 : i32
    %0 = arith.muli %arg0, %c1_i32 : i32
    %1 = arith.addi %0, %arg1 : i32
    %c0_i32 = arith.constant 0 : i32
    %c0_i32_0 = arith.constant 0 : i32
    %c0_i32_1 = arith.constant 0 : i32
    return %1, %c0_i32, %c0_i32_0 : i32, i32, i32
  }
  func.func @transform_5(%arg0: i32, %arg1: i32) -> (i32, i32, i32) {
    %c1_i32 = arith.constant 1 : i32
    %0 = arith.muli %arg0, %c1_i32 : i32
    %1 = arith.addi %0, %arg1 : i32
    %c0_i32 = arith.constant 0 : i32
    %c0_i32_0 = arith.constant 0 : i32
    %c0_i32_1 = arith.constant 0 : i32
    return %1, %c0_i32, %c0_i32_0 : i32, i32, i32
  }
}

module attributes {stable_mosaic.version = 11 : i64} {
  func.func @_gemm_kernel(%arg0: i32, %arg1: i32, %arg2: memref<1x16x512xbf16, #tpu.memory_space<vmem>>, %arg3: memref<512x64xbf16, #tpu.memory_space<vmem>>, %arg4: memref<1x64xf32, #tpu.memory_space<vmem>>, %arg5: memref<1x16x64xbf16, #tpu.memory_space<vmem>>, %arg6: memref<1x1x64xf32, #tpu.memory_space<vmem>>, %arg7: memref<1x1x64xf32, #tpu.memory_space<vmem>>) attributes {dimension_semantics = [#tpu.dimension_semantics<parallel>, #tpu.dimension_semantics<parallel>], iteration_bounds = array<i64: 2, 1>, scalar_prefetch = 0 : i64, scratch_operands = 0 : i64, tpu.core_type = #tpu.core_type<tc>, window_params = [{transform_indices = @transform_0, window_bounds = array<i64: 1, 16, 512>}, {pipeline_mode = #tpu.pipeline_mode<synchronous>, transform_indices = @transform_1, window_bounds = array<i64: 512, 64>}, {pipeline_mode = #tpu.pipeline_mode<synchronous>, transform_indices = @transform_2, window_bounds = array<i64: 1, 64>}, {transform_indices = @transform_3, window_bounds = array<i64: 1, 16, 64>}, {transform_indices = @transform_4, window_bounds = array<i64: 1, 1, 64>}, {transform_indices = @transform_5, window_bounds = array<i64: 1, 1, 64>}]} {
    %c0 = arith.constant 0 : index
    %c0_0 = arith.constant 0 : index
    %c0_1 = arith.constant 0 : index
    %0 = vector.load %arg2[%c0, %c0_0, %c0_1] : memref<1x16x512xbf16, #tpu.memory_space<vmem>>, vector<1x16x512xbf16>
    %1 = vector.shape_cast %0 : vector<1x16x512xbf16> to vector<16x512xbf16>
    %c0_2 = arith.constant 0 : index
    %c0_3 = arith.constant 0 : index
    %2 = vector.load %arg3[%c0_2, %c0_3] : memref<512x64xbf16, #tpu.memory_space<vmem>>, vector<512x64xbf16>
    %cst = arith.constant dense<0.000000e+00> : vector<16x64xf32>
    %3 = tpu.matmul %1, %2, %cst {dimension_numbers = #tpu.dot_dimension_numbers<[1], [0], [0], [1], [0, 0, 1, 1], [], []>} : vector<16x512xbf16>, vector<512x64xbf16>, vector<16x64xf32> -> vector<16x64xf32>
    %c0_4 = arith.constant 0 : index
    %c0_5 = arith.constant 0 : index
    %4 = vector.load %arg4[%c0_4, %c0_5] : memref<1x64xf32, #tpu.memory_space<vmem>>, vector<1x64xf32>
    %5 = vector.broadcast %4 : vector<1x64xf32> to vector<16x64xf32>
    %6 = arith.addf %3, %5 : vector<16x64xf32>
    %cst_6 = arith.constant dense<0.000000e+00> : vector<64xf32>
    %7 = vector.multi_reduction <add>, %6, %cst_6 [0] : vector<16x64xf32> to vector<64xf32>
    %8 = vector.shape_cast %7 : vector<64xf32> to vector<1x64xf32>
    %c0_7 = arith.constant 0 : index
    %c0_8 = arith.constant 0 : index
    %c0_9 = arith.constant 0 : index
    %9 = vector.load %arg6[%c0_7, %c0_8, %c0_9] : memref<1x1x64xf32, #tpu.memory_space<vmem>>, vector<1x1x64xf32>
    %10 = vector.shape_cast %9 : vector<1x1x64xf32> to vector<1x64xf32>
    %11 = vector.shape_cast %8 : vector<1x64xf32> to vector<1x1x64xf32>
    tpu.vector_store %arg6[%c0_7, %c0_8, %c0_9], %11 {strides = array<i32>} : memref<1x1x64xf32, #tpu.memory_space<vmem>>, vector<1x1x64xf32>,
    %12 = arith.mulf %6, %6 : vector<16x64xf32>
    %cst_10 = arith.constant dense<0.000000e+00> : vector<64xf32>
    %13 = vector.multi_reduction <add>, %12, %cst_10 [0] : vector<16x64xf32> to vector<64xf32>
    %14 = vector.shape_cast %13 : vector<64xf32> to vector<1x64xf32>
    %c0_11 = arith.constant 0 : index
    %c0_12 = arith.constant 0 : index
    %c0_13 = arith.constant 0 : index
    %15 = vector.load %arg7[%c0_11, %c0_12, %c0_13] : memref<1x1x64xf32, #tpu.memory_space<vmem>>, vector<1x1x64xf32>
    %16 = vector.shape_cast %15 : vector<1x1x64xf32> to vector<1x64xf32>
    %17 = vector.shape_cast %14 : vector<1x64xf32> to vector<1x1x64xf32>
    tpu.vector_store %arg7[%c0_11, %c0_12, %c0_13], %17 {strides = array<i32>} : memref<1x1x64xf32, #tpu.memory_space<vmem>>, vector<1x1x64xf32>,
    %18 = vector.shape_cast %6 : vector<16x64xf32> to vector<1x16x64xf32>
    %19 = arith.truncf %18 : vector<1x16x64xf32> to vector<1x16x64xbf16>
    %c0_14 = arith.constant 0 : index
    %c0_15 = arith.constant 0 : index
    %c0_16 = arith.constant 0 : index
    %20 = vector.load %arg5[%c0_14, %c0_15, %c0_16] : memref<1x16x64xbf16, #tpu.memory_space<vmem>>, vector<1x16x64xbf16>
    tpu.vector_store %arg5[%c0_14, %c0_15, %c0_16], %19 {strides = array<i32>} : memref<1x16x64xbf16, #tpu.memory_space<vmem>>, vector<1x16x64xbf16>,
    return
  }
  func.func @transform_0(%arg0: i32, %arg1: i32) -> (i32, i32, i32) {
    %c0_i32 = arith.constant 0 : i32
    %c0_i32_0 = arith.constant 0 : i32
    return %arg0, %arg1, %c0_i32 : i32, i32, i32
  }
  func.func @transform_1(%arg0: i32, %arg1: i32) -> (i32, i32) {
    %c0_i32 = arith.constant 0 : i32
    %c0_i32_0 = arith.constant 0 : i32
    %c0_i32_1 = arith.constant 0 : i32
    return %c0_i32, %c0_i32_0 : i32, i32
  }
  func.func @transform_2(%arg0: i32, %arg1: i32) -> (i32, i32) {
    %c0_i32 = arith.constant 0 : i32
    %c0_i32_0 = arith.constant 0 : i32
    %c0_i32_1 = arith.constant 0 : i32
    return %c0_i32, %c0_i32_0 : i32, i32
  }
  func.func @transform_3(%arg0: i32, %arg1: i32) -> (i32, i32, i32) {
    %c0_i32 = arith.constant 0 : i32
    %c0_i32_0 = arith.constant 0 : i32
    return %arg0, %arg1, %c0_i32 : i32, i32, i32
  }
  func.func @transform_4(%arg0: i32, %arg1: i32) -> (i32, i32, i32) {
    %c1_i32 = arith.constant 1 : i32
    %0 = arith.muli %arg0, %c1_i32 : i32
    %1 = arith.addi %0, %arg1 : i32
    %c0_i32 = arith.constant 0 : i32
    %c0_i32_0 = arith.constant 0 : i32
    %c0_i32_1 = arith.constant 0 : i32
    return %1, %c0_i32, %c0_i32_0 : i32, i32, i32
  }
  func.func @transform_5(%arg0: i32, %arg1: i32) -> (i32, i32, i32) {
    %c1_i32 = arith.constant 1 : i32
    %0 = arith.muli %arg0, %c1_i32 : i32
    %1 = arith.addi %0, %arg1 : i32
    %c0_i32 = arith.constant 0 : i32
    %c0_i32_0 = arith.constant 0 : i32
    %c0_i32_1 = arith.constant 0 : i32
    return %1, %c0_i32, %c0_i32_0 : i32, i32, i32
  }
}

module attributes {stable_mosaic.version = 11 : i64} {
  func.func @_gemm_kernel(%arg0: i32, %arg1: i32, %arg2: memref<1x4x1024xbf16, #tpu.memory_space<vmem>>, %arg3: memref<1024x64xbf16, #tpu.memory_space<vmem>>, %arg4: memref<1x64xf32, #tpu.memory_space<vmem>>, %arg5: memref<1x4x64xbf16, #tpu.memory_space<vmem>>, %arg6: memref<1x1x64xf32, #tpu.memory_space<vmem>>, %arg7: memref<1x1x64xf32, #tpu.memory_space<vmem>>) attributes {dimension_semantics = [#tpu.dimension_semantics<parallel>, #tpu.dimension_semantics<parallel>], iteration_bounds = array<i64: 2, 1>, scalar_prefetch = 0 : i64, scratch_operands = 0 : i64, tpu.core_type = #tpu.core_type<tc>, window_params = [{transform_indices = @transform_0, window_bounds = array<i64: 1, 4, 1024>}, {pipeline_mode = #tpu.pipeline_mode<synchronous>, transform_indices = @transform_1, window_bounds = array<i64: 1024, 64>}, {pipeline_mode = #tpu.pipeline_mode<synchronous>, transform_indices = @transform_2, window_bounds = array<i64: 1, 64>}, {transform_indices = @transform_3, window_bounds = array<i64: 1, 4, 64>}, {transform_indices = @transform_4, window_bounds = array<i64: 1, 1, 64>}, {transform_indices = @transform_5, window_bounds = array<i64: 1, 1, 64>}]} {
    %c0 = arith.constant 0 : index
    %c0_0 = arith.constant 0 : index
    %c0_1 = arith.constant 0 : index
    %0 = vector.load %arg2[%c0, %c0_0, %c0_1] : memref<1x4x1024xbf16, #tpu.memory_space<vmem>>, vector<1x4x1024xbf16>
    %1 = vector.shape_cast %0 : vector<1x4x1024xbf16> to vector<4x1024xbf16>
    %c0_2 = arith.constant 0 : index
    %c0_3 = arith.constant 0 : index
    %2 = vector.load %arg3[%c0_2, %c0_3] : memref<1024x64xbf16, #tpu.memory_space<vmem>>, vector<1024x64xbf16>
    %cst = arith.constant dense<0.000000e+00> : vector<4x64xf32>
    %3 = tpu.matmul %1, %2, %cst {dimension_numbers = #tpu.dot_dimension_numbers<[1], [0], [0], [1], [0, 0, 1, 1], [], []>} : vector<4x1024xbf16>, vector<1024x64xbf16>, vector<4x64xf32> -> vector<4x64xf32>
    %c0_4 = arith.constant 0 : index
    %c0_5 = arith.constant 0 : index
    %4 = vector.load %arg4[%c0_4, %c0_5] : memref<1x64xf32, #tpu.memory_space<vmem>>, vector<1x64xf32>
    %5 = vector.broadcast %4 : vector<1x64xf32> to vector<4x64xf32>
    %6 = arith.addf %3, %5 : vector<4x64xf32>
    %cst_6 = arith.constant dense<0.000000e+00> : vector<64xf32>
    %7 = vector.multi_reduction <add>, %6, %cst_6 [0] : vector<4x64xf32> to vector<64xf32>
    %8 = vector.shape_cast %7 : vector<64xf32> to vector<1x64xf32>
    %c0_7 = arith.constant 0 : index
    %c0_8 = arith.constant 0 : index
    %c0_9 = arith.constant 0 : index
    %9 = vector.load %arg6[%c0_7, %c0_8, %c0_9] : memref<1x1x64xf32, #tpu.memory_space<vmem>>, vector<1x1x64xf32>
    %10 = vector.shape_cast %9 : vector<1x1x64xf32> to vector<1x64xf32>
    %11 = vector.shape_cast %8 : vector<1x64xf32> to vector<1x1x64xf32>
    tpu.vector_store %arg6[%c0_7, %c0_8, %c0_9], %11 {strides = array<i32>} : memref<1x1x64xf32, #tpu.memory_space<vmem>>, vector<1x1x64xf32>,
    %12 = arith.mulf %6, %6 : vector<4x64xf32>
    %cst_10 = arith.constant dense<0.000000e+00> : vector<64xf32>
    %13 = vector.multi_reduction <add>, %12, %cst_10 [0] : vector<4x64xf32> to vector<64xf32>
    %14 = vector.shape_cast %13 : vector<64xf32> to vector<1x64xf32>
    %c0_11 = arith.constant 0 : index
    %c0_12 = arith.constant 0 : index
    %c0_13 = arith.constant 0 : index
    %15 = vector.load %arg7[%c0_11, %c0_12, %c0_13] : memref<1x1x64xf32, #tpu.memory_space<vmem>>, vector<1x1x64xf32>
    %16 = vector.shape_cast %15 : vector<1x1x64xf32> to vector<1x64xf32>
    %17 = vector.shape_cast %14 : vector<1x64xf32> to vector<1x1x64xf32>
    tpu.vector_store %arg7[%c0_11, %c0_12, %c0_13], %17 {strides = array<i32>} : memref<1x1x64xf32, #tpu.memory_space<vmem>>, vector<1x1x64xf32>,
    %18 = vector.shape_cast %6 : vector<4x64xf32> to vector<1x4x64xf32>
    %19 = arith.truncf %18 : vector<1x4x64xf32> to vector<1x4x64xbf16>
    %c0_14 = arith.constant 0 : index
    %c0_15 = arith.constant 0 : index
    %c0_16 = arith.constant 0 : index
    %20 = vector.load %arg5[%c0_14, %c0_15, %c0_16] : memref<1x4x64xbf16, #tpu.memory_space<vmem>>, vector<1x4x64xbf16>
    tpu.vector_store %arg5[%c0_14, %c0_15, %c0_16], %19 {strides = array<i32>} : memref<1x4x64xbf16, #tpu.memory_space<vmem>>, vector<1x4x64xbf16>,
    return
  }
  func.func @transform_0(%arg0: i32, %arg1: i32) -> (i32, i32, i32) {
    %c0_i32 = arith.constant 0 : i32
    %c0_i32_0 = arith.constant 0 : i32
    return %arg0, %arg1, %c0_i32 : i32, i32, i32
  }
  func.func @transform_1(%arg0: i32, %arg1: i32) -> (i32, i32) {
    %c0_i32 = arith.constant 0 : i32
    %c0_i32_0 = arith.constant 0 : i32
    %c0_i32_1 = arith.constant 0 : i32
    return %c0_i32, %c0_i32_0 : i32, i32
  }
  func.func @transform_2(%arg0: i32, %arg1: i32) -> (i32, i32) {
    %c0_i32 = arith.constant 0 : i32
    %c0_i32_0 = arith.constant 0 : i32
    %c0_i32_1 = arith.constant 0 : i32
    return %c0_i32, %c0_i32_0 : i32, i32
  }
  func.func @transform_3(%arg0: i32, %arg1: i32) -> (i32, i32, i32) {
    %c0_i32 = arith.constant 0 : i32
    %c0_i32_0 = arith.constant 0 : i32
    return %arg0, %arg1, %c0_i32 : i32, i32, i32
  }
  func.func @transform_4(%arg0: i32, %arg1: i32) -> (i32, i32, i32) {
    %c1_i32 = arith.constant 1 : i32
    %0 = arith.muli %arg0, %c1_i32 : i32
    %1 = arith.addi %0, %arg1 : i32
    %c0_i32 = arith.constant 0 : i32
    %c0_i32_0 = arith.constant 0 : i32
    %c0_i32_1 = arith.constant 0 : i32
    return %1, %c0_i32, %c0_i32_0 : i32, i32, i32
  }
  func.func @transform_5(%arg0: i32, %arg1: i32) -> (i32, i32, i32) {
    %c1_i32 = arith.constant 1 : i32
    %0 = arith.muli %arg0, %c1_i32 : i32
    %1 = arith.addi %0, %arg1 : i32
    %c0_i32 = arith.constant 0 : i32
    %c0_i32_0 = arith.constant 0 : i32
    %c0_i32_1 = arith.constant 0 : i32
    return %1, %c0_i32, %c0_i32_0 : i32, i32, i32
  }
}

module attributes {stable_mosaic.version = 11 : i64} {
  func.func @_mid_kernel(%arg0: i32, %arg1: memref<1x1x256xbf16, #tpu.memory_space<vmem>>, %arg2: memref<256x64xbf16, #tpu.memory_space<vmem>>, %arg3: memref<64x512xbf16, #tpu.memory_space<vmem>>, %arg4: memref<1x512xf32, #tpu.memory_space<vmem>>, %arg5: memref<1x1x512xf32, #tpu.memory_space<vmem>>) attributes {dimension_semantics = [#tpu.dimension_semantics<parallel>], iteration_bounds = array<i64: 2>, scalar_prefetch = 0 : i64, scratch_operands = 0 : i64, tpu.core_type = #tpu.core_type<tc>, window_params = [{transform_indices = @transform_0, window_bounds = array<i64: 1, 1, 256>}, {pipeline_mode = #tpu.pipeline_mode<synchronous>, transform_indices = @transform_1, window_bounds = array<i64: 256, 64>}, {pipeline_mode = #tpu.pipeline_mode<synchronous>, transform_indices = @transform_2, window_bounds = array<i64: 64, 512>}, {pipeline_mode = #tpu.pipeline_mode<synchronous>, transform_indices = @transform_3, window_bounds = array<i64: 1, 512>}, {transform_indices = @transform_4, window_bounds = array<i64: 1, 1, 512>}]} {
    %c0 = arith.constant 0 : index
    %c0_0 = arith.constant 0 : index
    %c0_1 = arith.constant 0 : index
    %0 = vector.load %arg1[%c0, %c0_0, %c0_1] : memref<1x1x256xbf16, #tpu.memory_space<vmem>>, vector<1x1x256xbf16>
    %1 = vector.shape_cast %0 : vector<1x1x256xbf16> to vector<1x256xbf16>
    %c0_2 = arith.constant 0 : index
    %c0_3 = arith.constant 0 : index
    %2 = vector.load %arg2[%c0_2, %c0_3] : memref<256x64xbf16, #tpu.memory_space<vmem>>, vector<256x64xbf16>
    %cst = arith.constant dense<0.000000e+00> : vector<1x64xf32>
    %3 = tpu.matmul %1, %2, %cst {dimension_numbers = #tpu.dot_dimension_numbers<[1], [0], [0], [1], [0, 0, 1, 1], [], []>} : vector<1x256xbf16>, vector<256x64xbf16>, vector<1x64xf32> -> vector<1x64xf32>
    %cst_4 = arith.constant 0.000000e+00 : f32
    %4 = vector.broadcast %cst_4 : f32 to vector<1x64xf32>
    %5 = arith.maximumf %3, %4 : vector<1x64xf32>
    %6 = arith.truncf %5 : vector<1x64xf32> to vector<1x64xbf16>
    %c0_5 = arith.constant 0 : index
    %c0_6 = arith.constant 0 : index
    %7 = vector.load %arg3[%c0_5, %c0_6] : memref<64x512xbf16, #tpu.memory_space<vmem>>, vector<64x512xbf16>
    %cst_7 = arith.constant dense<0.000000e+00> : vector<1x512xf32>
    %8 = tpu.matmul %6, %7, %cst_7 {dimension_numbers = #tpu.dot_dimension_numbers<[1], [0], [0], [1], [0, 0, 1, 1], [], []>} : vector<1x64xbf16>, vector<64x512xbf16>, vector<1x512xf32> -> vector<1x512xf32>
    %c0_8 = arith.constant 0 : index
    %c0_9 = arith.constant 0 : index
    %9 = vector.load %arg4[%c0_8, %c0_9] : memref<1x512xf32, #tpu.memory_space<vmem>>, vector<1x512xf32>
    %10 = arith.addf %8, %9 : vector<1x512xf32>
    %c0_10 = arith.constant 0 : index
    %c0_11 = arith.constant 0 : index
    %c0_12 = arith.constant 0 : index
    %11 = vector.load %arg5[%c0_10, %c0_11, %c0_12] : memref<1x1x512xf32, #tpu.memory_space<vmem>>, vector<1x1x512xf32>
    %12 = vector.shape_cast %11 : vector<1x1x512xf32> to vector<1x512xf32>
    %13 = vector.shape_cast %10 : vector<1x512xf32> to vector<1x1x512xf32>
    tpu.vector_store %arg5[%c0_10, %c0_11, %c0_12], %13 {strides = array<i32>} : memref<1x1x512xf32, #tpu.memory_space<vmem>>, vector<1x1x512xf32>,
    return
  }
  func.func @transform_0(%arg0: i32) -> (i32, i32, i32) {
    %c0_i32 = arith.constant 0 : i32
    %c0_i32_0 = arith.constant 0 : i32
    %c0_i32_1 = arith.constant 0 : i32
    return %arg0, %c0_i32, %c0_i32_0 : i32, i32, i32
  }
  func.func @transform_1(%arg0: i32) -> (i32, i32) {
    %c0_i32 = arith.constant 0 : i32
    %c0_i32_0 = arith.constant 0 : i32
    %c0_i32_1 = arith.constant 0 : i32
    return %c0_i32, %c0_i32_0 : i32, i32
  }
  func.func @transform_2(%arg0: i32) -> (i32, i32) {
    %c0_i32 = arith.constant 0 : i32
    %c0_i32_0 = arith.constant 0 : i32
    %c0_i32_1 = arith.constant 0 : i32
    return %c0_i32, %c0_i32_0 : i32, i32
  }
  func.func @transform_3(%arg0: i32) -> (i32, i32) {
    %c0_i32 = arith.constant 0 : i32
    %c0_i32_0 = arith.constant 0 : i32
    %c0_i32_1 = arith.constant 0 : i32
    return %c0_i32, %c0_i32_0 : i32, i32
  }
  func.func @transform_4(%arg0: i32) -> (i32, i32, i32) {
    %c0_i32 = arith.constant 0 : i32
    %c0_i32_0 = arith.constant 0 : i32
    %c0_i32_1 = arith.constant 0 : i32
    return %arg0, %c0_i32, %c0_i32_0 : i32, i32, i32
  }
}

module attributes {stable_mosaic.version = 11 : i64} {
  func.func @_gemm_kernel(%arg0: i32, %arg1: i32, %arg2: i32, %arg3: memref<1x1x4x512xbf16, #tpu.memory_space<vmem>>, %arg4: memref<1x512x64xbf16, #tpu.memory_space<vmem>>, %arg5: memref<1x64xf32, #tpu.memory_space<vmem>>, %arg6: memref<1x1x4x64xbf16, #tpu.memory_space<vmem>>, %arg7: memref<1x1x64xf32, #tpu.memory_space<vmem>>, %arg8: memref<1x1x64xf32, #tpu.memory_space<vmem>>) attributes {dimension_semantics = [#tpu.dimension_semantics<parallel>, #tpu.dimension_semantics<parallel>, #tpu.dimension_semantics<parallel>], iteration_bounds = array<i64: 2, 4, 1>, scalar_prefetch = 0 : i64, scratch_operands = 0 : i64, tpu.core_type = #tpu.core_type<tc>, window_params = [{transform_indices = @transform_0, window_bounds = array<i64: 1, 1, 4, 512>}, {transform_indices = @transform_1, window_bounds = array<i64: 1, 512, 64>}, {pipeline_mode = #tpu.pipeline_mode<synchronous>, transform_indices = @transform_2, window_bounds = array<i64: 1, 64>}, {transform_indices = @transform_3, window_bounds = array<i64: 1, 1, 4, 64>}, {transform_indices = @transform_4, window_bounds = array<i64: 1, 1, 64>}, {transform_indices = @transform_5, window_bounds = array<i64: 1, 1, 64>}]} {
    %c0 = arith.constant 0 : index
    %c0_0 = arith.constant 0 : index
    %c0_1 = arith.constant 0 : index
    %c0_2 = arith.constant 0 : index
    %0 = vector.load %arg3[%c0, %c0_0, %c0_1, %c0_2] : memref<1x1x4x512xbf16, #tpu.memory_space<vmem>>, vector<1x1x4x512xbf16>
    %1 = vector.shape_cast %0 : vector<1x1x4x512xbf16> to vector<4x512xbf16>
    %c0_3 = arith.constant 0 : index
    %c0_4 = arith.constant 0 : index
    %c0_5 = arith.constant 0 : index
    %2 = vector.load %arg4[%c0_3, %c0_4, %c0_5] : memref<1x512x64xbf16, #tpu.memory_space<vmem>>, vector<1x512x64xbf16>
    %3 = vector.shape_cast %2 : vector<1x512x64xbf16> to vector<512x64xbf16>
    %cst = arith.constant dense<0.000000e+00> : vector<4x64xf32>
    %4 = tpu.matmul %1, %3, %cst {dimension_numbers = #tpu.dot_dimension_numbers<[1], [0], [0], [1], [0, 0, 1, 1], [], []>} : vector<4x512xbf16>, vector<512x64xbf16>, vector<4x64xf32> -> vector<4x64xf32>
    %c0_6 = arith.constant 0 : index
    %c0_7 = arith.constant 0 : index
    %5 = vector.load %arg5[%c0_6, %c0_7] : memref<1x64xf32, #tpu.memory_space<vmem>>, vector<1x64xf32>
    %6 = vector.broadcast %5 : vector<1x64xf32> to vector<4x64xf32>
    %7 = arith.addf %4, %6 : vector<4x64xf32>
    %cst_8 = arith.constant dense<0.000000e+00> : vector<64xf32>
    %8 = vector.multi_reduction <add>, %7, %cst_8 [0] : vector<4x64xf32> to vector<64xf32>
    %9 = vector.shape_cast %8 : vector<64xf32> to vector<1x64xf32>
    %c0_9 = arith.constant 0 : index
    %c0_10 = arith.constant 0 : index
    %c0_11 = arith.constant 0 : index
    %10 = vector.load %arg7[%c0_9, %c0_10, %c0_11] : memref<1x1x64xf32, #tpu.memory_space<vmem>>, vector<1x1x64xf32>
    %11 = vector.shape_cast %10 : vector<1x1x64xf32> to vector<1x64xf32>
    %12 = vector.shape_cast %9 : vector<1x64xf32> to vector<1x1x64xf32>
    tpu.vector_store %arg7[%c0_9, %c0_10, %c0_11], %12 {strides = array<i32>} : memref<1x1x64xf32, #tpu.memory_space<vmem>>, vector<1x1x64xf32>,
    %13 = arith.mulf %7, %7 : vector<4x64xf32>
    %cst_12 = arith.constant dense<0.000000e+00> : vector<64xf32>
    %14 = vector.multi_reduction <add>, %13, %cst_12 [0] : vector<4x64xf32> to vector<64xf32>
    %15 = vector.shape_cast %14 : vector<64xf32> to vector<1x64xf32>
    %c0_13 = arith.constant 0 : index
    %c0_14 = arith.constant 0 : index
    %c0_15 = arith.constant 0 : index
    %16 = vector.load %arg8[%c0_13, %c0_14, %c0_15] : memref<1x1x64xf32, #tpu.memory_space<vmem>>, vector<1x1x64xf32>
    %17 = vector.shape_cast %16 : vector<1x1x64xf32> to vector<1x64xf32>
    %18 = vector.shape_cast %15 : vector<1x64xf32> to vector<1x1x64xf32>
    tpu.vector_store %arg8[%c0_13, %c0_14, %c0_15], %18 {strides = array<i32>} : memref<1x1x64xf32, #tpu.memory_space<vmem>>, vector<1x1x64xf32>,
    %19 = vector.shape_cast %7 : vector<4x64xf32> to vector<1x1x4x64xf32>
    %20 = arith.truncf %19 : vector<1x1x4x64xf32> to vector<1x1x4x64xbf16>
    %c0_16 = arith.constant 0 : index
    %c0_17 = arith.constant 0 : index
    %c0_18 = arith.constant 0 : index
    %c0_19 = arith.constant 0 : index
    %21 = vector.load %arg6[%c0_16, %c0_17, %c0_18, %c0_19] : memref<1x1x4x64xbf16, #tpu.memory_space<vmem>>, vector<1x1x4x64xbf16>
    tpu.vector_store %arg6[%c0_16, %c0_17, %c0_18, %c0_19], %20 {strides = array<i32>} : memref<1x1x4x64xbf16, #tpu.memory_space<vmem>>, vector<1x1x4x64xbf16>,
    return
  }
  func.func @transform_0(%arg0: i32, %arg1: i32, %arg2: i32) -> (i32, i32, i32, i32) {
    %c0_i32 = arith.constant 0 : i32
    %c0_i32_0 = arith.constant 0 : i32
    return %arg0, %arg1, %arg2, %c0_i32 : i32, i32, i32, i32
  }
  func.func @transform_1(%arg0: i32, %arg1: i32, %arg2: i32) -> (i32, i32, i32) {
    %c0_i32 = arith.constant 0 : i32
    %c0_i32_0 = arith.constant 0 : i32
    %c0_i32_1 = arith.constant 0 : i32
    return %arg1, %c0_i32, %c0_i32_0 : i32, i32, i32
  }
  func.func @transform_2(%arg0: i32, %arg1: i32, %arg2: i32) -> (i32, i32) {
    %c0_i32 = arith.constant 0 : i32
    %c0_i32_0 = arith.constant 0 : i32
    %c0_i32_1 = arith.constant 0 : i32
    return %c0_i32, %c0_i32_0 : i32, i32
  }
  func.func @transform_3(%arg0: i32, %arg1: i32, %arg2: i32) -> (i32, i32, i32, i32) {
    %c0_i32 = arith.constant 0 : i32
    %c0_i32_0 = arith.constant 0 : i32
    return %arg0, %arg1, %arg2, %c0_i32 : i32, i32, i32, i32
  }
  func.func @transform_4(%arg0: i32, %arg1: i32, %arg2: i32) -> (i32, i32, i32) {
    %c4_i32 = arith.constant 4 : i32
    %0 = arith.muli %arg0, %c4_i32 : i32
    %1 = arith.addi %0, %arg1 : i32
    %c1_i32 = arith.constant 1 : i32
    %2 = arith.muli %1, %c1_i32 : i32
    %3 = arith.addi %2, %arg2 : i32
    %c0_i32 = arith.constant 0 : i32
    %c0_i32_0 = arith.constant 0 : i32
    %c0_i32_1 = arith.constant 0 : i32
    return %3, %c0_i32, %c0_i32_0 : i32, i32, i32
  }
  func.func @transform_5(%arg0: i32, %arg1: i32, %arg2: i32) -> (i32, i32, i32) {
    %c4_i32 = arith.constant 4 : i32
    %0 = arith.muli %arg0, %c4_i32 : i32
    %1 = arith.addi %0, %arg1 : i32
    %c1_i32 = arith.constant 1 : i32
    %2 = arith.muli %1, %c1_i32 : i32
    %3 = arith.addi %2, %arg2 : i32
    %c0_i32 = arith.constant 0 : i32
    %c0_i32_0 = arith.constant 0 : i32
    %c0_i32_1 = arith.constant 0 : i32
    return %3, %c0_i32, %c0_i32_0 : i32, i32, i32
  }
}

module attributes {stable_mosaic.version = 11 : i64} {
  func.func @_gemm_kernel(%arg0: i32, %arg1: i32, %arg2: i32, %arg3: memref<1x1x16x512xbf16, #tpu.memory_space<vmem>>, %arg4: memref<1x512x32xbf16, #tpu.memory_space<vmem>>, %arg5: memref<1x32xf32, #tpu.memory_space<vmem>>, %arg6: memref<1x1x16x32xbf16, #tpu.memory_space<vmem>>, %arg7: memref<1x1x32xf32, #tpu.memory_space<vmem>>, %arg8: memref<1x1x32xf32, #tpu.memory_space<vmem>>) attributes {dimension_semantics = [#tpu.dimension_semantics<parallel>, #tpu.dimension_semantics<parallel>, #tpu.dimension_semantics<parallel>], iteration_bounds = array<i64: 2, 4, 1>, scalar_prefetch = 0 : i64, scratch_operands = 0 : i64, tpu.core_type = #tpu.core_type<tc>, window_params = [{transform_indices = @transform_0, window_bounds = array<i64: 1, 1, 16, 512>}, {transform_indices = @transform_1, window_bounds = array<i64: 1, 512, 32>}, {pipeline_mode = #tpu.pipeline_mode<synchronous>, transform_indices = @transform_2, window_bounds = array<i64: 1, 32>}, {transform_indices = @transform_3, window_bounds = array<i64: 1, 1, 16, 32>}, {transform_indices = @transform_4, window_bounds = array<i64: 1, 1, 32>}, {transform_indices = @transform_5, window_bounds = array<i64: 1, 1, 32>}]} {
    %c0 = arith.constant 0 : index
    %c0_0 = arith.constant 0 : index
    %c0_1 = arith.constant 0 : index
    %c0_2 = arith.constant 0 : index
    %0 = vector.load %arg3[%c0, %c0_0, %c0_1, %c0_2] : memref<1x1x16x512xbf16, #tpu.memory_space<vmem>>, vector<1x1x16x512xbf16>
    %1 = vector.shape_cast %0 : vector<1x1x16x512xbf16> to vector<16x512xbf16>
    %c0_3 = arith.constant 0 : index
    %c0_4 = arith.constant 0 : index
    %c0_5 = arith.constant 0 : index
    %2 = vector.load %arg4[%c0_3, %c0_4, %c0_5] : memref<1x512x32xbf16, #tpu.memory_space<vmem>>, vector<1x512x32xbf16>
    %3 = vector.shape_cast %2 : vector<1x512x32xbf16> to vector<512x32xbf16>
    %cst = arith.constant dense<0.000000e+00> : vector<16x32xf32>
    %4 = tpu.matmul %1, %3, %cst {dimension_numbers = #tpu.dot_dimension_numbers<[1], [0], [0], [1], [0, 0, 1, 1], [], []>} : vector<16x512xbf16>, vector<512x32xbf16>, vector<16x32xf32> -> vector<16x32xf32>
    %c0_6 = arith.constant 0 : index
    %c0_7 = arith.constant 0 : index
    %5 = vector.load %arg5[%c0_6, %c0_7] : memref<1x32xf32, #tpu.memory_space<vmem>>, vector<1x32xf32>
    %6 = vector.broadcast %5 : vector<1x32xf32> to vector<16x32xf32>
    %7 = arith.addf %4, %6 : vector<16x32xf32>
    %cst_8 = arith.constant dense<0.000000e+00> : vector<32xf32>
    %8 = vector.multi_reduction <add>, %7, %cst_8 [0] : vector<16x32xf32> to vector<32xf32>
    %9 = vector.shape_cast %8 : vector<32xf32> to vector<1x32xf32>
    %c0_9 = arith.constant 0 : index
    %c0_10 = arith.constant 0 : index
    %c0_11 = arith.constant 0 : index
    %10 = vector.load %arg7[%c0_9, %c0_10, %c0_11] : memref<1x1x32xf32, #tpu.memory_space<vmem>>, vector<1x1x32xf32>
    %11 = vector.shape_cast %10 : vector<1x1x32xf32> to vector<1x32xf32>
    %12 = vector.shape_cast %9 : vector<1x32xf32> to vector<1x1x32xf32>
    tpu.vector_store %arg7[%c0_9, %c0_10, %c0_11], %12 {strides = array<i32>} : memref<1x1x32xf32, #tpu.memory_space<vmem>>, vector<1x1x32xf32>,
    %13 = arith.mulf %7, %7 : vector<16x32xf32>
    %cst_12 = arith.constant dense<0.000000e+00> : vector<32xf32>
    %14 = vector.multi_reduction <add>, %13, %cst_12 [0] : vector<16x32xf32> to vector<32xf32>
    %15 = vector.shape_cast %14 : vector<32xf32> to vector<1x32xf32>
    %c0_13 = arith.constant 0 : index
    %c0_14 = arith.constant 0 : index
    %c0_15 = arith.constant 0 : index
    %16 = vector.load %arg8[%c0_13, %c0_14, %c0_15] : memref<1x1x32xf32, #tpu.memory_space<vmem>>, vector<1x1x32xf32>
    %17 = vector.shape_cast %16 : vector<1x1x32xf32> to vector<1x32xf32>
    %18 = vector.shape_cast %15 : vector<1x32xf32> to vector<1x1x32xf32>
    tpu.vector_store %arg8[%c0_13, %c0_14, %c0_15], %18 {strides = array<i32>} : memref<1x1x32xf32, #tpu.memory_space<vmem>>, vector<1x1x32xf32>,
    %19 = vector.shape_cast %7 : vector<16x32xf32> to vector<1x1x16x32xf32>
    %20 = arith.truncf %19 : vector<1x1x16x32xf32> to vector<1x1x16x32xbf16>
    %c0_16 = arith.constant 0 : index
    %c0_17 = arith.constant 0 : index
    %c0_18 = arith.constant 0 : index
    %c0_19 = arith.constant 0 : index
    %21 = vector.load %arg6[%c0_16, %c0_17, %c0_18, %c0_19] : memref<1x1x16x32xbf16, #tpu.memory_space<vmem>>, vector<1x1x16x32xbf16>
    tpu.vector_store %arg6[%c0_16, %c0_17, %c0_18, %c0_19], %20 {strides = array<i32>} : memref<1x1x16x32xbf16, #tpu.memory_space<vmem>>, vector<1x1x16x32xbf16>,
    return
  }
  func.func @transform_0(%arg0: i32, %arg1: i32, %arg2: i32) -> (i32, i32, i32, i32) {
    %c0_i32 = arith.constant 0 : i32
    %c0_i32_0 = arith.constant 0 : i32
    return %arg0, %arg1, %arg2, %c0_i32 : i32, i32, i32, i32
  }
  func.func @transform_1(%arg0: i32, %arg1: i32, %arg2: i32) -> (i32, i32, i32) {
    %c0_i32 = arith.constant 0 : i32
    %c0_i32_0 = arith.constant 0 : i32
    %c0_i32_1 = arith.constant 0 : i32
    return %arg1, %c0_i32, %c0_i32_0 : i32, i32, i32
  }
  func.func @transform_2(%arg0: i32, %arg1: i32, %arg2: i32) -> (i32, i32) {
    %c0_i32 = arith.constant 0 : i32
    %c0_i32_0 = arith.constant 0 : i32
    %c0_i32_1 = arith.constant 0 : i32
    return %c0_i32, %c0_i32_0 : i32, i32
  }
  func.func @transform_3(%arg0: i32, %arg1: i32, %arg2: i32) -> (i32, i32, i32, i32) {
    %c0_i32 = arith.constant 0 : i32
    %c0_i32_0 = arith.constant 0 : i32
    return %arg0, %arg1, %arg2, %c0_i32 : i32, i32, i32, i32
  }
  func.func @transform_4(%arg0: i32, %arg1: i32, %arg2: i32) -> (i32, i32, i32) {
    %c4_i32 = arith.constant 4 : i32
    %0 = arith.muli %arg0, %c4_i32 : i32
    %1 = arith.addi %0, %arg1 : i32
    %c1_i32 = arith.constant 1 : i32
    %2 = arith.muli %1, %c1_i32 : i32
    %3 = arith.addi %2, %arg2 : i32
    %c0_i32 = arith.constant 0 : i32
    %c0_i32_0 = arith.constant 0 : i32
    %c0_i32_1 = arith.constant 0 : i32
    return %3, %c0_i32, %c0_i32_0 : i32, i32, i32
  }
  func.func @transform_5(%arg0: i32, %arg1: i32, %arg2: i32) -> (i32, i32, i32) {
    %c4_i32 = arith.constant 4 : i32
    %0 = arith.muli %arg0, %c4_i32 : i32
    %1 = arith.addi %0, %arg1 : i32
    %c1_i32 = arith.constant 1 : i32
    %2 = arith.muli %1, %c1_i32 : i32
    %3 = arith.addi %2, %arg2 : i32
    %c0_i32 = arith.constant 0 : i32
    %c0_i32_0 = arith.constant 0 : i32
    %c0_i32_1 = arith.constant 0 : i32
    return %3, %c0_i32, %c0_i32_0 : i32, i32, i32
  }
}

module attributes {stable_mosaic.version = 11 : i64} {
  func.func @_gemm_kernel(%arg0: i32, %arg1: i32, %arg2: i32, %arg3: memref<1x1x64x256xbf16, #tpu.memory_space<vmem>>, %arg4: memref<1x256x16xbf16, #tpu.memory_space<vmem>>, %arg5: memref<1x16xf32, #tpu.memory_space<vmem>>, %arg6: memref<1x1x64x16xbf16, #tpu.memory_space<vmem>>, %arg7: memref<1x1x16xf32, #tpu.memory_space<vmem>>, %arg8: memref<1x1x16xf32, #tpu.memory_space<vmem>>) attributes {dimension_semantics = [#tpu.dimension_semantics<parallel>, #tpu.dimension_semantics<parallel>, #tpu.dimension_semantics<parallel>], iteration_bounds = array<i64: 2, 4, 1>, scalar_prefetch = 0 : i64, scratch_operands = 0 : i64, tpu.core_type = #tpu.core_type<tc>, window_params = [{transform_indices = @transform_0, window_bounds = array<i64: 1, 1, 64, 256>}, {transform_indices = @transform_1, window_bounds = array<i64: 1, 256, 16>}, {pipeline_mode = #tpu.pipeline_mode<synchronous>, transform_indices = @transform_2, window_bounds = array<i64: 1, 16>}, {transform_indices = @transform_3, window_bounds = array<i64: 1, 1, 64, 16>}, {transform_indices = @transform_4, window_bounds = array<i64: 1, 1, 16>}, {transform_indices = @transform_5, window_bounds = array<i64: 1, 1, 16>}]} {
    %c0 = arith.constant 0 : index
    %c0_0 = arith.constant 0 : index
    %c0_1 = arith.constant 0 : index
    %c0_2 = arith.constant 0 : index
    %0 = vector.load %arg3[%c0, %c0_0, %c0_1, %c0_2] : memref<1x1x64x256xbf16, #tpu.memory_space<vmem>>, vector<1x1x64x256xbf16>
    %1 = vector.shape_cast %0 : vector<1x1x64x256xbf16> to vector<64x256xbf16>
    %c0_3 = arith.constant 0 : index
    %c0_4 = arith.constant 0 : index
    %c0_5 = arith.constant 0 : index
    %2 = vector.load %arg4[%c0_3, %c0_4, %c0_5] : memref<1x256x16xbf16, #tpu.memory_space<vmem>>, vector<1x256x16xbf16>
    %3 = vector.shape_cast %2 : vector<1x256x16xbf16> to vector<256x16xbf16>
    %cst = arith.constant dense<0.000000e+00> : vector<64x16xf32>
    %4 = tpu.matmul %1, %3, %cst {dimension_numbers = #tpu.dot_dimension_numbers<[1], [0], [0], [1], [0, 0, 1, 1], [], []>} : vector<64x256xbf16>, vector<256x16xbf16>, vector<64x16xf32> -> vector<64x16xf32>
    %c0_6 = arith.constant 0 : index
    %c0_7 = arith.constant 0 : index
    %5 = vector.load %arg5[%c0_6, %c0_7] : memref<1x16xf32, #tpu.memory_space<vmem>>, vector<1x16xf32>
    %6 = vector.broadcast %5 : vector<1x16xf32> to vector<64x16xf32>
    %7 = arith.addf %4, %6 : vector<64x16xf32>
    %cst_8 = arith.constant dense<0.000000e+00> : vector<16xf32>
    %8 = vector.multi_reduction <add>, %7, %cst_8 [0] : vector<64x16xf32> to vector<16xf32>
    %9 = vector.shape_cast %8 : vector<16xf32> to vector<1x16xf32>
    %c0_9 = arith.constant 0 : index
    %c0_10 = arith.constant 0 : index
    %c0_11 = arith.constant 0 : index
    %10 = vector.load %arg7[%c0_9, %c0_10, %c0_11] : memref<1x1x16xf32, #tpu.memory_space<vmem>>, vector<1x1x16xf32>
    %11 = vector.shape_cast %10 : vector<1x1x16xf32> to vector<1x16xf32>
    %12 = vector.shape_cast %9 : vector<1x16xf32> to vector<1x1x16xf32>
    tpu.vector_store %arg7[%c0_9, %c0_10, %c0_11], %12 {strides = array<i32>} : memref<1x1x16xf32, #tpu.memory_space<vmem>>, vector<1x1x16xf32>,
    %13 = arith.mulf %7, %7 : vector<64x16xf32>
    %cst_12 = arith.constant dense<0.000000e+00> : vector<16xf32>
    %14 = vector.multi_reduction <add>, %13, %cst_12 [0] : vector<64x16xf32> to vector<16xf32>
    %15 = vector.shape_cast %14 : vector<16xf32> to vector<1x16xf32>
    %c0_13 = arith.constant 0 : index
    %c0_14 = arith.constant 0 : index
    %c0_15 = arith.constant 0 : index
    %16 = vector.load %arg8[%c0_13, %c0_14, %c0_15] : memref<1x1x16xf32, #tpu.memory_space<vmem>>, vector<1x1x16xf32>
    %17 = vector.shape_cast %16 : vector<1x1x16xf32> to vector<1x16xf32>
    %18 = vector.shape_cast %15 : vector<1x16xf32> to vector<1x1x16xf32>
    tpu.vector_store %arg8[%c0_13, %c0_14, %c0_15], %18 {strides = array<i32>} : memref<1x1x16xf32, #tpu.memory_space<vmem>>, vector<1x1x16xf32>,
    %19 = vector.shape_cast %7 : vector<64x16xf32> to vector<1x1x64x16xf32>
    %20 = arith.truncf %19 : vector<1x1x64x16xf32> to vector<1x1x64x16xbf16>
    %c0_16 = arith.constant 0 : index
    %c0_17 = arith.constant 0 : index
    %c0_18 = arith.constant 0 : index
    %c0_19 = arith.constant 0 : index
    %21 = vector.load %arg6[%c0_16, %c0_17, %c0_18, %c0_19] : memref<1x1x64x16xbf16, #tpu.memory_space<vmem>>, vector<1x1x64x16xbf16>
    tpu.vector_store %arg6[%c0_16, %c0_17, %c0_18, %c0_19], %20 {strides = array<i32>} : memref<1x1x64x16xbf16, #tpu.memory_space<vmem>>, vector<1x1x64x16xbf16>,
    return
  }
  func.func @transform_0(%arg0: i32, %arg1: i32, %arg2: i32) -> (i32, i32, i32, i32) {
    %c0_i32 = arith.constant 0 : i32
    %c0_i32_0 = arith.constant 0 : i32
    return %arg0, %arg1, %arg2, %c0_i32 : i32, i32, i32, i32
  }
  func.func @transform_1(%arg0: i32, %arg1: i32, %arg2: i32) -> (i32, i32, i32) {
    %c0_i32 = arith.constant 0 : i32
    %c0_i32_0 = arith.constant 0 : i32
    %c0_i32_1 = arith.constant 0 : i32
    return %arg1, %c0_i32, %c0_i32_0 : i32, i32, i32
  }
  func.func @transform_2(%arg0: i32, %arg1: i32, %arg2: i32) -> (i32, i32) {
    %c0_i32 = arith.constant 0 : i32
    %c0_i32_0 = arith.constant 0 : i32
    %c0_i32_1 = arith.constant 0 : i32
    return %c0_i32, %c0_i32_0 : i32, i32
  }
  func.func @transform_3(%arg0: i32, %arg1: i32, %arg2: i32) -> (i32, i32, i32, i32) {
    %c0_i32 = arith.constant 0 : i32
    %c0_i32_0 = arith.constant 0 : i32
    return %arg0, %arg1, %arg2, %c0_i32 : i32, i32, i32, i32
  }
  func.func @transform_4(%arg0: i32, %arg1: i32, %arg2: i32) -> (i32, i32, i32) {
    %c4_i32 = arith.constant 4 : i32
    %0 = arith.muli %arg0, %c4_i32 : i32
    %1 = arith.addi %0, %arg1 : i32
    %c1_i32 = arith.constant 1 : i32
    %2 = arith.muli %1, %c1_i32 : i32
    %3 = arith.addi %2, %arg2 : i32
    %c0_i32 = arith.constant 0 : i32
    %c0_i32_0 = arith.constant 0 : i32
    %c0_i32_1 = arith.constant 0 : i32
    return %3, %c0_i32, %c0_i32_0 : i32, i32, i32
  }
  func.func @transform_5(%arg0: i32, %arg1: i32, %arg2: i32) -> (i32, i32, i32) {
    %c4_i32 = arith.constant 4 : i32
    %0 = arith.muli %arg0, %c4_i32 : i32
    %1 = arith.addi %0, %arg1 : i32
    %c1_i32 = arith.constant 1 : i32
    %2 = arith.muli %1, %c1_i32 : i32
    %3 = arith.addi %2, %arg2 : i32
    %c0_i32 = arith.constant 0 : i32
    %c0_i32_0 = arith.constant 0 : i32
    %c0_i32_1 = arith.constant 0 : i32
    return %3, %c0_i32, %c0_i32_0 : i32, i32, i32
  }
}

module attributes {stable_mosaic.version = 11 : i64} {
  func.func @_gemm_kernel(%arg0: i32, %arg1: i32, %arg2: i32, %arg3: memref<1x1x256x128xbf16, #tpu.memory_space<vmem>>, %arg4: memref<1x128x8xbf16, #tpu.memory_space<vmem>>, %arg5: memref<1x8xf32, #tpu.memory_space<vmem>>, %arg6: memref<1x1x256x8xbf16, #tpu.memory_space<vmem>>, %arg7: memref<1x1x8xf32, #tpu.memory_space<vmem>>, %arg8: memref<1x1x8xf32, #tpu.memory_space<vmem>>) attributes {dimension_semantics = [#tpu.dimension_semantics<parallel>, #tpu.dimension_semantics<parallel>, #tpu.dimension_semantics<parallel>], iteration_bounds = array<i64: 2, 4, 1>, scalar_prefetch = 0 : i64, scratch_operands = 0 : i64, tpu.core_type = #tpu.core_type<tc>, window_params = [{transform_indices = @transform_0, window_bounds = array<i64: 1, 1, 256, 128>}, {transform_indices = @transform_1, window_bounds = array<i64: 1, 128, 8>}, {pipeline_mode = #tpu.pipeline_mode<synchronous>, transform_indices = @transform_2, window_bounds = array<i64: 1, 8>}, {transform_indices = @transform_3, window_bounds = array<i64: 1, 1, 256, 8>}, {transform_indices = @transform_4, window_bounds = array<i64: 1, 1, 8>}, {transform_indices = @transform_5, window_bounds = array<i64: 1, 1, 8>}]} {
    %c0 = arith.constant 0 : index
    %c0_0 = arith.constant 0 : index
    %c0_1 = arith.constant 0 : index
    %c0_2 = arith.constant 0 : index
    %0 = vector.load %arg3[%c0, %c0_0, %c0_1, %c0_2] : memref<1x1x256x128xbf16, #tpu.memory_space<vmem>>, vector<1x1x256x128xbf16>
    %1 = vector.shape_cast %0 : vector<1x1x256x128xbf16> to vector<256x128xbf16>
    %c0_3 = arith.constant 0 : index
    %c0_4 = arith.constant 0 : index
    %c0_5 = arith.constant 0 : index
    %2 = vector.load %arg4[%c0_3, %c0_4, %c0_5] : memref<1x128x8xbf16, #tpu.memory_space<vmem>>, vector<1x128x8xbf16>
    %3 = vector.shape_cast %2 : vector<1x128x8xbf16> to vector<128x8xbf16>
    %cst = arith.constant dense<0.000000e+00> : vector<256x8xf32>
    %4 = tpu.matmul %1, %3, %cst {dimension_numbers = #tpu.dot_dimension_numbers<[1], [0], [0], [1], [0, 0, 1, 1], [], []>} : vector<256x128xbf16>, vector<128x8xbf16>, vector<256x8xf32> -> vector<256x8xf32>
    %c0_6 = arith.constant 0 : index
    %c0_7 = arith.constant 0 : index
    %5 = vector.load %arg5[%c0_6, %c0_7] : memref<1x8xf32, #tpu.memory_space<vmem>>, vector<1x8xf32>
    %6 = vector.broadcast %5 : vector<1x8xf32> to vector<256x8xf32>
    %7 = arith.addf %4, %6 : vector<256x8xf32>
    %cst_8 = arith.constant dense<0.000000e+00> : vector<8xf32>
    %8 = vector.multi_reduction <add>, %7, %cst_8 [0] : vector<256x8xf32> to vector<8xf32>
    %9 = vector.shape_cast %8 : vector<8xf32> to vector<1x8xf32>
    %c0_9 = arith.constant 0 : index
    %c0_10 = arith.constant 0 : index
    %c0_11 = arith.constant 0 : index
    %10 = vector.load %arg7[%c0_9, %c0_10, %c0_11] : memref<1x1x8xf32, #tpu.memory_space<vmem>>, vector<1x1x8xf32>
    %11 = vector.shape_cast %10 : vector<1x1x8xf32> to vector<1x8xf32>
    %12 = vector.shape_cast %9 : vector<1x8xf32> to vector<1x1x8xf32>
    tpu.vector_store %arg7[%c0_9, %c0_10, %c0_11], %12 {strides = array<i32>} : memref<1x1x8xf32, #tpu.memory_space<vmem>>, vector<1x1x8xf32>,
    %13 = arith.mulf %7, %7 : vector<256x8xf32>
    %cst_12 = arith.constant dense<0.000000e+00> : vector<8xf32>
    %14 = vector.multi_reduction <add>, %13, %cst_12 [0] : vector<256x8xf32> to vector<8xf32>
    %15 = vector.shape_cast %14 : vector<8xf32> to vector<1x8xf32>
    %c0_13 = arith.constant 0 : index
    %c0_14 = arith.constant 0 : index
    %c0_15 = arith.constant 0 : index
    %16 = vector.load %arg8[%c0_13, %c0_14, %c0_15] : memref<1x1x8xf32, #tpu.memory_space<vmem>>, vector<1x1x8xf32>
    %17 = vector.shape_cast %16 : vector<1x1x8xf32> to vector<1x8xf32>
    %18 = vector.shape_cast %15 : vector<1x8xf32> to vector<1x1x8xf32>
    tpu.vector_store %arg8[%c0_13, %c0_14, %c0_15], %18 {strides = array<i32>} : memref<1x1x8xf32, #tpu.memory_space<vmem>>, vector<1x1x8xf32>,
    %19 = vector.shape_cast %7 : vector<256x8xf32> to vector<1x1x256x8xf32>
    %20 = arith.truncf %19 : vector<1x1x256x8xf32> to vector<1x1x256x8xbf16>
    %c0_16 = arith.constant 0 : index
    %c0_17 = arith.constant 0 : index
    %c0_18 = arith.constant 0 : index
    %c0_19 = arith.constant 0 : index
    %21 = vector.load %arg6[%c0_16, %c0_17, %c0_18, %c0_19] : memref<1x1x256x8xbf16, #tpu.memory_space<vmem>>, vector<1x1x256x8xbf16>
    tpu.vector_store %arg6[%c0_16, %c0_17, %c0_18, %c0_19], %20 {strides = array<i32>} : memref<1x1x256x8xbf16, #tpu.memory_space<vmem>>, vector<1x1x256x8xbf16>,
    return
  }
  func.func @transform_0(%arg0: i32, %arg1: i32, %arg2: i32) -> (i32, i32, i32, i32) {
    %c0_i32 = arith.constant 0 : i32
    %c0_i32_0 = arith.constant 0 : i32
    return %arg0, %arg1, %arg2, %c0_i32 : i32, i32, i32, i32
  }
  func.func @transform_1(%arg0: i32, %arg1: i32, %arg2: i32) -> (i32, i32, i32) {
    %c0_i32 = arith.constant 0 : i32
    %c0_i32_0 = arith.constant 0 : i32
    %c0_i32_1 = arith.constant 0 : i32
    return %arg1, %c0_i32, %c0_i32_0 : i32, i32, i32
  }
  func.func @transform_2(%arg0: i32, %arg1: i32, %arg2: i32) -> (i32, i32) {
    %c0_i32 = arith.constant 0 : i32
    %c0_i32_0 = arith.constant 0 : i32
    %c0_i32_1 = arith.constant 0 : i32
    return %c0_i32, %c0_i32_0 : i32, i32
  }
  func.func @transform_3(%arg0: i32, %arg1: i32, %arg2: i32) -> (i32, i32, i32, i32) {
    %c0_i32 = arith.constant 0 : i32
    %c0_i32_0 = arith.constant 0 : i32
    return %arg0, %arg1, %arg2, %c0_i32 : i32, i32, i32, i32
  }
  func.func @transform_4(%arg0: i32, %arg1: i32, %arg2: i32) -> (i32, i32, i32) {
    %c4_i32 = arith.constant 4 : i32
    %0 = arith.muli %arg0, %c4_i32 : i32
    %1 = arith.addi %0, %arg1 : i32
    %c1_i32 = arith.constant 1 : i32
    %2 = arith.muli %1, %c1_i32 : i32
    %3 = arith.addi %2, %arg2 : i32
    %c0_i32 = arith.constant 0 : i32
    %c0_i32_0 = arith.constant 0 : i32
    %c0_i32_1 = arith.constant 0 : i32
    return %3, %c0_i32, %c0_i32_0 : i32, i32, i32
  }
  func.func @transform_5(%arg0: i32, %arg1: i32, %arg2: i32) -> (i32, i32, i32) {
    %c4_i32 = arith.constant 4 : i32
    %0 = arith.muli %arg0, %c4_i32 : i32
    %1 = arith.addi %0, %arg1 : i32
    %c1_i32 = arith.constant 1 : i32
    %2 = arith.muli %1, %c1_i32 : i32
    %3 = arith.addi %2, %arg2 : i32
    %c0_i32 = arith.constant 0 : i32
    %c0_i32_0 = arith.constant 0 : i32
    %c0_i32_1 = arith.constant 0 : i32
    return %3, %c0_i32, %c0_i32_0 : i32, i32, i32
  }
}

module attributes {stable_mosaic.version = 11 : i64} {
  func.func @_gemm_kernel(%arg0: i32, %arg1: i32, %arg2: i32, %arg3: memref<1x1x256x64xbf16, #tpu.memory_space<vmem>>, %arg4: memref<1x64x128xbf16, #tpu.memory_space<vmem>>, %arg5: memref<1x128xf32, #tpu.memory_space<vmem>>, %arg6: memref<1x1x256x128xf32, #tpu.memory_space<vmem>>) attributes {dimension_semantics = [#tpu.dimension_semantics<parallel>, #tpu.dimension_semantics<parallel>, #tpu.dimension_semantics<parallel>], iteration_bounds = array<i64: 2, 4, 4>, scalar_prefetch = 0 : i64, scratch_operands = 0 : i64, tpu.core_type = #tpu.core_type<tc>, window_params = [{transform_indices = @transform_0, window_bounds = array<i64: 1, 1, 256, 64>}, {transform_indices = @transform_1, window_bounds = array<i64: 1, 64, 128>}, {pipeline_mode = #tpu.pipeline_mode<synchronous>, transform_indices = @transform_2, window_bounds = array<i64: 1, 128>}, {transform_indices = @transform_3, window_bounds = array<i64: 1, 1, 256, 128>}]} {
    %c0 = arith.constant 0 : index
    %c0_0 = arith.constant 0 : index
    %c0_1 = arith.constant 0 : index
    %c0_2 = arith.constant 0 : index
    %0 = vector.load %arg3[%c0, %c0_0, %c0_1, %c0_2] : memref<1x1x256x64xbf16, #tpu.memory_space<vmem>>, vector<1x1x256x64xbf16>
    %1 = vector.shape_cast %0 : vector<1x1x256x64xbf16> to vector<256x64xbf16>
    %c0_3 = arith.constant 0 : index
    %c0_4 = arith.constant 0 : index
    %c0_5 = arith.constant 0 : index
    %2 = vector.load %arg4[%c0_3, %c0_4, %c0_5] : memref<1x64x128xbf16, #tpu.memory_space<vmem>>, vector<1x64x128xbf16>
    %3 = vector.shape_cast %2 : vector<1x64x128xbf16> to vector<64x128xbf16>
    %cst = arith.constant dense<0.000000e+00> : vector<256x128xf32>
    %4 = tpu.matmul %1, %3, %cst {dimension_numbers = #tpu.dot_dimension_numbers<[1], [0], [0], [1], [0, 0, 1, 1], [], []>} : vector<256x64xbf16>, vector<64x128xbf16>, vector<256x128xf32> -> vector<256x128xf32>
    %c0_6 = arith.constant 0 : index
    %c0_7 = arith.constant 0 : index
    %5 = vector.load %arg5[%c0_6, %c0_7] : memref<1x128xf32, #tpu.memory_space<vmem>>, vector<1x128xf32>
    %6 = vector.broadcast %5 : vector<1x128xf32> to vector<256x128xf32>
    %7 = arith.addf %4, %6 : vector<256x128xf32>
    %8 = math.tanh %7 : vector<256x128xf32>
    %9 = vector.shape_cast %8 : vector<256x128xf32> to vector<1x1x256x128xf32>
    %c0_8 = arith.constant 0 : index
    %c0_9 = arith.constant 0 : index
    %c0_10 = arith.constant 0 : index
    %c0_11 = arith.constant 0 : index
    %10 = vector.load %arg6[%c0_8, %c0_9, %c0_10, %c0_11] : memref<1x1x256x128xf32, #tpu.memory_space<vmem>>, vector<1x1x256x128xf32>
    tpu.vector_store %arg6[%c0_8, %c0_9, %c0_10, %c0_11], %9 {strides = array<i32>} : memref<1x1x256x128xf32, #tpu.memory_space<vmem>>, vector<1x1x256x128xf32>,
    return
  }
  func.func @transform_0(%arg0: i32, %arg1: i32, %arg2: i32) -> (i32, i32, i32, i32) {
    %c0_i32 = arith.constant 0 : i32
    %c0_i32_0 = arith.constant 0 : i32
    return %arg0, %arg1, %arg2, %c0_i32 : i32, i32, i32, i32
  }
  func.func @transform_1(%arg0: i32, %arg1: i32, %arg2: i32) -> (i32, i32, i32) {
    %c0_i32 = arith.constant 0 : i32
    %c0_i32_0 = arith.constant 0 : i32
    %c0_i32_1 = arith.constant 0 : i32
    return %arg1, %c0_i32, %c0_i32_0 : i32, i32, i32
  }
  func.func @transform_2(%arg0: i32, %arg1: i32, %arg2: i32) -> (i32, i32) {
    %c0_i32 = arith.constant 0 : i32
    %c0_i32_0 = arith.constant 0 : i32
    %c0_i32_1 = arith.constant 0 : i32
    return %c0_i32, %c0_i32_0 : i32, i32
  }
  func.func @transform_3(%arg0: i32, %arg1: i32, %arg2: i32) -> (i32, i32, i32, i32) {
    %c0_i32 = arith.constant 0 : i32
    %c0_i32_0 = arith.constant 0 : i32
    return %arg0, %arg1, %arg2, %c0_i32 : i32, i32, i32, i32
  }
}

</mosaic_0001>

<bundles_post_ra>
// kernel: forward.16
= control target key start
LH: loop header
LB: loop body
LE: loop exit
PB: predicated region body
PF: predicated region fallthrough
CT: control target
= control target key end

     0   :  { %s878_s12 = smov 0   ;;  %s880_s13 = smov 0   ;;  %s1082_s0 = inlined_call_operand.vmem [shape: bf16[2,1024,48], index: 0, kind: input, shape index: {}]   ;;  %s1083_s1 = inlined_call_operand.vmem [shape: bf16[48,8], index: 1, kind: input, shape index: {}]   ;;  %s1084_s2 = inlined_call_operand.vmem [shape: f32[1,8], index: 2, kind: input, shape index: {}]   ;;  %s1085_s3 = inlined_call_operand.vmem [shape: bf16[2,1024,8], index: 3, kind: output, shape index: {}]  }
   0x1   :  { %s882_s14 = smov 0   ;;  %s884_s15 = smov 0  }
   0x2   :  { %s886_s16 = smov 0  }
   0x3 LB: > { %s22_s17 = sadd.s32 1, %s848_s14  ;;  %s25_s18 = sadd.s32 1, %s852_s15  ;;  %s856_s16 = sphi %s886_s16, %s13_s16   ;;  %s852_s15 = sphi %s884_s15, %s1089_s15   ;;  %s848_s14 = sphi %s882_s14, %s1088_s14   ;;  %s844_s13 = sphi %s880_s13, %s1087_s13   ;;  %s840_s12 = sphi %s878_s12, %s1086_s12  }
   0x4   : > { %p23_p0 = scmp.ge.s32.totalorder %s22_s17, 4  ;;  %p648_p1 = scmp.ge.s32.totalorder %s856_s16, 1 }
   0x5   : > { %p158_p2 = scmp.lt.s32.totalorder %s856_s16, 9 }
   0x6   : > { %s1091_s17 = smov (%p23_p0, %s22_s17), 0  ;;  %s1093_s18 = smov (!%p23_p0, %s25_s18), %s852_s15 }
   0x7   : > { %p159_p3 = pnand %p648_p1, %p158_p2  ;;  %p27_p4 = scmp.ge.s32.totalorder %s1093_s18, 2 }
   0x8   : > { %s649_s21 = sshll.u32 (!%p159_p3), %s840_s12, 5  ;;  %p191_p5 = scmp.lt.s32.totalorder (!%p159_p3), %s844_s13, 1 }
   0x9   : > { %s1095_s18 = smov (%p27_p4, %s1093_s18), 0  ;;  %162 = sbr.rel (%p159_p3) target bundleno = 221 (0xdd), region = 32 }
   0xa   : > { %p193_p6 = scmp.lt.s32.totalorder (!%p159_p3), %s649_s21, 127 }
   0xe   : > { %v767_v0 = vld [vmem:[%s1083_s1 + $0x10] sm:$0xff]  ;;  %v766_v1 = vld [vmem:[%s1083_s1 + $0x8] sm:$0xff]  ;;  %s1097_s13 = smov (!%p191_p5, %s844_s13), 1  ;;  %s1099_s21 = smov (!%p193_p6, %s649_s21), 127  ;;  %v765_v2 = vld [vmem:[%s1083_s1] sm:$0xff]  ;;  %vm351_vm0 = vcmask 392192  }
   0xf   : > { %405 = vmatpush.bf16.msra.mxu0 %v767_v0  ;;  %768 = vmatpush.bf16.msra.mxu1 %v767_v0  ;;  %s650_s24 = sshll.u32 %s1097_s13, 7  ;;  %v962_v19 = vld [vmem:[%s1084_s2] ss:$0 sm:$0xff]  ;;  %vm521_vm1 = vcmask 60416  }
  0x10   : > { %769 = vmatpush.bf16.msra.mxu2 %v767_v0  ;;  %770 = vmatpush.bf16.msra.mxu3 %v767_v0  ;;  %s914_s25 = sadd.s32 %s650_s24, %s1099_s21 }
  0x11   : > { %s651_s28 = sshll.u32 %s914_s25, 2 }
  0x12   : > { %s925_s4 = scalar_lea.vmem %s1082_s0, %s651_s28  ;;  %s971_s9 = scalar_lea.vmem %s1085_s3, %s651_s28 }
  0x13   : > { %406 = vmatpush.bf16.msra.mxu0 %v766_v1  ;;  %771 = vmatpush.bf16.msra.mxu1 %v766_v1  ;;  %v749_v3 = vld [vmem:[%s925_s4] sm:$0xff]  ;;  %v750_v7 = vld [vmem:[%s925_s4 + $0x8] sm:$0xff]  ;;  %v751_v11 = vld [vmem:[%s925_s4 + $0x10] sm:$0xff] }
  0x14   : > { %772 = vmatpush.bf16.msra.mxu2 %v766_v1  ;;  %773 = vmatpush.bf16.msra.mxu3 %v766_v1  ;;  %v753_v4 = vld [vmem:[%s925_s4 + $0x20] sm:$0xff]  ;;  %v754_v8 = vld [vmem:[%s925_s4 + $0x28] sm:$0xff]  ;;  %v755_v12 = vld [vmem:[%s925_s4 + $0x30] sm:$0xff] }
  0x15   : > { %v757_v5 = vld [vmem:[%s925_s4 + $0x40] sm:$0xff]  ;;  %v758_v9 = vld [vmem:[%s925_s4 + $0x48] sm:$0xff]  ;;  %v759_v13 = vld [vmem:[%s925_s4 + $0x50] sm:$0xff] }
  0x16   : > { %v761_v6 = vld [vmem:[%s925_s4 + $0x60] sm:$0xff]  ;;  %v762_v10 = vld [vmem:[%s925_s4 + $0x68] sm:$0xff]  ;;  %v763_v14 = vld [vmem:[%s925_s4 + $0x70] sm:$0xff] }
  0x17   : > { %407 = vmatpush.bf16.msra.mxu0 %v765_v2  ;;  %774 = vmatpush.bf16.msra.mxu1 %v765_v2  ;;  %v752_v15 = vld [vmem:[%s925_s4 + $0x18] sm:$0xff] }
  0x18   : > { %775 = vmatpush.bf16.msra.mxu2 %v765_v2  ;;  %776 = vmatpush.bf16.msra.mxu3 %v765_v2  ;;  %v756_v16 = vld [vmem:[%s925_s4 + $0x38] sm:$0xff] }
  0x19   : > { %v760_v17 = vld [vmem:[%s925_s4 + $0x58] sm:$0xff] }
  0x1a   : > { %731 = vmatmul.msk.bf16.vlgmr.msra.gmra.mxu0 %vm351_vm0, %v749_v3  ;;  %735 = vmatmul.msk.bf16.vlgmr.msra.gmra.mxu1 %vm351_vm0, %v753_v4  ;;  %v764_v18 = vld [vmem:[%s925_s4 + $0x78] sm:$0xff] }
  0x1b   : > { %739 = vmatmul.msk.bf16.vlgmr.msra.gmra.mxu2 %vm351_vm0, %v757_v5  ;;  %743 = vmatmul.msk.bf16.vlgmr.msra.gmra.mxu3 %vm351_vm0, %v761_v6 }
  0x2a   : > { %732 = vmatmul.msk.bf16.gmra.mxu0 %vm351_vm0, %v750_v7  ;;  %736 = vmatmul.msk.bf16.gmra.mxu1 %vm351_vm0, %v754_v8 }
  0x2b   : > { %740 = vmatmul.msk.bf16.gmra.mxu2 %vm351_vm0, %v758_v9  ;;  %744 = vmatmul.msk.bf16.gmra.mxu3 %vm351_vm0, %v762_v10 }
  0x3a   : > { %733 = vmatmul.msk.bf16.gmra.mxu0 %vm351_vm0, %v751_v11  ;;  %737 = vmatmul.msk.bf16.gmra.mxu1 %vm351_vm0, %v755_v12 }
  0x3b   : > { %741 = vmatmul.msk.bf16.gmra.mxu2 %vm351_vm0, %v759_v13  ;;  %745 = vmatmul.msk.bf16.gmra.mxu3 %vm351_vm0, %v763_v14 }
  0x4a   : > { %734 = vmatmul.msk.bf16.gmra.mxu0 %vm351_vm0, %v752_v15  ;;  %738 = vmatmul.msk.bf16.gmra.mxu1 %vm351_vm0, %v756_v16 }
  0x4b   : > { %742 = vmatmul.msk.bf16.gmra.mxu2 %vm351_vm0, %v760_v17  ;;  %746 = vmatmul.msk.bf16.gmra.mxu3 %vm351_vm0, %v764_v18 }
  0x97   : > { %v409_v20 = vpop.f32.mrf.mxu0  ;;  %v429_v21 = vpop.f32.mrf.mxu1 }
  0x98   : > { %v410_v22 = vadd.f32 %v962_v19, %v409_v20  ;;  %v430_v23 = vadd.f32 %v962_v19, %v429_v21 }
  0x9a   : > { %v489_v24 = vpack.c.bf16 %v410_v22, %v410_v22  ;;  %v497_v25 = vpack.c.bf16 %v430_v23, %v430_v23 }
  0x9c   : > { %522 = vst.msk [vmem:[%s971_s9] sm:$0xf] %vm521_vm1, %v489_v24 }
  0x9d   : > { %530 = vst.msk [vmem:[%s971_s9 + $0x20] sm:$0xf] %vm521_vm1, %v497_v25 }
  0x9e   : > { %v449_v26 = vpop.f32.mrf.mxu2  ;;  %v469_v27 = vpop.f32.mrf.mxu3 }
  0x9f   : > { %v450_v28 = vadd.f32 %v962_v19, %v449_v26  ;;  %v470_v29 = vadd.f32 %v962_v19, %v469_v27  ;;  %v411_v30 = vpop.f32.mrf.mxu0  ;;  %v431_v31 = vpop.f32.mrf.mxu1 }
  0xa0   : > { %v412_v32 = vadd.f32 %v962_v19, %v411_v30  ;;  %v432_v33 = vadd.f32 %v962_v19, %v431_v31 }
  0xa1   : > { %v505_v34 = vpack.c.bf16 %v450_v28, %v450_v28  ;;  %v513_v35 = vpack.c.bf16 %v470_v29, %v470_v29 }
  0xa2   : > { %v490_v36 = vpack.c.bf16 %v412_v32, %v412_v32  ;;  %v498_v37 = vpack.c.bf16 %v432_v33, %v432_v33 }
  0xa3   : > { %538 = vst.msk [vmem:[%s971_s9 + $0x40] sm:$0xf] %vm521_vm1, %v505_v34 }
  0xa4   : > { %546 = vst.msk [vmem:[%s971_s9 + $0x60] sm:$0xf] %vm521_vm1, %v513_v35 }
  0xa5   : > { %523 = vst.msk [vmem:[%s971_s9 + $0x4] sm:$0xf] %vm521_vm1, %v490_v36 }
  0xa6   : > { %531 = vst.msk [vmem:[%s971_s9 + $0x24] sm:$0xf] %vm521_vm1, %v498_v37  ;;  %v451_v38 = vpop.f32.mrf.mxu2  ;;  %v471_v39 = vpop.f32.mrf.mxu3 }
  0xa7   : > { %v452_v40 = vadd.f32 %v962_v19, %v451_v38  ;;  %v472_v41 = vadd.f32 %v962_v19, %v471_v39  ;;  %v414_v42 = vpop.f32.mrf.mxu0  ;;  %v434_v43 = vpop.f32.mrf.mxu1 }
  0xa8   : > { %v415_v44 = vadd.f32 %v962_v19, %v414_v42  ;;  %v435_v45 = vadd.f32 %v962_v19, %v434_v43 }
  0xa9   : > { %v506_v46 = vpack.c.bf16 %v452_v40, %v452_v40  ;;  %v514_v47 = vpack.c.bf16 %v472_v41, %v472_v41 }
  0xaa   : > { %v491_v48 = vpack.c.bf16 %v415_v44, %v415_v44  ;;  %v499_v49 = vpack.c.bf16 %v435_v45, %v435_v45 }
  0xab   : > { %539 = vst.msk [vmem:[%s971_s9 + $0x44] sm:$0xf] %vm521_vm1, %v506_v46 }
  0xac   : > { %547 = vst.msk [vmem:[%s971_s9 + $0x64] sm:$0xf] %vm521_vm1, %v514_v47 }
  0xad   : > { %524 = vst.msk [vmem:[%s971_s9 + $0x8] sm:$0xf] %vm521_vm1, %v491_v48 }
  0xae   : > { %532 = vst.msk [vmem:[%s971_s9 + $0x28] sm:$0xf] %vm521_vm1, %v499_v49  ;;  %v454_v50 = vpop.f32.mrf.mxu2  ;;  %v474_v51 = vpop.f32.mrf.mxu3 }
  0xaf   : > { %v455_v52 = vadd.f32 %v962_v19, %v454_v50  ;;  %v475_v53 = vadd.f32 %v962_v19, %v474_v51  ;;  %v416_v54 = vpop.f32.mrf.mxu0  ;;  %v436_v55 = vpop.f32.mrf.mxu1 }
  0xb0   : > { %v417_v56 = vadd.f32 %v962_v19, %v416_v54  ;;  %v437_v57 = vadd.f32 %v962_v19, %v436_v55 }
  0xb1   : > { %v507_v58 = vpack.c.bf16 %v455_v52, %v455_v52  ;;  %v515_v59 = vpack.c.bf16 %v475_v53, %v475_v53 }
  0xb2   : > { %v492_v60 = vpack.c.bf16 %v417_v56, %v417_v56  ;;  %v500_v61 = vpack.c.bf16 %v437_v57, %v437_v57 }
  0xb3   : > { %540 = vst.msk [vmem:[%s971_s9 + $0x48] sm:$0xf] %vm521_vm1, %v507_v58 }
  0xb4   : > { %548 = vst.msk [vmem:[%s971_s9 + $0x68] sm:$0xf] %vm521_vm1, %v515_v59 }
  0xb5   : > { %525 = vst.msk [vmem:[%s971_s9 + $0xc] sm:$0xf] %vm521_vm1, %v492_v60 }
  0xb6   : > { %533 = vst.msk [vmem:[%s971_s9 + $0x2c] sm:$0xf] %vm521_vm1, %v500_v61  ;;  %v456_v62 = vpop.f32.mrf.mxu2  ;;  %v476_v63 = vpop.f32.mrf.mxu3 }
  0xb7   : > { %v457_v0 = vadd.f32 %v962_v19, %v456_v62  ;;  %v477_v1 = vadd.f32 %v962_v19, %v476_v63  ;;  %v419_v2 = vpop.f32.mrf.mxu0  ;;  %v439_v3 = vpop.f32.mrf.mxu1 }
  0xb8   : > { %v420_v4 = vadd.f32 %v962_v19, %v419_v2  ;;  %v440_v5 = vadd.f32 %v962_v19, %v439_v3 }
  0xb9   : > { %v508_v6 = vpack.c.bf16 %v457_v0, %v457_v0  ;;  %v516_v7 = vpack.c.bf16 %v477_v1, %v477_v1 }
  0xba   : > { %v493_v8 = vpack.c.bf16 %v420_v4, %v420_v4  ;;  %v501_v9 = vpack.c.bf16 %v440_v5, %v440_v5 }
  0xbb   : > { %541 = vst.msk [vmem:[%s971_s9 + $0x4c] sm:$0xf] %vm521_vm1, %v508_v6 }
  0xbc   : > { %549 = vst.msk [vmem:[%s971_s9 + $0x6c] sm:$0xf] %vm521_vm1, %v516_v7 }
  0xbd   : > { %526 = vst.msk [vmem:[%s971_s9 + $0x10] sm:$0xf] %vm521_vm1, %v493_v8 }
  0xbe   : > { %534 = vst.msk [vmem:[%s971_s9 + $0x30] sm:$0xf] %vm521_vm1, %v501_v9  ;;  %v459_v10 = vpop.f32.mrf.mxu2  ;;  %v479_v11 = vpop.f32.mrf.mxu3 }
  0xbf   : > { %v460_v12 = vadd.f32 %v962_v19, %v459_v10  ;;  %v480_v13 = vadd.f32 %v962_v19, %v479_v11  ;;  %v421_v14 = vpop.f32.mrf.mxu0  ;;  %v441_v15 = vpop.f32.mrf.mxu1 }
  0xc0   : > { %v422_v16 = vadd.f32 %v962_v19, %v421_v14  ;;  %v442_v17 = vadd.f32 %v962_v19, %v441_v15 }
  0xc1   : > { %v509_v18 = vpack.c.bf16 %v460_v12, %v460_v12  ;;  %v517_v20 = vpack.c.bf16 %v480_v13, %v480_v13 }
  0xc2   : > { %v494_v21 = vpack.c.bf16 %v422_v16, %v422_v16  ;;  %v502_v22 = vpack.c.bf16 %v442_v17, %v442_v17 }
  0xc3   : > { %542 = vst.msk [vmem:[%s971_s9 + $0x50] sm:$0xf] %vm521_vm1, %v509_v18 }
  0xc4   : > { %550 = vst.msk [vmem:[%s971_s9 + $0x70] sm:$0xf] %vm521_vm1, %v517_v20 }
  0xc5   : > { %527 = vst.msk [vmem:[%s971_s9 + $0x14] sm:$0xf] %vm521_vm1, %v494_v21 }
  0xc6   : > { %535 = vst.msk [vmem:[%s971_s9 + $0x34] sm:$0xf] %vm521_vm1, %v502_v22  ;;  %v461_v23 = vpop.f32.mrf.mxu2  ;;  %v481_v24 = vpop.f32.mrf.mxu3 }
  0xc7   : > { %v462_v25 = vadd.f32 %v962_v19, %v461_v23  ;;  %v482_v26 = vadd.f32 %v962_v19, %v481_v24  ;;  %v424_v27 = vpop.f32.mrf.mxu0  ;;  %v444_v28 = vpop.f32.mrf.mxu1 }
  0xc8   : > { %v425_v29 = vadd.f32 %v962_v19, %v424_v27  ;;  %v445_v30 = vadd.f32 %v962_v19, %v444_v28 }
  0xc9   : > { %v510_v31 = vpack.c.bf16 %v462_v25, %v462_v25  ;;  %v518_v32 = vpack.c.bf16 %v482_v26, %v482_v26 }
  0xca   : > { %v495_v33 = vpack.c.bf16 %v425_v29, %v425_v29  ;;  %v503_v34 = vpack.c.bf16 %v445_v30, %v445_v30 }
  0xcb   : > { %543 = vst.msk [vmem:[%s971_s9 + $0x54] sm:$0xf] %vm521_vm1, %v510_v31 }
  0xcc   : > { %551 = vst.msk [vmem:[%s971_s9 + $0x74] sm:$0xf] %vm521_vm1, %v518_v32 }
  0xcd   : > { %528 = vst.msk [vmem:[%s971_s9 + $0x18] sm:$0xf] %vm521_vm1, %v495_v33 }
  0xce   : > { %536 = vst.msk [vmem:[%s971_s9 + $0x38] sm:$0xf] %vm521_vm1, %v503_v34  ;;  %v464_v35 = vpop.f32.mrf.mxu2  ;;  %v484_v36 = vpop.f32.mrf.mxu3 }
  0xcf   : > { %v465_v37 = vadd.f32 %v962_v19, %v464_v35  ;;  %v485_v38 = vadd.f32 %v962_v19, %v484_v36  ;;  %v426_v39 = vpop.f32.mrf.mxu0  ;;  %v446_v40 = vpop.f32.mrf.mxu1 }
  0xd0   : > { %v427_v41 = vadd.f32 %v962_v19, %v426_v39  ;;  %v447_v42 = vadd.f32 %v962_v19, %v446_v40 }
  0xd1   : > { %v511_v43 = vpack.c.bf16 %v465_v37, %v465_v37  ;;  %v519_v44 = vpack.c.bf16 %v485_v38, %v485_v38 }
  0xd2   : > { %v496_v45 = vpack.c.bf16 %v427_v41, %v427_v41  ;;  %v504_v46 = vpack.c.bf16 %v447_v42, %v447_v42 }
  0xd3   : > { %544 = vst.msk [vmem:[%s971_s9 + $0x58] sm:$0xf] %vm521_vm1, %v511_v43 }
  0xd4   : > { %552 = vst.msk [vmem:[%s971_s9 + $0x78] sm:$0xf] %vm521_vm1, %v519_v44 }
  0xd5   : > { %529 = vst.msk [vmem:[%s971_s9 + $0x1c] sm:$0xf] %vm521_vm1, %v496_v45 }
  0xd6   : > { %537 = vst.msk [vmem:[%s971_s9 + $0x3c] sm:$0xf] %vm521_vm1, %v504_v46  ;;  %v466_v47 = vpop.f32.mrf.mxu2  ;;  %v486_v48 = vpop.f32.mrf.mxu3 }
  0xd7   : > { %v467_v49 = vadd.f32 %v962_v19, %v466_v47  ;;  %v487_v50 = vadd.f32 %v962_v19, %v486_v48 }
  0xd9   : > { %v512_v51 = vpack.c.bf16 %v467_v49, %v467_v49  ;;  %v520_v52 = vpack.c.bf16 %v487_v50, %v487_v50 }
  0xdb   : > { %545 = vst.msk [vmem:[%s971_s9 + $0x5c] sm:$0xf] %vm521_vm1, %v512_v51 }
  0xdc   : > { %553 = vst.msk [vmem:[%s971_s9 + $0x7c] sm:$0xf] %vm521_vm1, %v520_v52 }
  0xdd PF: > { %s13_s16 = sadd.s32 1, %s856_s16   ;;  %s1086_s12 = smov %s848_s14 }
  0xde   : > { %p10_p7 = scmp.ge.s32.totalorder %s13_s16, 10   ;;  %s1087_s13 = smov %s852_s15 }
  0xdf   : > { %s1088_s14 = smov %s1091_s17  ;;  %s1089_s15 = smov %s1095_s18 }
  0xe0   :  { %12 = sbr.rel (!%p10_p7) target bundleno = 3 (0x3), region = 62 }

// kernel: forward.17
= control target key start
LH: loop header
LB: loop body
LE: loop exit
PB: predicated region body
PF: predicated region fallthrough
CT: control target
= control target key end

     0   :  { %s1194_s18 = smov 0   ;;  %s1196_s19 = smov 0   ;;  %s1644_s0 = inlined_call_operand.vmem [shape: bf16[2,256,128], index: 0, kind: input, shape index: {}]   ;;  %s1645_s1 = inlined_call_operand.vmem [shape: bf16[128,16], index: 1, kind: input, shape index: {}]   ;;  %s1646_s2 = inlined_call_operand.vmem [shape: f32[1,16], index: 2, kind: input, shape index: {}]   ;;  %s1647_s3 = inlined_call_operand.vmem [shape: bf16[2,256,16], index: 3, kind: output, shape index: {0}]   ;;  %s1648_s4 = inlined_call_operand.vmem [shape: f32[2,1,16], index: 4, kind: output, shape index: {1}]   ;;  %s1649_s5 = inlined_call_operand.vmem [shape: f32[2,1,16], index: 5, kind: output, shape index: {2}]  }
   0x1   :  { %s1198_s20 = smov 0  }
   0x2 LB: > { %s28_s21 = sadd.s32 1, %s1158_s19  ;;  %p962_p0 = scmp.ge.s32.totalorder %s1162_s20, 1  ;;  %s1162_s20 = sphi %s1198_s20, %s16_s20   ;;  %s1158_s19 = sphi %s1196_s19, %s1651_s19   ;;  %s1154_s18 = sphi %s1194_s18, %s1650_s18  }
   0x3   : > { %p30_p1 = scmp.ge.s32.totalorder %s28_s21, 2  ;;  %p217_p2 = scmp.lt.s32.totalorder %s1162_s20, 3 }
   0x5   : > { %s1653_s21 = smov (%p30_p1, %s28_s21), 0  ;;  %p218_p3 = pnand %p962_p0, %p217_p2 }
   0x6   : > { %p262_p4 = scmp.lt.s32.totalorder (!%p218_p3), %s1154_s18, 1 }
   0x7   : > { %221 = sbr.rel (%p218_p3) target bundleno = 294 (0x126), region = 32 }
   0xc   : > { %v1090_v0 = vld [vmem:[%s1645_s1 + $0x38] sm:$0xff]  ;;  %v1089_v1 = vld [vmem:[%s1645_s1 + $0x30] sm:$0xff]  ;;  %v1088_v2 = vld [vmem:[%s1645_s1 + $0x28] sm:$0xff]  ;;  %s1655_s18 = smov (!%p262_p4, %s1154_s18), 1  ;;  %vm782_vm0 = vcmask 125952   ;;  %vm576_vm1 = vcmask 130048  }
   0xd   : > { %487 = vmatpush.bf16.msra.mxu0 %v1090_v0  ;;  %1091 = vmatpush.bf16.msra.mxu1 %v1090_v0  ;;  %v1087_v3 = vld [vmem:[%s1645_s1 + $0x20] sm:$0xff]  ;;  %v1086_v4 = vld [vmem:[%s1645_s1 + $0x18] sm:$0xff]  ;;  %v1085_v5 = vld [vmem:[%s1645_s1 + $0x10] sm:$0xff]  ;;  %s1065_s11 = sshll.u32 %s1655_s18, 7  ;;  %s284_s28 = scalar_lea.vmem %s1648_s4, %s1655_s18  ;;  %vm646_vm2 = vcmask 122880  }
   0xe   : > { %1092 = vmatpush.bf16.msra.mxu2 %v1090_v0  ;;  %1093 = vmatpush.bf16.msra.mxu3 %v1090_v0  ;;  %v1084_v6 = vld [vmem:[%s1645_s1 + $0x8] sm:$0xff]  ;;  %v1083_v7 = vld [vmem:[%s1645_s1] sm:$0xff]  ;;  %s1248_s16 = scalar_lea.vmem %s1644_s0, %s1065_s11  ;;  %s1282_s25 = scalar_lea.vmem %s1647_s3, %s1065_s11 }
   0xf   : > { %v1067_v8 = vld [vmem:[%s1248_s16] sm:$0xff]  ;;  %v1068_v12 = vld [vmem:[%s1248_s16 + $0x8] sm:$0xff]  ;;  %v1069_v16 = vld [vmem:[%s1248_s16 + $0x10] sm:$0xff]  ;;  %s289_s6 = scalar_lea.vmem %s1649_s5, %s1655_s18 }
  0x10   : > { %v1071_v9 = vld [vmem:[%s1248_s16 + $0x20] sm:$0xff]  ;;  %v1072_v13 = vld [vmem:[%s1248_s16 + $0x28] sm:$0xff]  ;;  %v1073_v17 = vld [vmem:[%s1248_s16 + $0x30] sm:$0xff] }
  0x11   : > { %488 = vmatpush.bf16.msra.mxu0 %v1089_v1  ;;  %1094 = vmatpush.bf16.msra.mxu1 %v1089_v1  ;;  %v1075_v10 = vld [vmem:[%s1248_s16 + $0x40] sm:$0xff]  ;;  %v1076_v14 = vld [vmem:[%s1248_s16 + $0x48] sm:$0xff]  ;;  %v1077_v18 = vld [vmem:[%s1248_s16 + $0x50] sm:$0xff] }
  0x12   : > { %1095 = vmatpush.bf16.msra.mxu2 %v1089_v1  ;;  %1096 = vmatpush.bf16.msra.mxu3 %v1089_v1  ;;  %v1079_v11 = vld [vmem:[%s1248_s16 + $0x60] sm:$0xff]  ;;  %v1080_v15 = vld [vmem:[%s1248_s16 + $0x68] sm:$0xff]  ;;  %v1081_v19 = vld [vmem:[%s1248_s16 + $0x70] sm:$0xff] }
  0x13   : > { %v1070_v20 = vld [vmem:[%s1248_s16 + $0x18] sm:$0xff]  ;;  %v1269_v24 = vld [vmem:[%s1646_s2] ss:$0 sm:$0xff] }
  0x14   : > { %v1074_v21 = vld [vmem:[%s1248_s16 + $0x38] sm:$0xff] }
  0x15   : > { %489 = vmatpush.bf16.msra.mxu0 %v1088_v2  ;;  %1097 = vmatpush.bf16.msra.mxu1 %v1088_v2  ;;  %v1078_v22 = vld [vmem:[%s1248_s16 + $0x58] sm:$0xff] }
  0x16   : > { %1098 = vmatpush.bf16.msra.mxu2 %v1088_v2  ;;  %1099 = vmatpush.bf16.msra.mxu3 %v1088_v2  ;;  %v1082_v23 = vld [vmem:[%s1248_s16 + $0x78] sm:$0xff] }
  0x19   : > { %490 = vmatpush.bf16.msra.mxu0 %v1087_v3  ;;  %1100 = vmatpush.bf16.msra.mxu1 %v1087_v3 }
  0x1a   : > { %1101 = vmatpush.bf16.msra.mxu2 %v1087_v3  ;;  %1102 = vmatpush.bf16.msra.mxu3 %v1087_v3 }
  0x1d   : > { %491 = vmatpush.bf16.msra.mxu0 %v1086_v4  ;;  %1103 = vmatpush.bf16.msra.mxu1 %v1086_v4 }
  0x1e   : > { %1104 = vmatpush.bf16.msra.mxu2 %v1086_v4  ;;  %1105 = vmatpush.bf16.msra.mxu3 %v1086_v4 }
  0x21   : > { %492 = vmatpush.bf16.msra.mxu0 %v1085_v5  ;;  %1106 = vmatpush.bf16.msra.mxu1 %v1085_v5 }
  0x22   : > { %1107 = vmatpush.bf16.msra.mxu2 %v1085_v5  ;;  %1108 = vmatpush.bf16.msra.mxu3 %v1085_v5 }
  0x25   : > { %493 = vmatpush.bf16.msra.mxu0 %v1084_v6  ;;  %1109 = vmatpush.bf16.msra.mxu1 %v1084_v6 }
  0x26   : > { %1110 = vmatpush.bf16.msra.mxu2 %v1084_v6  ;;  %1111 = vmatpush.bf16.msra.mxu3 %v1084_v6 }
  0x29   : > { %494 = vmatpush.bf16.msra.mxu0 %v1083_v7  ;;  %1112 = vmatpush.bf16.msra.mxu1 %v1083_v7 }
  0x2a   : > { %1113 = vmatpush.bf16.msra.mxu2 %v1083_v7  ;;  %1114 = vmatpush.bf16.msra.mxu3 %v1083_v7 }
  0x2c   : > { %495 = vmatmul.bf16.vlgmr.msra.gmra.mxu0 %v1067_v8  ;;  %515 = vmatmul.bf16.vlgmr.msra.gmra.mxu1 %v1071_v9 }
  0x2d   : > { %535 = vmatmul.bf16.vlgmr.msra.gmra.mxu2 %v1075_v10  ;;  %555 = vmatmul.bf16.vlgmr.msra.gmra.mxu3 %v1079_v11 }
  0x3c   : > { %500 = vmatmul.bf16.gmra.mxu0 %v1068_v12  ;;  %520 = vmatmul.bf16.gmra.mxu1 %v1072_v13 }
  0x3d   : > { %540 = vmatmul.bf16.gmra.mxu2 %v1076_v14  ;;  %560 = vmatmul.bf16.gmra.mxu3 %v1080_v15 }
  0x4c   : > { %505 = vmatmul.bf16.gmra.mxu0 %v1069_v16  ;;  %525 = vmatmul.bf16.gmra.mxu1 %v1073_v17 }
  0x4d   : > { %545 = vmatmul.bf16.gmra.mxu2 %v1077_v18  ;;  %565 = vmatmul.bf16.gmra.mxu3 %v1081_v19 }
  0x5c   : > { %510 = vmatmul.bf16.gmra.mxu0 %v1070_v20  ;;  %530 = vmatmul.bf16.gmra.mxu1 %v1074_v21 }
  0x5d   : > { %550 = vmatmul.bf16.gmra.mxu2 %v1078_v22  ;;  %570 = vmatmul.bf16.gmra.mxu3 %v1082_v23 }
  0xa9   : > { %v496_v25 = vpop.f32.mrf.mxu0  ;;  %v516_v26 = vpop.f32.mrf.mxu1 }
  0xaa   : > { %v1272_v27 = vadd.f32 %v1269_v24, %v496_v25  ;;  %v1275_v28 = vadd.f32 %v1269_v24, %v516_v26 }
  0xac   : > { %v750_v29 = vpack.c.bf16 %v1272_v27, %v1272_v27  ;;  %v758_v30 = vpack.c.bf16 %v1275_v28, %v1275_v28  ;;  %v648_v23 = vmul.f32 %v1272_v27, %v1272_v27 }
  0xae   : > { %783 = vst.msk [vmem:[%s1282_s25] sm:$0xf] %vm782_vm0, %v750_v29 }
  0xaf   : > { %791 = vst.msk [vmem:[%s1282_s25 + $0x20] sm:$0xf] %vm782_vm0, %v758_v30 }
  0xb0   : > { %v536_v31 = vpop.f32.mrf.mxu2  ;;  %v556_v37 = vpop.f32.mrf.mxu3 }
  0xb1   : > { %v498_v32 = vpop.f32.mrf.mxu0  ;;  %v518_v33 = vpop.f32.mrf.mxu1  ;;  %v1293_v34 = vadd.f32 %v1269_v24, %v536_v31  ;;  %v1314_v41 = vadd.f32 %v1269_v24, %v556_v37  ;;  %v680_v37 = vsel %vm576_vm1, %v648_v23, 0.0 }
  0xb2   : > { %v1296_v35 = vadd.f32 %v1269_v24, %v498_v32  ;;  %v1299_v36 = vadd.f32 %v1269_v24, %v518_v33  ;;  %v577_v33 = vsel %vm576_vm1, %v1272_v27, 0.0 }
  0xb3   : > { %v766_v38 = vpack.c.bf16 %v1293_v34, %v1293_v34  ;;  %v774_v46 = vpack.c.bf16 %v1314_v41, %v1314_v41 }
  0xb4   : > { %v751_v39 = vpack.c.bf16 %v1296_v35, %v1296_v35  ;;  %v759_v40 = vpack.c.bf16 %v1299_v36, %v1299_v36  ;;  %v649_v25 = vmul.f32 %v1296_v35, %v1296_v35  ;;  %v578_v31 = vsel %vm576_vm1, %v1296_v35, 0.0 }
  0xb5   : > { %799 = vst.msk [vmem:[%s1282_s25 + $0x40] sm:$0xf] %vm782_vm0, %v766_v38 }
  0xb6   : > { %784 = vst.msk [vmem:[%s1282_s25 + $0x4] sm:$0xf] %vm782_vm0, %v751_v39  ;;  %v681_v38 = vsel %vm576_vm1, %v649_v25, 0.0 }
  0xb7   : > { %792 = vst.msk [vmem:[%s1282_s25 + $0x24] sm:$0xf] %vm782_vm0, %v759_v40 }
  0xb8   : > { %v538_v42 = vpop.f32.mrf.mxu2  ;;  %v558_v49 = vpop.f32.mrf.mxu3  ;;  %807 = vst.msk [vmem:[%s1282_s25 + $0x60] sm:$0xf] %vm782_vm0, %v774_v46 }
  0xb9   : > { %v501_v43 = vpop.f32.mrf.mxu0  ;;  %v521_v44 = vpop.f32.mrf.mxu1  ;;  %v1317_v45 = vadd.f32 %v1269_v24, %v538_v42  ;;  %v1340_v53 = vadd.f32 %v1269_v24, %v558_v49  ;;  %v579_v42 = vadd.f32 %v578_v31, %v577_v33 }
  0xba   : > { %v1322_v47 = vadd.f32 %v1269_v24, %v501_v43  ;;  %v1325_v48 = vadd.f32 %v1269_v24, %v521_v44 }
  0xbb   : > { %v767_v50 = vpack.c.bf16 %v1317_v45, %v1317_v45  ;;  %v775_v55 = vpack.c.bf16 %v1340_v53, %v1340_v53 }
  0xbc   : > { %v752_v51 = vpack.c.bf16 %v1322_v47, %v1322_v47  ;;  %v760_v52 = vpack.c.bf16 %v1325_v48, %v1325_v48  ;;  %v650_v29 = vmul.f32 %v1322_v47, %v1322_v47  ;;  %v580_v39 = vsel %vm576_vm1, %v1322_v47, 0.0 }
  0xbd   : > { %800 = vst.msk [vmem:[%s1282_s25 + $0x44] sm:$0xf] %vm782_vm0, %v767_v50 }
  0xbe   : > { %785 = vst.msk [vmem:[%s1282_s25 + $0x8] sm:$0xf] %vm782_vm0, %v752_v51  ;;  %v683_v43 = vsel %vm576_vm1, %v650_v29, 0.0 }
  0xbf   : > { %793 = vst.msk [vmem:[%s1282_s25 + $0x28] sm:$0xf] %vm782_vm0, %v760_v52 }
  0xc0   : > { %v541_v54 = vpop.f32.mrf.mxu2  ;;  %808 = vst.msk [vmem:[%s1282_s25 + $0x64] sm:$0xf] %vm782_vm0, %v775_v55  ;;  %v561_v61 = vpop.f32.mrf.mxu3  ;;  %v581_v55 = vadd.f32 %v580_v39, %v579_v42 }
  0xc1   : > { %v503_v56 = vpop.f32.mrf.mxu0  ;;  %v523_v57 = vpop.f32.mrf.mxu1  ;;  %v1347_v58 = vadd.f32 %v1269_v24, %v541_v54  ;;  %v1373_v7 = vadd.f32 %v1269_v24, %v561_v61  ;;  %v682_v54 = vadd.f32 %v681_v38, %v680_v37  ;;  %v656_v37 = vmul.f32 %v1275_v28, %v1275_v28 }
  0xc2   : > { %v504_v59 = vadd.f32 %v1269_v24, %v503_v56  ;;  %v1351_v60 = vadd.f32 %v1269_v24, %v523_v57 }
  0xc3   : > { %v768_v62 = vpack.c.bf16 %v1347_v58, %v1347_v58  ;;  %v776_v13 = vpack.c.bf16 %v1373_v7, %v1373_v7 }
  0xc4   : > { %v753_v63 = vpack.c.bf16 %v504_v59, %v504_v59  ;;  %v761_v0 = vpack.c.bf16 %v1351_v60, %v1351_v60  ;;  %v651_v32 = vmul.f32 %v504_v59, %v504_v59  ;;  %v582_v35 = vsel %vm576_vm1, %v504_v59, 0.0 }
  0xc5   : > { %801 = vst.msk [vmem:[%s1282_s25 + $0x48] sm:$0xf] %vm782_vm0, %v768_v62 }
  0xc6   : > { %786 = vst.msk [vmem:[%s1282_s25 + $0xc] sm:$0xf] %vm782_vm0, %v753_v63  ;;  %v685_v56 = vsel %vm576_vm1, %v651_v32, 0.0 }
  0xc7   : > { %794 = vst.msk [vmem:[%s1282_s25 + $0x2c] sm:$0xf] %vm782_vm0, %v761_v0  ;;  %v684_v0 = vadd.f32 %v683_v43, %v682_v54 }
  0xc8   : > { %v543_v1 = vpop.f32.mrf.mxu2  ;;  %v563_v8 = vpop.f32.mrf.mxu3  ;;  %809 = vst.msk [vmem:[%s1282_s25 + $0x68] sm:$0xf] %vm782_vm0, %v776_v13 }
  0xc9   : > { %v506_v2 = vpop.f32.mrf.mxu0  ;;  %v526_v3 = vpop.f32.mrf.mxu1  ;;  %v1366_v4 = vadd.f32 %v1269_v24, %v543_v1  ;;  %v1378_v11 = vadd.f32 %v1269_v24, %v563_v8  ;;  %v583_v1 = vadd.f32 %v582_v35, %v581_v55  ;;  %v695_v55 = vsel %vm576_vm1, %v656_v37, 0.0 }
  0xca   : > { %v507_v5 = vadd.f32 %v1269_v24, %v506_v2  ;;  %v1370_v6 = vadd.f32 %v1269_v24, %v526_v3 }
  0xcb   : > { %v769_v9 = vpack.c.bf16 %v1366_v4, %v1366_v4  ;;  %v777_v15 = vpack.c.bf16 %v1378_v11, %v1378_v11 }
  0xcc   : > { %v754_v10 = vpack.c.bf16 %v507_v5, %v507_v5  ;;  %v762_v12 = vpack.c.bf16 %v1370_v6, %v1370_v6  ;;  %v652_v50 = vmul.f32 %v507_v5, %v507_v5  ;;  %v584_v59 = vsel %vm576_vm1, %v507_v5, 0.0 }
  0xcd   : > { %802 = vst.msk [vmem:[%s1282_s25 + $0x4c] sm:$0xf] %vm782_vm0, %v769_v9 }
  0xce   : > { %787 = vst.msk [vmem:[%s1282_s25 + $0x10] sm:$0xf] %vm782_vm0, %v754_v10  ;;  %v687_v3 = vsel %vm576_vm1, %v652_v50, 0.0  ;;  %v686_v10 = vadd.f32 %v685_v56, %v684_v0  ;;  %v594_v56 = vsel %vm576_vm1, %v1299_v36, 0.0  ;;  %v596_v0 = vsel %vm576_vm1, %v1325_v48, 0.0 }
  0xcf   : > { %795 = vst.msk [vmem:[%s1282_s25 + $0x30] sm:$0xf] %vm782_vm0, %v762_v12  ;;  %v585_v12 = vadd.f32 %v584_v59, %v583_v1  ;;  %v659_v1 = vmul.f32 %v1351_v60, %v1351_v60 }
  0xd0   : > { %v546_v14 = vpop.f32.mrf.mxu2  ;;  %810 = vst.msk [vmem:[%s1282_s25 + $0x6c] sm:$0xf] %vm782_vm0, %v777_v15  ;;  %v566_v21 = vpop.f32.mrf.mxu3 }
  0xd1   : > { %v508_v16 = vpop.f32.mrf.mxu0  ;;  %v528_v17 = vpop.f32.mrf.mxu1  ;;  %v1395_v18 = vadd.f32 %v1269_v24, %v546_v14  ;;  %v1437_v47 = vadd.f32 %v1269_v24, %v566_v21 }
  0xd2   : > { %v509_v19 = vadd.f32 %v1269_v24, %v508_v16  ;;  %v1399_v20 = vadd.f32 %v1269_v24, %v528_v17  ;;  %v688_v17 = vadd.f32 %v687_v3, %v686_v10  ;;  %v660_v10 = vmul.f32 %v1370_v6, %v1370_v6 }
  0xd3   : > { %v770_v22 = vpack.c.bf16 %v1395_v18, %v1395_v18  ;;  %v778_v5 = vpack.c.bf16 %v1437_v47, %v1437_v47 }
  0xd4   : > { %v755_v26 = vpack.c.bf16 %v509_v19, %v509_v19  ;;  %v763_v30 = vpack.c.bf16 %v1399_v20, %v1399_v20  ;;  %v653_v61 = vmul.f32 %v509_v19, %v509_v19  ;;  %v586_v8 = vsel %vm576_vm1, %v509_v19, 0.0 }
  0xd5   : > { %803 = vst.msk [vmem:[%s1282_s25 + $0x50] sm:$0xf] %vm782_vm0, %v770_v22  ;;  %v587_v19 = vadd.f32 %v586_v8, %v585_v12 }
  0xd6   : > { %788 = vst.msk [vmem:[%s1282_s25 + $0x14] sm:$0xf] %vm782_vm0, %v755_v26  ;;  %v689_v13 = vsel %vm576_vm1, %v653_v61, 0.0 }
  0xd7   : > { %796 = vst.msk [vmem:[%s1282_s25 + $0x34] sm:$0xf] %vm782_vm0, %v763_v30  ;;  %v690_v31 = vadd.f32 %v689_v13, %v688_v17  ;;  %v661_v17 = vmul.f32 %v1399_v20, %v1399_v20 }
  0xd8   : > { %v548_v40 = vpop.f32.mrf.mxu2  ;;  %v568_v52 = vpop.f32.mrf.mxu3  ;;  %811 = vst.msk [vmem:[%s1282_s25 + $0x70] sm:$0xf] %vm782_vm0, %v778_v5  ;;  %v598_v5 = vsel %vm576_vm1, %v1351_v60, 0.0  ;;  %v600_v60 = vsel %vm576_vm1, %v1370_v6, 0.0 }
  0xd9   : > { %v511_v44 = vpop.f32.mrf.mxu0  ;;  %v531_v46 = vpop.f32.mrf.mxu1  ;;  %v1430_v49 = vadd.f32 %v1269_v24, %v548_v40  ;;  %v1444_v63 = vadd.f32 %v1269_v24, %v568_v52 }
  0xda   : > { %v512_v27 = vadd.f32 %v1269_v24, %v511_v44  ;;  %v1434_v51 = vadd.f32 %v1269_v24, %v531_v46  ;;  %v592_v44 = vsel %vm576_vm1, %v1275_v28, 0.0  ;;  %v657_v46 = vmul.f32 %v1299_v36, %v1299_v36 }
  0xdb   : > { %v771_v57 = vpack.c.bf16 %v1430_v49, %v1430_v49  ;;  %v779_v16 = vpack.c.bf16 %v1444_v63, %v1444_v63 }
  0xdc   : > { %v756_v62 = vpack.c.bf16 %v512_v27, %v512_v27  ;;  %v764_v2 = vpack.c.bf16 %v1434_v51, %v1434_v51  ;;  %v654_v9 = vmul.f32 %v512_v27, %v512_v27  ;;  %v588_v14 = vsel %vm576_vm1, %v512_v27, 0.0 }
  0xdd   : > { %804 = vst.msk [vmem:[%s1282_s25 + $0x54] sm:$0xf] %vm782_vm0, %v771_v57  ;;  %v589_v32 = vadd.f32 %v588_v14, %v587_v19  ;;  %v658_v27 = vmul.f32 %v1325_v48, %v1325_v48 }
  0xde   : > { %789 = vst.msk [vmem:[%s1282_s25 + $0x18] sm:$0xf] %vm782_vm0, %v756_v62  ;;  %v691_v25 = vsel %vm576_vm1, %v654_v9, 0.0  ;;  %v697_v62 = vsel %vm576_vm1, %v657_v46, 0.0 }
  0xdf   : > { %797 = vst.msk [vmem:[%s1282_s25 + $0x38] sm:$0xf] %vm782_vm0, %v764_v2  ;;  %v692_v42 = vadd.f32 %v691_v25, %v690_v31  ;;  %v699_v36 = vsel %vm576_vm1, %v658_v27, 0.0  ;;  %v662_v25 = vmul.f32 %v1434_v51, %v1434_v51  ;;  %v705_v31 = vsel %vm576_vm1, %v661_v17, 0.0 }
  0xe0   : > { %v551_v15 = vpop.f32.mrf.mxu2  ;;  %812 = vst.msk [vmem:[%s1282_s25 + $0x74] sm:$0xf] %vm782_vm0, %v779_v16  ;;  %v571_v30 = vpop.f32.mrf.mxu3  ;;  %v701_v16 = vsel %vm576_vm1, %v659_v1, 0.0 }
  0xe1   : > { %v513_v21 = vpop.f32.mrf.mxu0  ;;  %v533_v22 = vpop.f32.mrf.mxu1  ;;  %v1465_v23 = vadd.f32 %v1269_v24, %v551_v15  ;;  %v1506_v2 = vadd.f32 %v1269_v24, %v571_v30 }
  0xe2   : > { %v514_v26 = vadd.f32 %v1269_v24, %v513_v21  ;;  %v1470_v29 = vadd.f32 %v1269_v24, %v533_v22  ;;  %v703_v22 = vsel %vm576_vm1, %v660_v10, 0.0 }
  0xe3   : > { %v772_v33 = vpack.c.bf16 %v1465_v23, %v1465_v23  ;;  %v780_v12 = vpack.c.bf16 %v1506_v2, %v1506_v2 }
  0xe4   : > { %v590_v38 = vsel %vm576_vm1, %v514_v26, 0.0  ;;  %v655_v39 = vmul.f32 %v514_v26, %v514_v26  ;;  %v757_v40 = vpack.c.bf16 %v514_v26, %v514_v26  ;;  %v765_v35 = vpack.c.bf16 %v1470_v29, %v1470_v29 }
  0xe5   : > { %v591_v43 = vadd.f32 %v590_v38, %v589_v32  ;;  %805 = vst.msk [vmem:[%s1282_s25 + $0x58] sm:$0xf] %vm782_vm0, %v772_v33  ;;  %v604_v32 = vsel %vm576_vm1, %v1434_v51, 0.0  ;;  %v663_v33 = vmul.f32 %v1470_v29, %v1470_v29  ;;  %v664_v38 = vmul.f32 %v1293_v34, %v1293_v34 }
  0xe6   : > { %v693_v50 = vsel %vm576_vm1, %v655_v39, 0.0  ;;  %790 = vst.msk [vmem:[%s1282_s25 + $0x1c] sm:$0xf] %vm782_vm0, %v757_v40  ;;  %v707_v39 = vsel %vm576_vm1, %v662_v25, 0.0  ;;  %v606_v40 = vsel %vm576_vm1, %v1470_v29, 0.0  ;;  %v608_v51 = vsel %vm576_vm1, %v1293_v34, 0.0 }
  0xe7   : > { %v593_v52 = vadd.f32 %v592_v44, %v591_v43  ;;  %v694_v54 = vadd.f32 %v693_v50, %v692_v42  ;;  %798 = vst.msk [vmem:[%s1282_s25 + $0x3c] sm:$0xf] %vm782_vm0, %v765_v35  ;;  %v665_v35 = vmul.f32 %v1317_v45, %v1317_v45  ;;  %v709_v44 = vsel %vm576_vm1, %v663_v33, 0.0 }
  0xe8   : > { %v553_v28 = vpop.f32.mrf.mxu2  ;;  %v573_v3 = vpop.f32.mrf.mxu3  ;;  %813 = vst.msk [vmem:[%s1282_s25 + $0x78] sm:$0xf] %vm782_vm0, %v780_v12  ;;  %v711_v27 = vsel %vm576_vm1, %v664_v38, 0.0  ;;  %v666_v29 = vmul.f32 %v1347_v58, %v1347_v58  ;;  %v612_v34 = vsel %vm576_vm1, %v1347_v58, 0.0  ;;  %v616_v58 = vsel %vm576_vm1, %v1395_v18, 0.0 }
  0xe9   : > { %v595_v57 = vadd.f32 %v594_v56, %v593_v52  ;;  %v696_v59 = vadd.f32 %v695_v55, %v694_v54  ;;  %v1498_v61 = vadd.f32 %v1269_v24, %v553_v28  ;;  %v1518_v15 = vadd.f32 %v1269_v24, %v573_v3 }
  0xea   : > { %v602_v24 = vsel %vm576_vm1, %v1399_v20, 0.0  ;;  %v610_v52 = vsel %vm576_vm1, %v1317_v45, 0.0  ;;  %v713_v56 = vsel %vm576_vm1, %v665_v35, 0.0  ;;  %v667_v28 = vmul.f32 %v1366_v4, %v1366_v4 }
  0xeb   : > { %v597_v8 = vadd.f32 %v596_v0, %v595_v57  ;;  %v698_v9 = vadd.f32 %v697_v62, %v696_v59  ;;  %v773_v48 = vpack.c.bf16 %v1498_v61, %v1498_v61  ;;  %v781_v6 = vpack.c.bf16 %v1518_v15, %v1518_v15 }
  0xec   : > { %v715_v62 = vsel %vm576_vm1, %v666_v29, 0.0  ;;  %v614_v45 = vsel %vm576_vm1, %v1366_v4, 0.0  ;;  %v668_v0 = vmul.f32 %v1395_v18, %v1395_v18  ;;  %v618_v4 = vsel %vm576_vm1, %v1430_v49, 0.0 }
  0xed   : > { %v700_v13 = vadd.f32 %v699_v36, %v698_v9  ;;  %v599_v14 = vadd.f32 %v598_v5, %v597_v8  ;;  %806 = vst.msk [vmem:[%s1282_s25 + $0x5c] sm:$0xf] %vm782_vm0, %v773_v48  ;;  %v717_v36 = vsel %vm576_vm1, %v667_v28, 0.0  ;;  %v669_v8 = vmul.f32 %v1430_v49, %v1430_v49 }
  0xee   : > { %814 = vst.msk [vmem:[%s1282_s25 + $0x7c] sm:$0xf] %vm782_vm0, %v781_v6  ;;  %v719_v10 = vsel %vm576_vm1, %v668_v0, 0.0  ;;  %v670_v48 = vmul.f32 %v1465_v23, %v1465_v23  ;;  %v620_v18 = vsel %vm576_vm1, %v1465_v23, 0.0  ;;  %v624_v25 = vsel %vm576_vm1, %v1314_v41, 0.0 }
  0xef   : > { %v601_v19 = vadd.f32 %v600_v60, %v599_v14  ;;  %v702_v21 = vadd.f32 %v701_v16, %v700_v13  ;;  %v721_v14 = vsel %vm576_vm1, %v669_v8, 0.0  ;;  %v671_v16 = vmul.f32 %v1498_v61, %v1498_v61 }
  0xf0   : > { %v723_v49 = vsel %vm576_vm1, %v670_v48, 0.0  ;;  %v673_v23 = vmul.f32 %v1340_v53, %v1340_v53  ;;  %v675_v38 = vmul.f32 %v1378_v11, %v1378_v11  ;;  %v678_v29 = vmul.f32 %v1506_v2, %v1506_v2 }
  0xf1   : > { %v603_v26 = vadd.f32 %v602_v24, %v601_v19  ;;  %v704_v30 = vadd.f32 %v703_v22, %v702_v21  ;;  %v672_v19 = vmul.f32 %v1314_v41, %v1314_v41  ;;  %v622_v21 = vsel %vm576_vm1, %v1498_v61, 0.0 }
  0xf2   : > { %v725_v6 = vsel %vm576_vm1, %v671_v16, 0.0  ;;  %v674_v61 = vmul.f32 %v1373_v7, %v1373_v7  ;;  %v628_v41 = vsel %vm576_vm1, %v1373_v7, 0.0  ;;  %v632_v7 = vsel %vm576_vm1, %v1437_v47, 0.0 }
  0xf3   : > { %v605_v37 = vadd.f32 %v604_v32, %v603_v26  ;;  %v706_v20 = vadd.f32 %v705_v31, %v704_v30  ;;  %v727_v31 = vsel %vm576_vm1, %v672_v19, 0.0  ;;  %v626_v32 = vsel %vm576_vm1, %v1340_v53, 0.0 }
  0xf4   : > { %v630_v53 = vsel %vm576_vm1, %v1378_v11, 0.0  ;;  %v634_v11 = vsel %vm576_vm1, %v1444_v63, 0.0 }
  0xf5   : > { %v708_v42 = vadd.f32 %v707_v39, %v706_v20  ;;  %v607_v43 = vadd.f32 %v606_v40, %v605_v37  ;;  %v729_v20 = vsel %vm576_vm1, %v673_v23, 0.0 }
  0xf7   : > { %v609_v46 = vadd.f32 %v608_v51, %v607_v43  ;;  %v710_v50 = vadd.f32 %v709_v44, %v708_v42  ;;  %v731_v42 = vsel %vm576_vm1, %v674_v61, 0.0  ;;  %v676_v43 = vmul.f32 %v1437_v47, %v1437_v47 }
  0xf8   : > { %v733_v44 = vsel %vm576_vm1, %v675_v38, 0.0  ;;  %v636_v47 = vsel %vm576_vm1, %v1506_v2, 0.0 }
  0xf9   : > { %v611_v54 = vadd.f32 %v610_v52, %v609_v46  ;;  %v712_v55 = vadd.f32 %v711_v27, %v710_v50  ;;  %v677_v46 = vmul.f32 %v1444_v63, %v1444_v63  ;;  %v735_v52 = vsel %vm576_vm1, %v676_v43, 0.0 }
  0xfa   : > { %v638_v63 = vsel %vm576_vm1, %v1518_v15, 0.0 }
  0xfb   : > { %v714_v57 = vadd.f32 %v713_v56, %v712_v55  ;;  %v613_v59 = vadd.f32 %v612_v34, %v611_v54  ;;  %v737_v56 = vsel %vm576_vm1, %v677_v46, 0.0  ;;  %v679_v34 = vmul.f32 %v1518_v15, %v1518_v15 }
  0xfd   : > { %v615_v1 = vadd.f32 %v614_v45, %v613_v59  ;;  %v716_v3 = vadd.f32 %v715_v62, %v714_v57  ;;  %v739_v59 = vsel %vm576_vm1, %v678_v29, 0.0  ;;  %v741_v0 = vsel %vm576_vm1, %v679_v34, 0.0 }
  0xff   : > { %v617_v9 = vadd.f32 %v616_v58, %v615_v1  ;;  %v718_v5 = vadd.f32 %v717_v36, %v716_v3 }
 0x101   : > { %v619_v12 = vadd.f32 %v618_v4, %v617_v9  ;;  %v720_v13 = vadd.f32 %v719_v10, %v718_v5 }
 0x103   : > { %v722_v60 = vadd.f32 %v721_v14, %v720_v13  ;;  %v621_v17 = vadd.f32 %v620_v18, %v619_v12 }
 0x105   : > { %v724_v22 = vadd.f32 %v723_v49, %v722_v60  ;;  %v623_v24 = vadd.f32 %v622_v21, %v621_v17 }
 0x107   : > { %v625_v26 = vadd.f32 %v624_v25, %v623_v24  ;;  %v726_v30 = vadd.f32 %v725_v6, %v724_v22 }
 0x109   : > { %v627_v33 = vadd.f32 %v626_v32, %v625_v26  ;;  %v728_v37 = vadd.f32 %v727_v31, %v726_v30 }
 0x10b   : > { %v730_v39 = vadd.f32 %v729_v20, %v728_v37  ;;  %v629_v40 = vadd.f32 %v628_v41, %v627_v33 }
 0x10d   : > { %v631_v51 = vadd.f32 %v630_v53, %v629_v40  ;;  %v732_v35 = vadd.f32 %v731_v42, %v730_v39 }
 0x10f   : > { %v633_v50 = vadd.f32 %v632_v7, %v631_v51  ;;  %v734_v27 = vadd.f32 %v733_v44, %v732_v35 }
 0x111   : > { %v635_v54 = vadd.f32 %v634_v11, %v633_v50  ;;  %v736_v55 = vadd.f32 %v735_v52, %v734_v27 }
 0x113   : > { %v738_v28 = vadd.f32 %v737_v56, %v736_v55  ;;  %v637_v57 = vadd.f32 %v636_v47, %v635_v54 }
 0x115   : > { %v740_v62 = vadd.f32 %v739_v59, %v738_v28  ;;  %v639_v45 = vadd.f32 %v638_v63, %v637_v57 }
 0x117   : > { %v640_v1 = vrot.slane %v639_v45, 4  ;;  %v742_v3 = vadd.f32 %v741_v0, %v740_v62 }
 0x119   : > { %v641_v36 = vadd.f32 %v640_v1, %v639_v45  ;;  %v743_v2 = vrot.slane %v742_v3, 4 }
 0x11b   : > { %v642_v58 = vrot.slane %v641_v36, 2  ;;  %v744_v8 = vadd.f32 %v743_v2, %v742_v3 }
 0x11d   : > { %v643_v9 = vadd.f32 %v642_v58, %v641_v36  ;;  %v745_v5 = vrot.slane %v744_v8, 2 }
 0x11f   : > { %v644_v10 = vrot.slane %v643_v9, 1  ;;  %v746_v4 = vadd.f32 %v745_v5, %v744_v8 }
 0x121   : > { %v645_v15 = vadd.f32 %v644_v10, %v643_v9  ;;  %v747_v48 = vrot.slane %v746_v4, 1 }
 0x123   : > { %647 = vst.msk [vmem:[%s284_s28] sm:$0x1] %vm646_vm2, %v645_v15  ;;  %v748_v12 = vadd.f32 %v747_v48, %v746_v4 }
 0x125   : > { %749 = vst.msk [vmem:[%s289_s6] sm:$0x1] %vm646_vm2, %v748_v12 }
 0x126 PF: > { %s16_s20 = sadd.s32 1, %s1162_s20   ;;  %s1650_s18 = smov %s1158_s19 }
 0x127   : > { %p13_p5 = scmp.ge.s32.totalorder %s16_s20, 4   ;;  %s1651_s19 = smov %s1653_s21 }
 0x129   :  { %15 = sbr.rel (!%p13_p5) target bundleno = 2 (0x2), region = 86 }

// kernel: forward.18
= control target key start
LH: loop header
LB: loop body
LE: loop exit
PB: predicated region body
PF: predicated region fallthrough
CT: control target
= control target key end

     0   :  { %s977_s18 = smov 0   ;;  %s979_s19 = smov 0   ;;  %s1139_s0 = inlined_call_operand.vmem [shape: bf16[2,64,256], index: 0, kind: input, shape index: {}]   ;;  %s1140_s1 = inlined_call_operand.vmem [shape: bf16[256,32], index: 1, kind: input, shape index: {}]   ;;  %s1141_s2 = inlined_call_operand.vmem [shape: f32[1,32], index: 2, kind: input, shape index: {}]   ;;  %s1142_s3 = inlined_call_operand.vmem [shape: bf16[2,64,32], index: 3, kind: output, shape index: {0}]   ;;  %s1143_s4 = inlined_call_operand.vmem [shape: f32[2,1,32], index: 4, kind: output, shape index: {1}]   ;;  %s1144_s5 = inlined_call_operand.vmem [shape: f32[2,1,32], index: 5, kind: output, shape index: {2}]  }
   0x1   :  { %s981_s20 = smov 0  }
   0x2 LB: > { %s28_s21 = sadd.s32 1, %s941_s19  ;;  %p753_p0 = scmp.ge.s32.totalorder %s945_s20, 1  ;;  %s945_s20 = sphi %s981_s20, %s16_s20   ;;  %s941_s19 = sphi %s979_s19, %s1146_s19   ;;  %s937_s18 = sphi %s977_s18, %s1145_s18  }
   0x3   : > { %p30_p1 = scmp.ge.s32.totalorder %s28_s21, 2  ;;  %p218_p2 = scmp.lt.s32.totalorder %s945_s20, 3 }
   0x5   : > { %s1148_s21 = smov (%p30_p1, %s28_s21), 0  ;;  %p219_p3 = pnand %p753_p0, %p218_p2 }
   0x6   : > { %p264_p4 = scmp.lt.s32.totalorder (!%p219_p3), %s937_s18, 1 }
   0x7   : > { %222 = sbr.rel (%p219_p3) target bundleno = 224 (0xe0), region = 32 }
   0xc   : > { %v873_v0 = vld [vmem:[%s1140_s1 + $0x38] sm:$0xff]  ;;  %v872_v2 = vld [vmem:[%s1140_s1 + $0x30] sm:$0xff]  ;;  %v871_v4 = vld [vmem:[%s1140_s1 + $0x28] sm:$0xff]  ;;  %s1150_s18 = smov (!%p264_p4, %s937_s18), 1  ;;  %vm594_vm0 = vcmask 257024   ;;  %vm532_vm1 = vcmask 261120  }
   0xd   : > { %v881_v1 = vld [vmem:[%s1140_s1 + $0x78] sm:$0xff]  ;;  %474 = vmatpush.bf16.msra.mxu0 %v873_v0  ;;  %882 = vmatpush.bf16.msra.mxu2 %v873_v0  ;;  %v880_v3 = vld [vmem:[%s1140_s1 + $0x70] sm:$0xff]  ;;  %v879_v5 = vld [vmem:[%s1140_s1 + $0x68] sm:$0xff]  ;;  %s856_s25 = sshll.u32 %s1150_s18, 6  ;;  %s857_s14 = sshll.u32 %s1150_s18, 5  ;;  %vm554_vm2 = vcmask 253952  }
   0xe   : > { %503 = vmatpush.bf16.msra.mxu1 %v881_v1  ;;  %890 = vmatpush.bf16.msra.mxu3 %v881_v1  ;;  %v870_v6 = vld [vmem:[%s1140_s1 + $0x20] sm:$0xff]  ;;  %v869_v8 = vld [vmem:[%s1140_s1 + $0x18] sm:$0xff]  ;;  %v868_v10 = vld [vmem:[%s1140_s1 + $0x10] sm:$0xff]  ;;  %s1044_s30 = scalar_lea.vmem %s1139_s0, %s856_s25  ;;  %s1081_s17 = scalar_lea.vmem %s1142_s3, %s857_s14 }
   0xf   : > { %v878_v7 = vld [vmem:[%s1140_s1 + $0x60] sm:$0xff]  ;;  %v877_v9 = vld [vmem:[%s1140_s1 + $0x58] sm:$0xff]  ;;  %v876_v11 = vld [vmem:[%s1140_s1 + $0x50] sm:$0xff]  ;;  %s287_s24 = scalar_lea.vmem %s1143_s4, %s1150_s18  ;;  %s292_s27 = scalar_lea.vmem %s1144_s5, %s1150_s18 }
  0x10   : > { %v867_v12 = vld [vmem:[%s1140_s1 + $0x8] sm:$0xff]  ;;  %v866_v14 = vld [vmem:[%s1140_s1] sm:$0xff]  ;;  %v768_v28 = vld [vmem:[%s1044_s30 + $0x10] sm:$0xf] }
  0x11   : > { %475 = vmatpush.bf16.msra.mxu0 %v872_v2  ;;  %883 = vmatpush.bf16.msra.mxu2 %v872_v2  ;;  %v875_v13 = vld [vmem:[%s1140_s1 + $0x48] sm:$0xff]  ;;  %v874_v15 = vld [vmem:[%s1140_s1 + $0x40] sm:$0xff]  ;;  %v861_v29 = vld [vmem:[%s1044_s30 + $0x14] sm:$0xf0] }
  0x12   : > { %504 = vmatpush.bf16.msra.mxu1 %v880_v3  ;;  %891 = vmatpush.bf16.msra.mxu3 %v880_v3  ;;  %v760_v16 = vld [vmem:[%s1044_s30] sm:$0xf]  ;;  %v859_v17 = vld [vmem:[%s1044_s30 + $0x4] sm:$0xf0]  ;;  %v858_v20 = vld [vmem:[%s1044_s30 + $0x4] sm:$0xf]  ;;  %v769_v36 = vor.u32 %v861_v29, %v768_v28 }
  0x13   : > { %v776_v18 = vld [vmem:[%s1044_s30 + $0x20] sm:$0xf]  ;;  %v863_v19 = vld [vmem:[%s1044_s30 + $0x24] sm:$0xf0]  ;;  %v762_v21 = vld [vmem:[%s1044_s30 + $0x8] sm:$0xf0]  ;;  %v761_v24 = vor.u32 %v859_v17, %v760_v16 }
  0x14   : > { %v862_v22 = vld [vmem:[%s1044_s30 + $0x24] sm:$0xf]  ;;  %v778_v23 = vld [vmem:[%s1044_s30 + $0x28] sm:$0xf0]  ;;  %v777_v25 = vor.u32 %v863_v19, %v776_v18  ;;  %v765_v26 = vor.u32 %v858_v20, %v762_v21  ;;  %v784_v30 = vld [vmem:[%s1044_s30 + $0x30] sm:$0xf] }
  0x15   : > { %476 = vmatpush.bf16.msra.mxu0 %v871_v4  ;;  %884 = vmatpush.bf16.msra.mxu2 %v871_v4  ;;  %v781_v27 = vor.u32 %v862_v22, %v778_v23  ;;  %v865_v31 = vld [vmem:[%s1044_s30 + $0x34] sm:$0xf0]  ;;  %v860_v32 = vld [vmem:[%s1044_s30 + $0x14] sm:$0xf]  ;;  %v770_v33 = vld [vmem:[%s1044_s30 + $0x18] sm:$0xf0] }
  0x16   : > { %505 = vmatpush.bf16.msra.mxu1 %v879_v5  ;;  %892 = vmatpush.bf16.msra.mxu3 %v879_v5  ;;  %v864_v34 = vld [vmem:[%s1044_s30 + $0x34] sm:$0xf]  ;;  %v786_v35 = vld [vmem:[%s1044_s30 + $0x38] sm:$0xf0]  ;;  %v785_v37 = vor.u32 %v865_v31, %v784_v30  ;;  %v773_v38 = vor.u32 %v860_v32, %v770_v33  ;;  %v1074_v40 = vld [vmem:[%s1141_s2] ss:$0 sm:$0xff] }
  0x17   : > { %v789_v39 = vor.u32 %v864_v34, %v786_v35 }
  0x19   : > { %477 = vmatpush.bf16.msra.mxu0 %v870_v6  ;;  %885 = vmatpush.bf16.msra.mxu2 %v870_v6 }
  0x1a   : > { %506 = vmatpush.bf16.msra.mxu1 %v878_v7  ;;  %893 = vmatpush.bf16.msra.mxu3 %v878_v7 }
  0x1d   : > { %478 = vmatpush.bf16.msra.mxu0 %v869_v8  ;;  %886 = vmatpush.bf16.msra.mxu2 %v869_v8 }
  0x1e   : > { %507 = vmatpush.bf16.msra.mxu1 %v877_v9  ;;  %894 = vmatpush.bf16.msra.mxu3 %v877_v9 }
  0x21   : > { %479 = vmatpush.bf16.msra.mxu0 %v868_v10  ;;  %887 = vmatpush.bf16.msra.mxu2 %v868_v10 }
  0x22   : > { %508 = vmatpush.bf16.msra.mxu1 %v876_v11  ;;  %895 = vmatpush.bf16.msra.mxu3 %v876_v11 }
  0x25   : > { %480 = vmatpush.bf16.msra.mxu0 %v867_v12  ;;  %888 = vmatpush.bf16.msra.mxu2 %v867_v12 }
  0x26   : > { %509 = vmatpush.bf16.msra.mxu1 %v875_v13  ;;  %896 = vmatpush.bf16.msra.mxu3 %v875_v13 }
  0x29   : > { %481 = vmatpush.bf16.msra.mxu0 %v866_v14  ;;  %889 = vmatpush.bf16.msra.mxu2 %v866_v14 }
  0x2a   : > { %510 = vmatpush.bf16.msra.mxu1 %v874_v15  ;;  %897 = vmatpush.bf16.msra.mxu3 %v874_v15 }
  0x2c   : > { %482 = vmatmul.bf16.vlgmr.msra.gmra.mxu0 %v761_v24  ;;  %492 = vmatmul.bf16.vlgmr.msra.gmra.mxu2 %v777_v25 }
  0x2d   : > { %511 = vmatmul.bf16.vlgmr.msra.gmra.mxu1 %v765_v26  ;;  %521 = vmatmul.bf16.vlgmr.msra.gmra.mxu3 %v781_v27 }
  0x3c   : > { %487 = vmatmul.bf16.gmra.mxu0 %v769_v36  ;;  %497 = vmatmul.bf16.gmra.mxu2 %v785_v37 }
  0x3d   : > { %516 = vmatmul.bf16.gmra.mxu1 %v773_v38  ;;  %526 = vmatmul.bf16.gmra.mxu3 %v789_v39 }
  0xa9   : > { %v483_v41 = vpop.f32.mrf.mxu0 }
  0xaa   : > { %v484_v42 = vadd.f32 %v1074_v40, %v483_v41  ;;  %v512_v43 = vpop.f32.mrf.mxu1 }
  0xac   : > { %v513_v44 = vadd.f32 %v512_v43, %v484_v42 }
  0xae   : > { %v586_v45 = vpack.c.bf16 %v513_v44, %v513_v44  ;;  %v556_v4 = vmul.f32 %v513_v44, %v513_v44  ;;  %v533_v9 = vsel %vm532_vm1, %v513_v44, 0.0 }
  0xaf   : > { %v493_v46 = vpop.f32.mrf.mxu2 }
  0xb0   : > { %595 = vst.msk [vmem:[%s1081_s17] sm:$0xf] %vm594_vm0, %v586_v45  ;;  %v494_v47 = vadd.f32 %v1074_v40, %v493_v46  ;;  %v522_v48 = vpop.f32.mrf.mxu3  ;;  %v564_v17 = vsel %vm532_vm1, %v556_v4, 0.0 }
  0xb1   : > { %v485_v49 = vpop.f32.mrf.mxu0 }
  0xb2   : > { %v523_v50 = vadd.f32 %v522_v48, %v494_v47  ;;  %v486_v51 = vadd.f32 %v1074_v40, %v485_v49  ;;  %v514_v52 = vpop.f32.mrf.mxu1 }
  0xb4   : > { %v590_v53 = vpack.c.bf16 %v523_v50, %v523_v50  ;;  %v515_v54 = vadd.f32 %v514_v52, %v486_v51  ;;  %v560_v23 = vmul.f32 %v523_v50, %v523_v50  ;;  %v540_v30 = vsel %vm532_vm1, %v523_v50, 0.0 }
  0xb6   : > { %599 = vst.msk [vmem:[%s1081_s17 + $0x10] sm:$0xf] %vm594_vm0, %v590_v53  ;;  %v587_v55 = vpack.c.bf16 %v515_v54, %v515_v54  ;;  %v557_v1 = vmul.f32 %v515_v54, %v515_v54  ;;  %v534_v5 = vsel %vm532_vm1, %v515_v54, 0.0  ;;  %v571_v37 = vsel %vm532_vm1, %v560_v23, 0.0 }
  0xb7   : > { %v495_v56 = vpop.f32.mrf.mxu2  ;;  %v535_v15 = vadd.f32 %v534_v5, %v533_v9 }
  0xb8   : > { %596 = vst.msk [vmem:[%s1081_s17 + $0x4] sm:$0xf] %vm594_vm0, %v587_v55  ;;  %v496_v57 = vadd.f32 %v1074_v40, %v495_v56  ;;  %v524_v58 = vpop.f32.mrf.mxu3  ;;  %v565_v11 = vsel %vm532_vm1, %v557_v1, 0.0 }
  0xb9   : > { %v488_v59 = vpop.f32.mrf.mxu0  ;;  %v566_v21 = vadd.f32 %v565_v11, %v564_v17 }
  0xba   : > { %v525_v60 = vadd.f32 %v524_v58, %v496_v57  ;;  %v489_v61 = vadd.f32 %v1074_v40, %v488_v59  ;;  %v517_v62 = vpop.f32.mrf.mxu1 }
  0xbc   : > { %v591_v63 = vpack.c.bf16 %v525_v60, %v525_v60  ;;  %v518_v0 = vadd.f32 %v517_v62, %v489_v61  ;;  %v561_v31 = vmul.f32 %v525_v60, %v525_v60  ;;  %v542_v38 = vsel %vm532_vm1, %v525_v60, 0.0 }
  0xbe   : > { %600 = vst.msk [vmem:[%s1081_s17 + $0x14] sm:$0xf] %vm594_vm0, %v591_v63  ;;  %v588_v2 = vpack.c.bf16 %v518_v0, %v518_v0  ;;  %v558_v6 = vmul.f32 %v518_v0, %v518_v0  ;;  %v536_v12 = vsel %vm532_vm1, %v518_v0, 0.0  ;;  %v573_v44 = vsel %vm532_vm1, %v561_v31, 0.0 }
  0xbf   : > { %v498_v3 = vpop.f32.mrf.mxu2  ;;  %v537_v22 = vadd.f32 %v536_v12, %v535_v15 }
  0xc0   : > { %597 = vst.msk [vmem:[%s1081_s17 + $0x8] sm:$0xf] %vm594_vm0, %v588_v2  ;;  %v499_v7 = vadd.f32 %v1074_v40, %v498_v3  ;;  %v527_v8 = vpop.f32.mrf.mxu3  ;;  %v567_v18 = vsel %vm532_vm1, %v558_v6, 0.0 }
  0xc1   : > { %v490_v10 = vpop.f32.mrf.mxu0  ;;  %v568_v27 = vadd.f32 %v567_v18, %v566_v21 }
  0xc2   : > { %v528_v13 = vadd.f32 %v527_v8, %v499_v7  ;;  %v491_v14 = vadd.f32 %v1074_v40, %v490_v10  ;;  %v519_v16 = vpop.f32.mrf.mxu1 }
  0xc4   : > { %v592_v19 = vpack.c.bf16 %v528_v13, %v528_v13  ;;  %v520_v20 = vadd.f32 %v519_v16, %v491_v14  ;;  %v562_v39 = vmul.f32 %v528_v13, %v528_v13  ;;  %v544_v45 = vsel %vm532_vm1, %v528_v13, 0.0 }
  0xc6   : > { %601 = vst.msk [vmem:[%s1081_s17 + $0x18] sm:$0xf] %vm594_vm0, %v592_v19  ;;  %v538_v24 = vsel %vm532_vm1, %v520_v20, 0.0  ;;  %v559_v25 = vmul.f32 %v520_v20, %v520_v20  ;;  %v589_v26 = vpack.c.bf16 %v520_v20, %v520_v20  ;;  %v575_v49 = vsel %vm532_vm1, %v562_v39, 0.0 }
  0xc7   : > { %v539_v28 = vadd.f32 %v538_v24, %v537_v22  ;;  %v500_v29 = vpop.f32.mrf.mxu2 }
  0xc8   : > { %v569_v32 = vsel %vm532_vm1, %v559_v25, 0.0  ;;  %598 = vst.msk [vmem:[%s1081_s17 + $0xc] sm:$0xf] %vm594_vm0, %v589_v26  ;;  %v501_v33 = vadd.f32 %v1074_v40, %v500_v29  ;;  %v529_v36 = vpop.f32.mrf.mxu3 }
  0xc9   : > { %v541_v34 = vadd.f32 %v540_v30, %v539_v28  ;;  %v570_v35 = vadd.f32 %v569_v32, %v568_v27 }
  0xca   : > { %v530_v41 = vadd.f32 %v529_v36, %v501_v33 }
  0xcb   : > { %v572_v42 = vadd.f32 %v571_v37, %v570_v35  ;;  %v543_v43 = vadd.f32 %v542_v38, %v541_v34 }
  0xcc   : > { %v563_v46 = vmul.f32 %v530_v41, %v530_v41  ;;  %v593_v47 = vpack.c.bf16 %v530_v41, %v530_v41  ;;  %v546_v50 = vsel %vm532_vm1, %v530_v41, 0.0 }
  0xcd   : > { %v545_v48 = vadd.f32 %v544_v45, %v543_v43  ;;  %v574_v40 = vadd.f32 %v573_v44, %v572_v42 }
  0xce   : > { %602 = vst.msk [vmem:[%s1081_s17 + $0x1c] sm:$0xf] %vm594_vm0, %v593_v47  ;;  %v577_v53 = vsel %vm532_vm1, %v563_v46, 0.0 }
  0xcf   : > { %v547_v51 = vadd.f32 %v546_v50, %v545_v48  ;;  %v576_v52 = vadd.f32 %v575_v49, %v574_v40 }
  0xd1   : > { %v548_v54 = vrot.slane %v547_v51, 4  ;;  %v578_v55 = vadd.f32 %v577_v53, %v576_v52 }
  0xd3   : > { %v549_v56 = vadd.f32 %v548_v54, %v547_v51  ;;  %v579_v57 = vrot.slane %v578_v55, 4 }
  0xd5   : > { %v550_v58 = vrot.slane %v549_v56, 2  ;;  %v580_v59 = vadd.f32 %v579_v57, %v578_v55 }
  0xd7   : > { %v551_v60 = vadd.f32 %v550_v58, %v549_v56  ;;  %v581_v61 = vrot.slane %v580_v59, 2 }
  0xd9   : > { %v552_v62 = vrot.slane %v551_v60, 1  ;;  %v582_v63 = vadd.f32 %v581_v61, %v580_v59 }
  0xdb   : > { %v553_v0 = vadd.f32 %v552_v62, %v551_v60  ;;  %v583_v1 = vrot.slane %v582_v63, 1 }
  0xdd   : > { %555 = vst.msk [vmem:[%s287_s24] sm:$0x1] %vm554_vm2, %v553_v0  ;;  %v584_v2 = vadd.f32 %v583_v1, %v582_v63 }
  0xdf   : > { %585 = vst.msk [vmem:[%s292_s27] sm:$0x1] %vm554_vm2, %v584_v2 }
  0xe0 PF: > { %s16_s20 = sadd.s32 1, %s945_s20   ;;  %s1145_s18 = smov %s941_s19 }
  0xe1   : > { %p13_p5 = scmp.ge.s32.totalorder %s16_s20, 4   ;;  %s1146_s19 = smov %s1148_s21 }
  0xe3   :  { %15 = sbr.rel (!%p13_p5) target bundleno = 2 (0x2), region = 86 }

// kernel: forward.19
= control target key start
LH: loop header
LB: loop body
LE: loop exit
PB: predicated region body
PF: predicated region fallthrough
CT: control target
= control target key end

     0   :  { %s1081_s18 = smov 0   ;;  %s1083_s19 = smov 0   ;;  %s1231_s0 = inlined_call_operand.vmem [shape: bf16[2,16,512], index: 0, kind: input, shape index: {}]   ;;  %s1232_s1 = inlined_call_operand.vmem [shape: bf16[512,64], index: 1, kind: input, shape index: {}]   ;;  %s1233_s2 = inlined_call_operand.vmem [shape: f32[1,64], index: 2, kind: input, shape index: {}]   ;;  %s1234_s3 = inlined_call_operand.vmem [shape: bf16[2,16,64], index: 3, kind: output, shape index: {0}]   ;;  %s1235_s4 = inlined_call_operand.vmem [shape: f32[2,1,64], index: 4, kind: output, shape index: {1}]   ;;  %s1236_s5 = inlined_call_operand.vmem [shape: f32[2,1,64], index: 5, kind: output, shape index: {2}]  }
   0x1   :  { %s1085_s20 = smov 0  }
   0x2 LB: > { %s28_s21 = sadd.s32 1, %s1045_s19  ;;  %p813_p0 = scmp.ge.s32.totalorder %s1049_s20, 1  ;;  %s1049_s20 = sphi %s1085_s20, %s16_s20   ;;  %s1045_s19 = sphi %s1083_s19, %s1238_s19   ;;  %s1041_s18 = sphi %s1081_s18, %s1237_s18  }
   0x3   : > { %p30_p1 = scmp.ge.s32.totalorder %s28_s21, 2  ;;  %p218_p2 = scmp.lt.s32.totalorder %s1049_s20, 3 }
   0x5   : > { %s1240_s21 = smov (%p30_p1, %s28_s21), 0  ;;  %p219_p3 = pnand %p813_p0, %p218_p2 }
   0x6   : > { %p264_p4 = scmp.lt.s32.totalorder (!%p219_p3), %s1041_s18, 1 }
   0x7   : > { %222 = sbr.rel (%p219_p3) target bundleno = 208 (0xd0), region = 32 }
   0xc   : > { %v977_v0 = vld [vmem:[%s1232_s1 + $0x38] sm:$0xff]  ;;  %v976_v4 = vld [vmem:[%s1232_s1 + $0x30] sm:$0xff]  ;;  %v975_v8 = vld [vmem:[%s1232_s1 + $0x28] sm:$0xff]  ;;  %s1242_s18 = smov (!%p264_p4, %s1041_s18), 1  ;;  %vm660_vm0 = vcmask 519168   ;;  %vm634_vm1 = vcmask 523264  }
   0xd   : > { %v985_v1 = vld [vmem:[%s1232_s1 + $0x78] sm:$0xff]  ;;  %578 = vmatpush.bf16.msra.mxu0 %v977_v0  ;;  %v984_v5 = vld [vmem:[%s1232_s1 + $0x70] sm:$0xff]  ;;  %v983_v9 = vld [vmem:[%s1232_s1 + $0x68] sm:$0xff]  ;;  %s964_s28 = sshll.u32 %s1242_s18, 5  ;;  %s965_s29 = sshll.u32 %s1242_s18, 3  ;;  %vm644_vm2 = vcmask 516096  }
   0xe   : > { %v993_v2 = vld [vmem:[%s1232_s1 + $0xb8] sm:$0xff]  ;;  %592 = vmatpush.bf16.msra.mxu1 %v985_v1  ;;  %v992_v6 = vld [vmem:[%s1232_s1 + $0xb0] sm:$0xff]  ;;  %v991_v10 = vld [vmem:[%s1232_s1 + $0xa8] sm:$0xff]  ;;  %s272_s10 = scalar_lea.vmem %s1231_s0, %s964_s28  ;;  %s282_s7 = scalar_lea.vmem %s1234_s3, %s965_s29 }
   0xf   : > { %v1001_v3 = vld [vmem:[%s1232_s1 + $0xf8] sm:$0xff]  ;;  %606 = vmatpush.bf16.msra.mxu2 %v993_v2  ;;  %v1000_v7 = vld [vmem:[%s1232_s1 + $0xf0] sm:$0xff]  ;;  %v999_v11 = vld [vmem:[%s1232_s1 + $0xe8] sm:$0xff]  ;;  %s292_s13 = scalar_lea.vmem %s1236_s5, %s1242_s18 }
  0x10   : > { %620 = vmatpush.bf16.msra.mxu3 %v1001_v3  ;;  %v974_v12 = vld [vmem:[%s1232_s1 + $0x20] sm:$0xff]  ;;  %v973_v16 = vld [vmem:[%s1232_s1 + $0x18] sm:$0xff]  ;;  %v972_v20 = vld [vmem:[%s1232_s1 + $0x10] sm:$0xff] }
  0x11   : > { %579 = vmatpush.bf16.msra.mxu0 %v976_v4  ;;  %v982_v13 = vld [vmem:[%s1232_s1 + $0x60] sm:$0xff]  ;;  %v981_v17 = vld [vmem:[%s1232_s1 + $0x58] sm:$0xff]  ;;  %v980_v21 = vld [vmem:[%s1232_s1 + $0x50] sm:$0xff] }
  0x12   : > { %593 = vmatpush.bf16.msra.mxu1 %v984_v5  ;;  %v990_v14 = vld [vmem:[%s1232_s1 + $0xa0] sm:$0xff]  ;;  %v989_v18 = vld [vmem:[%s1232_s1 + $0x98] sm:$0xff]  ;;  %v988_v22 = vld [vmem:[%s1232_s1 + $0x90] sm:$0xff] }
  0x13   : > { %607 = vmatpush.bf16.msra.mxu2 %v992_v6  ;;  %v998_v15 = vld [vmem:[%s1232_s1 + $0xe0] sm:$0xff]  ;;  %v997_v19 = vld [vmem:[%s1232_s1 + $0xd8] sm:$0xff]  ;;  %v996_v23 = vld [vmem:[%s1232_s1 + $0xd0] sm:$0xff] }
  0x14   : > { %621 = vmatpush.bf16.msra.mxu3 %v1000_v7  ;;  %v971_v24 = vld [vmem:[%s1232_s1 + $0x8] sm:$0xff]  ;;  %v970_v28 = vld [vmem:[%s1232_s1] sm:$0xff]  ;;  %v968_v33 = vld [vmem:[%s272_s10 + $0xc] sm:$0xf0] }
  0x15   : > { %580 = vmatpush.bf16.msra.mxu0 %v975_v8  ;;  %v979_v25 = vld [vmem:[%s1232_s1 + $0x48] sm:$0xff]  ;;  %v978_v29 = vld [vmem:[%s1232_s1 + $0x40] sm:$0xff]  ;;  %v822_v35 = vld [vmem:[%s272_s10 + $0x10] sm:$0xf0] }
  0x16   : > { %594 = vmatpush.bf16.msra.mxu1 %v983_v9  ;;  %v987_v26 = vld [vmem:[%s1232_s1 + $0x88] sm:$0xff]  ;;  %v986_v30 = vld [vmem:[%s1232_s1 + $0x80] sm:$0xff]  ;;  %v969_v37 = vld [vmem:[%s272_s10 + $0x14] sm:$0xf0] }
  0x17   : > { %608 = vmatpush.bf16.msra.mxu2 %v991_v10  ;;  %v995_v27 = vld [vmem:[%s1232_s1 + $0xc8] sm:$0xff]  ;;  %v994_v31 = vld [vmem:[%s1232_s1 + $0xc0] sm:$0xff]  ;;  %v830_v39 = vld [vmem:[%s272_s10 + $0x18] sm:$0xf0] }
  0x18   : > { %622 = vmatpush.bf16.msra.mxu3 %v999_v11  ;;  %v820_v32 = vld [vmem:[%s272_s10] sm:$0xf]  ;;  %v966_v34 = vld [vmem:[%s272_s10 + $0x4] sm:$0xf]  ;;  %v828_v36 = vld [vmem:[%s272_s10 + $0x8] sm:$0xf] }
  0x19   : > { %581 = vmatpush.bf16.msra.mxu0 %v974_v12  ;;  %v967_v38 = vld [vmem:[%s272_s10 + $0xc] sm:$0xf]  ;;  %v821_v40 = vor.u32 %v968_v33, %v820_v32  ;;  %v825_v41 = vor.u32 %v966_v34, %v822_v35  ;;  %v829_v42 = vor.u32 %v969_v37, %v828_v36  ;;  %v1026_v44 = vld [vmem:[%s1233_s2] ss:$0 sm:$0xff]  ;;  %s287_s10 = scalar_lea.vmem %s1235_s4, %s1242_s18 }
  0x1a   : > { %595 = vmatpush.bf16.msra.mxu1 %v982_v13  ;;  %v833_v43 = vor.u32 %v967_v38, %v830_v39 }
  0x1b   : > { %609 = vmatpush.bf16.msra.mxu2 %v990_v14 }
  0x1c   : > { %623 = vmatpush.bf16.msra.mxu3 %v998_v15 }
  0x1d   : > { %582 = vmatpush.bf16.msra.mxu0 %v973_v16 }
  0x1e   : > { %596 = vmatpush.bf16.msra.mxu1 %v981_v17 }
  0x1f   : > { %610 = vmatpush.bf16.msra.mxu2 %v989_v18 }
  0x20   : > { %624 = vmatpush.bf16.msra.mxu3 %v997_v19 }
  0x21   : > { %583 = vmatpush.bf16.msra.mxu0 %v972_v20 }
  0x22   : > { %597 = vmatpush.bf16.msra.mxu1 %v980_v21 }
  0x23   : > { %611 = vmatpush.bf16.msra.mxu2 %v988_v22 }
  0x24   : > { %625 = vmatpush.bf16.msra.mxu3 %v996_v23 }
  0x25   : > { %584 = vmatpush.bf16.msra.mxu0 %v971_v24 }
  0x26   : > { %598 = vmatpush.bf16.msra.mxu1 %v979_v25 }
  0x27   : > { %612 = vmatpush.bf16.msra.mxu2 %v987_v26 }
  0x28   : > { %626 = vmatpush.bf16.msra.mxu3 %v995_v27 }
  0x29   : > { %585 = vmatpush.bf16.msra.mxu0 %v970_v28 }
  0x2a   : > { %599 = vmatpush.bf16.msra.mxu1 %v978_v29 }
  0x2b   : > { %613 = vmatpush.bf16.msra.mxu2 %v986_v30 }
  0x2c   : > { %627 = vmatpush.bf16.msra.mxu3 %v994_v31  ;;  %586 = vmatmul.bf16.vlgmr.msra.gmra.mxu0 %v821_v40 }
  0x2d   : > { %600 = vmatmul.bf16.vlgmr.msra.gmra.mxu1 %v825_v41 }
  0x2e   : > { %614 = vmatmul.bf16.vlgmr.msra.gmra.mxu2 %v829_v42 }
  0x2f   : > { %628 = vmatmul.bf16.vlgmr.msra.gmra.mxu3 %v833_v43 }
  0xa9   : > { %v587_v45 = vpop.f32.mrf.mxu0 }
  0xaa   : > { %v588_v46 = vadd.f32 %v1026_v44, %v587_v45  ;;  %v601_v47 = vpop.f32.mrf.mxu1 }
  0xac   : > { %v602_v48 = vadd.f32 %v601_v47, %v588_v46 }
  0xb1   : > { %v615_v49 = vpop.f32.mrf.mxu2  ;;  %v589_v52 = vpop.f32.mrf.mxu0 }
  0xb2   : > { %v629_v50 = vpop.f32.mrf.mxu3  ;;  %v616_v51 = vadd.f32 %v615_v49, %v602_v48  ;;  %v590_v54 = vadd.f32 %v1026_v44, %v589_v52  ;;  %v603_v56 = vpop.f32.mrf.mxu1 }
  0xb4   : > { %v630_v53 = vadd.f32 %v629_v50, %v616_v51  ;;  %v604_v57 = vadd.f32 %v603_v56, %v590_v54 }
  0xb6   : > { %v658_v55 = vpack.c.bf16 %v630_v53, %v630_v53  ;;  %v646_v61 = vmul.f32 %v630_v53, %v630_v53  ;;  %v635_v63 = vsel %vm634_vm1, %v630_v53, 0.0 }
  0xb8   : > { %661 = vst.msk [vmem:[%s282_s7] sm:$0xf] %vm660_vm0, %v658_v55  ;;  %v648_v4 = vsel %vm634_vm1, %v646_v61, 0.0 }
  0xb9   : > { %v617_v58 = vpop.f32.mrf.mxu2 }
  0xba   : > { %v618_v59 = vadd.f32 %v617_v58, %v604_v57  ;;  %v631_v60 = vpop.f32.mrf.mxu3 }
  0xbc   : > { %v632_v62 = vadd.f32 %v631_v60, %v618_v59 }
  0xbe   : > { %v636_v0 = vsel %vm634_vm1, %v632_v62, 0.0  ;;  %v647_v1 = vmul.f32 %v632_v62, %v632_v62  ;;  %v659_v2 = vpack.c.bf16 %v632_v62, %v632_v62 }
  0xbf   : > { %v637_v3 = vadd.f32 %v636_v0, %v635_v63 }
  0xc0   : > { %v649_v5 = vsel %vm634_vm1, %v647_v1, 0.0  ;;  %662 = vst.msk [vmem:[%s282_s7 + $0x4] sm:$0xf] %vm660_vm0, %v659_v2 }
  0xc1   : > { %v638_v6 = vrot.slane %v637_v3, 4  ;;  %v650_v7 = vadd.f32 %v649_v5, %v648_v4 }
  0xc3   : > { %v639_v8 = vadd.f32 %v638_v6, %v637_v3  ;;  %v651_v9 = vrot.slane %v650_v7, 4 }
  0xc5   : > { %v640_v10 = vrot.slane %v639_v8, 2  ;;  %v652_v11 = vadd.f32 %v651_v9, %v650_v7 }
  0xc7   : > { %v641_v12 = vadd.f32 %v640_v10, %v639_v8  ;;  %v653_v13 = vrot.slane %v652_v11, 2 }
  0xc9   : > { %v642_v14 = vrot.slane %v641_v12, 1  ;;  %v654_v15 = vadd.f32 %v653_v13, %v652_v11 }
  0xcb   : > { %v643_v16 = vadd.f32 %v642_v14, %v641_v12  ;;  %v655_v17 = vrot.slane %v654_v15, 1 }
  0xcd   : > { %645 = vst.msk [vmem:[%s287_s10] sm:$0x1] %vm644_vm2, %v643_v16  ;;  %v656_v18 = vadd.f32 %v655_v17, %v654_v15 }
  0xcf   : > { %657 = vst.msk [vmem:[%s292_s13] sm:$0x1] %vm644_vm2, %v656_v18 }
  0xd0 PF: > { %s16_s20 = sadd.s32 1, %s1049_s20   ;;  %s1237_s18 = smov %s1045_s19 }
  0xd1   : > { %p13_p5 = scmp.ge.s32.totalorder %s16_s20, 4   ;;  %s1238_s19 = smov %s1240_s21 }
  0xd3   :  { %15 = sbr.rel (!%p13_p5) target bundleno = 2 (0x2), region = 86 }

// kernel: forward.20
= control target key start
LH: loop header
LB: loop body
LE: loop exit
PB: predicated region body
PF: predicated region fallthrough
CT: control target
= control target key end

     0   :  { %s1496_s18 = smov 0   ;;  %s1498_s19 = smov 0   ;;  %s1740_s0 = inlined_call_operand.vmem [shape: bf16[2,4,1024], index: 0, kind: input, shape index: {}]   ;;  %s1741_s1 = inlined_call_operand.vmem [shape: bf16[1024,64], index: 1, kind: input, shape index: {}]   ;;  %s1742_s2 = inlined_call_operand.vmem [shape: f32[1,64], index: 2, kind: input, shape index: {}]   ;;  %s1743_s3 = inlined_call_operand.vmem [shape: bf16[2,4,64], index: 3, kind: output, shape index: {0}]   ;;  %s1744_s4 = inlined_call_operand.vmem [shape: f32[2,1,64], index: 4, kind: output, shape index: {1}]   ;;  %s1745_s5 = inlined_call_operand.vmem [shape: f32[2,1,64], index: 5, kind: output, shape index: {2}]  }
   0x1   :  { %s1500_s20 = smov 0  }
   0x2 LB: > { %s28_s21 = sadd.s32 1, %s1460_s19  ;;  %p1090_p0 = scmp.ge.s32.totalorder %s1464_s20, 1  ;;  %s1464_s20 = sphi %s1500_s20, %s16_s20   ;;  %s1460_s19 = sphi %s1498_s19, %s1747_s19   ;;  %s1456_s18 = sphi %s1496_s18, %s1746_s18  }
   0x3   : > { %p30_p1 = scmp.ge.s32.totalorder %s28_s21, 2  ;;  %p216_p2 = scmp.lt.s32.totalorder %s1464_s20, 3 }
   0x5   : > { %s1749_s21 = smov (%p30_p1, %s28_s21), 0  ;;  %p217_p3 = pnand %p1090_p0, %p216_p2 }
   0x6   : > { %p258_p4 = scmp.lt.s32.totalorder (!%p217_p3), %s1456_s18, 1 }
   0x7   : > { %220 = sbr.rel (%p217_p3) target bundleno = 230 (0xe6), region = 32 }
   0xc   : > { %v1360_v0 = vld [vmem:[%s1741_s1 + $0x38] sm:$0xff]  ;;  %v1359_v4 = vld [vmem:[%s1741_s1 + $0x30] sm:$0xff]  ;;  %s1751_s18 = smov (!%p258_p4, %s1456_s18), 1  ;;  %v1358_v8 = vld [vmem:[%s1741_s1 + $0x28] sm:$0xff]  ;;  %vm927_vm0 = vcmask 519168   ;;  %vm947_vm1 = vcmask 517120  }
   0xd   : > { %v1368_v1 = vld [vmem:[%s1741_s1 + $0x78] sm:$0xff]  ;;  %823 = vmatpush.bf16.msra.mxu0 %v1360_v0  ;;  %v1367_v5 = vld [vmem:[%s1741_s1 + $0x70] sm:$0xff]  ;;  %v1366_v9 = vld [vmem:[%s1741_s1 + $0x68] sm:$0xff]  ;;  %s1352_s25 = sshll.u32 %s1751_s18, 4  ;;  %s1093_s30 = sshll.u32 %s1751_s18, 1  ;;  %vm935_vm2 = vcmask 516096  }
   0xe   : > { %v1376_v2 = vld [vmem:[%s1741_s1 + $0xb8] sm:$0xff]  ;;  %836 = vmatpush.bf16.msra.mxu1 %v1368_v1  ;;  %v1375_v6 = vld [vmem:[%s1741_s1 + $0xb0] sm:$0xff]  ;;  %v1374_v10 = vld [vmem:[%s1741_s1 + $0xa8] sm:$0xff]  ;;  %s1562_s7 = scalar_lea.vmem %s1740_s0, %s1352_s25  ;;  %s273_s9 = scalar_lea.vmem %s1743_s3, %s1093_s30 }
   0xf   : > { %v1384_v3 = vld [vmem:[%s1741_s1 + $0xf8] sm:$0xff]  ;;  %849 = vmatpush.bf16.msra.mxu2 %v1376_v2  ;;  %v1383_v7 = vld [vmem:[%s1741_s1 + $0xf0] sm:$0xff]  ;;  %v1382_v11 = vld [vmem:[%s1741_s1 + $0xe8] sm:$0xff]  ;;  %s277_s12 = scalar_lea.vmem %s1744_s4, %s1751_s18  ;;  %s282_s15 = scalar_lea.vmem %s1745_s5, %s1751_s18 }
  0x10   : > { %862 = vmatpush.bf16.msra.mxu3 %v1384_v3  ;;  %v1357_v12 = vld [vmem:[%s1741_s1 + $0x20] sm:$0xff]  ;;  %v1356_v17 = vld [vmem:[%s1741_s1 + $0x18] sm:$0xff]  ;;  %v1355_v21 = vld [vmem:[%s1741_s1 + $0x10] sm:$0xff] }
  0x11   : > { %824 = vmatpush.bf16.msra.mxu0 %v1359_v4  ;;  %v1365_v13 = vld [vmem:[%s1741_s1 + $0x60] sm:$0xff]  ;;  %v1364_v18 = vld [vmem:[%s1741_s1 + $0x58] sm:$0xff]  ;;  %v1363_v22 = vld [vmem:[%s1741_s1 + $0x50] sm:$0xff] }
  0x12   : > { %837 = vmatpush.bf16.msra.mxu1 %v1367_v5  ;;  %v1373_v14 = vld [vmem:[%s1741_s1 + $0xa0] sm:$0xff]  ;;  %v1372_v19 = vld [vmem:[%s1741_s1 + $0x98] sm:$0xff]  ;;  %v1371_v23 = vld [vmem:[%s1741_s1 + $0x90] sm:$0xff] }
  0x13   : > { %850 = vmatpush.bf16.msra.mxu2 %v1375_v6  ;;  %v1381_v15 = vld [vmem:[%s1741_s1 + $0xe0] sm:$0xff]  ;;  %v1380_v20 = vld [vmem:[%s1741_s1 + $0xd8] sm:$0xff]  ;;  %v1379_v24 = vld [vmem:[%s1741_s1 + $0xd0] sm:$0xff] }
  0x14   : > { %863 = vmatpush.bf16.msra.mxu3 %v1383_v7  ;;  %v284_v16 = vld [vmem:[%s1562_s7] sm:$0xff]  ;;  %v1354_v25 = vld [vmem:[%s1741_s1 + $0x8] sm:$0xff]  ;;  %v1392_v34 = vld [vmem:[%s1741_s1 + $0x138] sm:$0xff] }
  0x15   : > { %825 = vmatpush.bf16.msra.mxu0 %v1358_v8  ;;  %419 = vst [vmem:[#allocation1] ss:$4 sm:$0xff] %v284_v16  ;;  %v1362_v26 = vld [vmem:[%s1741_s1 + $0x48] sm:$0xff]  ;;  %v1353_v30 = vld [vmem:[%s1741_s1] sm:$0xff]  ;;  %v1400_v35 = vld [vmem:[%s1741_s1 + $0x178] sm:$0xff] }
  0x16   : > { %838 = vmatpush.bf16.msra.mxu1 %v1366_v9  ;;  %v1370_v27 = vld [vmem:[%s1741_s1 + $0x88] sm:$0xff]  ;;  %v1361_v31 = vld [vmem:[%s1741_s1 + $0x40] sm:$0xff]  ;;  %v1408_v36 = vld [vmem:[%s1741_s1 + $0x1b8] sm:$0xff] }
  0x17   : > { %851 = vmatpush.bf16.msra.mxu2 %v1374_v10  ;;  %v1378_v28 = vld [vmem:[%s1741_s1 + $0xc8] sm:$0xff]  ;;  %v1369_v32 = vld [vmem:[%s1741_s1 + $0x80] sm:$0xff]  ;;  %v1416_v37 = vld [vmem:[%s1741_s1 + $0x1f8] sm:$0xff] }
  0x18   : > { %864 = vmatpush.bf16.msra.mxu3 %v1382_v11  ;;  %v285_v29 = vld [vmem:[%s1562_s7 + $0x8] sm:$0xff]  ;;  %v1377_v33 = vld [vmem:[%s1741_s1 + $0xc0] sm:$0xff]  ;;  %v1391_v38 = vld [vmem:[%s1741_s1 + $0x130] sm:$0xff] }
  0x19   : > { %826 = vmatpush.bf16.msra.mxu0 %v1357_v12  ;;  %422 = vst [vmem:[#allocation1 + $0x20] ss:$4 sm:$0xff] %v285_v29  ;;  %v1399_v39 = vld [vmem:[%s1741_s1 + $0x170] sm:$0xff]  ;;  %v1390_v46 = vld [vmem:[%s1741_s1 + $0x128] sm:$0xff]  ;;  %v1389_v50 = vld [vmem:[%s1741_s1 + $0x120] sm:$0xff] }
  0x1a   : > { %839 = vmatpush.bf16.msra.mxu1 %v1365_v13  ;;  %v1407_v44 = vld [vmem:[%s1741_s1 + $0x1b0] sm:$0xff]  ;;  %v1398_v47 = vld [vmem:[%s1741_s1 + $0x168] sm:$0xff]  ;;  %v1397_v51 = vld [vmem:[%s1741_s1 + $0x160] sm:$0xff] }
  0x1b   : > { %852 = vmatpush.bf16.msra.mxu2 %v1373_v14  ;;  %v1415_v45 = vld [vmem:[%s1741_s1 + $0x1f0] sm:$0xff]  ;;  %v1406_v48 = vld [vmem:[%s1741_s1 + $0x1a8] sm:$0xff]  ;;  %v1405_v52 = vld [vmem:[%s1741_s1 + $0x1a0] sm:$0xff] }
  0x1c   : > { %865 = vmatpush.bf16.msra.mxu3 %v1381_v15  ;;  %v425_v40 = vld.sshfl [vmem:[#allocation1 + $0x10] sm:$0xff pattern:$0x73625140]  ;;  %v423_v41 = vld.sshfl [vmem:[#allocation1] sm:$0xff pattern:$0x73625140] }
  0x1d   : > { %827 = vmatpush.bf16.msra.mxu0 %v1356_v17  ;;  %v426_v42 = vld.sshfl [vmem:[#allocation1 + $0x18] sm:$0xff pattern:$0x73625140]  ;;  %v424_v43 = vld.sshfl [vmem:[#allocation1 + $0x8] sm:$0xff pattern:$0x73625140] }
  0x1e   : > { %840 = vmatpush.bf16.msra.mxu1 %v1364_v18  ;;  %v1414_v49 = vld [vmem:[%s1741_s1 + $0x1e8] sm:$0xff]  ;;  %v1413_v53 = vld [vmem:[%s1741_s1 + $0x1e0] sm:$0xff]  ;;  %v1388_v54 = vld [vmem:[%s1741_s1 + $0x118] sm:$0xff] }
  0x1f   : > { %853 = vmatpush.bf16.msra.mxu2 %v1372_v19  ;;  %v1396_v55 = vld [vmem:[%s1741_s1 + $0x158] sm:$0xff]  ;;  %v1387_v58 = vld [vmem:[%s1741_s1 + $0x110] sm:$0xff]  ;;  %v1386_v62 = vld [vmem:[%s1741_s1 + $0x108] sm:$0xff] }
  0x20   : > { %866 = vmatpush.bf16.msra.mxu3 %v1380_v20  ;;  %v1404_v56 = vld [vmem:[%s1741_s1 + $0x198] sm:$0xff]  ;;  %v1395_v59 = vld [vmem:[%s1741_s1 + $0x150] sm:$0xff]  ;;  %v1394_v63 = vld [vmem:[%s1741_s1 + $0x148] sm:$0xff] }
  0x21   : > { %828 = vmatpush.bf16.msra.mxu0 %v1355_v21  ;;  %v1412_v57 = vld [vmem:[%s1741_s1 + $0x1d8] sm:$0xff]  ;;  %v1403_v60 = vld [vmem:[%s1741_s1 + $0x190] sm:$0xff]  ;;  %v1402_v0 = vld [vmem:[%s1741_s1 + $0x188] sm:$0xff] }
  0x22   : > { %841 = vmatpush.bf16.msra.mxu1 %v1363_v22  ;;  %v1411_v61 = vld [vmem:[%s1741_s1 + $0x1d0] sm:$0xff]  ;;  %v1410_v1 = vld [vmem:[%s1741_s1 + $0x1c8] sm:$0xff]  ;;  %v1385_v2 = vld [vmem:[%s1741_s1 + $0x100] sm:$0xff] }
  0x23   : > { %854 = vmatpush.bf16.msra.mxu2 %v1371_v23  ;;  %v1393_v3 = vld [vmem:[%s1741_s1 + $0x140] sm:$0xff]  ;;  %v428_v7 = vld.sshfl [vmem:[#allocation1 + $0x28] sm:$0xff pattern:$0x73625140] }
  0x24   : > { %867 = vmatpush.bf16.msra.mxu3 %v1379_v24  ;;  %v1401_v4 = vld [vmem:[%s1741_s1 + $0x180] sm:$0xff]  ;;  %v429_v8 = vld.sshfl [vmem:[#allocation1 + $0x30] sm:$0xff pattern:$0x73625140] }
  0x25   : > { %829 = vmatpush.bf16.msra.mxu0 %v1354_v25  ;;  %v1409_v5 = vld [vmem:[%s1741_s1 + $0x1c0] sm:$0xff]  ;;  %v430_v9 = vld.sshfl [vmem:[#allocation1 + $0x38] sm:$0xff pattern:$0x73625140] }
  0x26   : > { %842 = vmatpush.bf16.msra.mxu1 %v1362_v26  ;;  %v427_v6 = vld.sshfl [vmem:[#allocation1 + $0x20] sm:$0xff pattern:$0x73625140] }
  0x27   : > { %855 = vmatpush.bf16.msra.mxu2 %v1370_v27  ;;  %v1441_v16 = vld [vmem:[%s1742_s2] ss:$0 sm:$0xff] }
  0x28   : > { %868 = vmatpush.bf16.msra.mxu3 %v1378_v28 }
  0x29   : > { %830 = vmatpush.bf16.msra.mxu0 %v1353_v30 }
  0x2a   : > { %843 = vmatpush.bf16.msra.mxu1 %v1361_v31 }
  0x2b   : > { %856 = vmatpush.bf16.msra.mxu2 %v1369_v32 }
  0x2c   : > { %869 = vmatpush.bf16.msra.mxu3 %v1377_v33  ;;  %831 = vmatmul.bf16.vlgmr.msra.gmra.mxu0 %v423_v41 }
  0x2d   : > { %875 = vmatpush.bf16.msrb.mxu0 %v1392_v34  ;;  %844 = vmatmul.bf16.vlgmr.msra.gmra.mxu1 %v424_v43 }
  0x2e   : > { %888 = vmatpush.bf16.msrb.mxu1 %v1400_v35  ;;  %857 = vmatmul.bf16.vlgmr.msra.gmra.mxu2 %v425_v40 }
  0x2f   : > { %901 = vmatpush.bf16.msrb.mxu2 %v1408_v36  ;;  %870 = vmatmul.bf16.vlgmr.msra.gmra.mxu3 %v426_v42 }
  0x30   : > { %914 = vmatpush.bf16.msrb.mxu3 %v1416_v37 }
  0x31   : > { %876 = vmatpush.bf16.msrb.mxu0 %v1391_v38 }
  0x32   : > { %889 = vmatpush.bf16.msrb.mxu1 %v1399_v39 }
  0x33   : > { %902 = vmatpush.bf16.msrb.mxu2 %v1407_v44 }
  0x34   : > { %915 = vmatpush.bf16.msrb.mxu3 %v1415_v45 }
  0x35   : > { %877 = vmatpush.bf16.msrb.mxu0 %v1390_v46 }
  0x36   : > { %890 = vmatpush.bf16.msrb.mxu1 %v1398_v47 }
  0x37   : > { %903 = vmatpush.bf16.msrb.mxu2 %v1406_v48 }
  0x38   : > { %916 = vmatpush.bf16.msrb.mxu3 %v1414_v49 }
  0x39   : > { %878 = vmatpush.bf16.msrb.mxu0 %v1389_v50 }
  0x3a   : > { %891 = vmatpush.bf16.msrb.mxu1 %v1397_v51 }
  0x3b   : > { %904 = vmatpush.bf16.msrb.mxu2 %v1405_v52 }
  0x3c   : > { %917 = vmatpush.bf16.msrb.mxu3 %v1413_v53 }
  0x3d   : > { %879 = vmatpush.bf16.msrb.mxu0 %v1388_v54 }
  0x3e   : > { %892 = vmatpush.bf16.msrb.mxu1 %v1396_v55 }
  0x3f   : > { %905 = vmatpush.bf16.msrb.mxu2 %v1404_v56 }
  0x40   : > { %918 = vmatpush.bf16.msrb.mxu3 %v1412_v57 }
  0x41   : > { %880 = vmatpush.bf16.msrb.mxu0 %v1387_v58 }
  0x42   : > { %893 = vmatpush.bf16.msrb.mxu1 %v1395_v59 }
  0x43   : > { %906 = vmatpush.bf16.msrb.mxu2 %v1403_v60 }
  0x44   : > { %919 = vmatpush.bf16.msrb.mxu3 %v1411_v61 }
  0x45   : > { %881 = vmatpush.bf16.msrb.mxu0 %v1386_v62 }
  0x46   : > { %894 = vmatpush.bf16.msrb.mxu1 %v1394_v63 }
  0x47   : > { %907 = vmatpush.bf16.msrb.mxu2 %v1402_v0 }
  0x48   : > { %920 = vmatpush.bf16.msrb.mxu3 %v1410_v1 }
  0x49   : > { %882 = vmatpush.bf16.msrb.mxu0 %v1385_v2 }
  0x4a   : > { %895 = vmatpush.bf16.msrb.mxu1 %v1393_v3 }
  0x4b   : > { %908 = vmatpush.bf16.msrb.mxu2 %v1401_v4 }
  0x4c   : > { %921 = vmatpush.bf16.msrb.mxu3 %v1409_v5  ;;  %883 = vmatmul.bf16.vlgmr.msrb.gmra.mxu0 %v427_v6 }
  0x4d   : > { %896 = vmatmul.bf16.vlgmr.msrb.gmra.mxu1 %v428_v7 }
  0x4e   : > { %909 = vmatmul.bf16.vlgmr.msrb.gmra.mxu2 %v429_v8 }
  0x4f   : > { %922 = vmatmul.bf16.vlgmr.msrb.gmra.mxu3 %v430_v9 }
  0xa9   : > { %v832_v10 = vpop.f32.mrf.mxu0 }
  0xaa   : > { %v845_v11 = vpop.f32.mrf.mxu1  ;;  %v833_v19 = vadd.f32 %v1441_v16, %v832_v10 }
  0xac   : > { %v846_v20 = vadd.f32 %v845_v11, %v833_v19 }
  0xb1   : > { %v858_v12 = vpop.f32.mrf.mxu2  ;;  %v834_v14 = vpop.f32.mrf.mxu0 }
  0xb2   : > { %v871_v13 = vpop.f32.mrf.mxu3  ;;  %v847_v15 = vpop.f32.mrf.mxu1  ;;  %v859_v21 = vadd.f32 %v858_v12, %v846_v20 }
  0xb4   : > { %v872_v22 = vadd.f32 %v871_v13, %v859_v21 }
  0xb9   : > { %v860_v17 = vpop.f32.mrf.mxu2 }
  0xba   : > { %v873_v18 = vpop.f32.mrf.mxu3 }
  0xc9   : > { %v884_v23 = vpop.f32.mrf.mxu0 }
  0xca   : > { %v897_v24 = vpop.f32.mrf.mxu1  ;;  %v885_v25 = vadd.f32 %v884_v23, %v872_v22 }
  0xcc   : > { %v898_v26 = vadd.f32 %v897_v24, %v885_v25 }
  0xd1   : > { %v910_v27 = vpop.f32.mrf.mxu2  ;;  %v886_v30 = vpop.f32.mrf.mxu0 }
  0xd2   : > { %v923_v28 = vpop.f32.mrf.mxu3  ;;  %v911_v29 = vadd.f32 %v910_v27, %v898_v26  ;;  %v899_v31 = vpop.f32.mrf.mxu1 }
  0xd4   : > { %v924_v32 = vadd.f32 %v923_v28, %v911_v29 }
  0xd6   : > { %v928_v33 = vsel %vm927_vm0, %v924_v32, 0.0  ;;  %v937_v34 = vmul.f32 %v924_v32, %v924_v32  ;;  %v946_v35 = vpack.c.bf16 %v924_v32, %v924_v32 }
  0xd7   : > { %v929_v36 = vrot.slane %v928_v33, 4 }
  0xd8   : > { %v938_v37 = vsel %vm927_vm0, %v937_v34, 0.0  ;;  %948 = vst.msk [vmem:[%s273_s9] sm:$0x3] %vm947_vm1, %v946_v35 }
  0xd9   : > { %v930_v38 = vadd.f32 %v929_v36, %v928_v33  ;;  %v939_v39 = vrot.slane %v938_v37, 4  ;;  %v912_v40 = vpop.f32.mrf.mxu2 }
  0xda   : > { %v925_v41 = vpop.f32.mrf.mxu3 }
  0xdb   : > { %v931_v42 = vrot.slane %v930_v38, 2  ;;  %v940_v43 = vadd.f32 %v939_v39, %v938_v37 }
  0xdd   : > { %v932_v44 = vadd.f32 %v931_v42, %v930_v38  ;;  %v941_v45 = vrot.slane %v940_v43, 2 }
  0xdf   : > { %v933_v46 = vrot.slane %v932_v44, 1  ;;  %v942_v47 = vadd.f32 %v941_v45, %v940_v43 }
  0xe1   : > { %v934_v48 = vadd.f32 %v933_v46, %v932_v44  ;;  %v943_v49 = vrot.slane %v942_v47, 1 }
  0xe3   : > { %936 = vst.msk [vmem:[%s277_s12] sm:$0x1] %vm935_vm2, %v934_v48  ;;  %v944_v50 = vadd.f32 %v943_v49, %v942_v47 }
  0xe5   : > { %945 = vst.msk [vmem:[%s282_s15] sm:$0x1] %vm935_vm2, %v944_v50 }
  0xe6 PF: > { %s16_s20 = sadd.s32 1, %s1464_s20   ;;  %s1746_s18 = smov %s1460_s19 }
  0xe7   : > { %p13_p5 = scmp.ge.s32.totalorder %s16_s20, 4   ;;  %s1747_s19 = smov %s1749_s21 }
  0xe9   :  { %15 = sbr.rel (!%p13_p5) target bundleno = 2 (0x2), region = 87 }

// kernel: tile.8
= control target key start
LH: loop header
LB: loop body
LE: loop exit
PB: predicated region body
PF: predicated region fallthrough
CT: control target
= control target key end

     0   :  { %s22_s0 = inlined_call_operand.vmem [shape: f32[128], index: 0, kind: input, shape index: {}]   ;;  %s23_s1 = inlined_call_operand.vmem [shape: f32[4,128], index: 1, kind: output, shape index: {}]  }
   0x1   :  { %v4_v0 = vld [vmem:[%s22_s0] ss:$0 sm:$0xff] }
   0x2   :  { %5 = vst [vmem:[%s23_s1] sm:$0xf] %v4_v0 }

// kernel: forward.21
= control target key start
LH: loop header
LB: loop body
LE: loop exit
PB: predicated region body
PF: predicated region fallthrough
CT: control target
= control target key end

     0   :  { %s805_s15 = smov 0   ;;  %s973_s0 = inlined_call_operand.vmem [shape: bf16[2,1,256], index: 0, kind: input, shape index: {}]   ;;  %s974_s1 = inlined_call_operand.vmem [shape: bf16[256,64], index: 1, kind: input, shape index: {}]   ;;  %s975_s2 = inlined_call_operand.vmem [shape: bf16[64,512], index: 2, kind: input, shape index: {}]   ;;  %s976_s3 = inlined_call_operand.vmem [shape: f32[1,512], index: 3, kind: input, shape index: {}]   ;;  %s977_s4 = inlined_call_operand.vmem [shape: f32[2,1,512], index: 4, kind: output, shape index: {}]  }
   0x1 LB: > { %s591_s16 = sadd.s32 4294967295, %s778_s15   ;;  %p595_p0 = scmp.ge.s32.totalorder %s778_s15, 1  ;;  %s778_s15 = sphi %s805_s15, %s14_s15  }
   0x2   : > { %p161_p1 = scmp.lt.s32.totalorder %s778_s15, 3 }
   0x4   : > { %p162_p2 = pnand %p595_p0, %p161_p1 }
   0x5   : > { %p185_p3 = scmp.lt.s32.totalorder (!%p162_p2), %s591_s16, 1 }
   0x6   : > { %165 = sbr.rel (%p162_p2) target bundleno = 332 (0x14c), region = 36 }
   0xb   : > { %v739_v0 = vld [vmem:[%s974_s1 + $0x38] sm:$0xff]  ;;  %v738_v2 = vld [vmem:[%s974_s1 + $0x30] sm:$0xff]  ;;  %s979_s16 = smov (!%p185_p3, %s591_s16), 1  ;;  %v737_v4 = vld [vmem:[%s974_s1 + $0x28] sm:$0xff]  ;;  %vm463_vm0 = vcmask 523264   ;;  %vm526_vm1 = vcmask 1040384  }
   0xc   : > { %v747_v1 = vld [vmem:[%s974_s1 + $0x78] sm:$0xff]  ;;  %329 = vmatpush.bf16.msra.mxu0 %v739_v0  ;;  %v746_v3 = vld [vmem:[%s974_s1 + $0x70] sm:$0xff]  ;;  %s596_s27 = sshll.u32 %s979_s16, 1  ;;  %v745_v5 = vld [vmem:[%s974_s1 + $0x68] sm:$0xff]  ;;  %s597_s23 = sshll.u32 %s979_s16, 2  ;;  %vm528_vm2 = vcmask 1042434  }
   0xd   : > { %342 = vmatpush.bf16.msra.mxu1 %v747_v1  ;;  %s188_s6 = scalar_lea.vmem %s973_s0, %s596_s27  ;;  %v712_v6 = vld [vmem:[%s975_s2 + $0x60] sm:$0xf]  ;;  %v762_v7 = vld [vmem:[%s975_s2 + $0x6c] sm:$0xf0]  ;;  %v760_v10 = vld [vmem:[%s975_s2 + $0x64] sm:$0xf]  ;;  %s192_s26 = scalar_lea.vmem %s977_s4, %s597_s23 }
   0xe   : > { %v194_v8 = vld [vmem:[%s188_s6] sm:$0x3]  ;;  %v713_v9 = vor.u32 %v762_v7, %v712_v6  ;;  %v714_v11 = vld [vmem:[%s975_s2 + $0x70] sm:$0xf0]  ;;  %v758_v14 = vld [vmem:[%s975_s2 + $0x4c] sm:$0xf0] }
   0xf   : > { %228 = vst [vmem:[#allocation1] ss:$9 sm:$0xff] %v194_v8  ;;  %v717_v12 = vor.u32 %v760_v10, %v714_v11  ;;  %v696_v13 = vld [vmem:[%s975_s2 + $0x40] sm:$0xf]  ;;  %v756_v16 = vld [vmem:[%s975_s2 + $0x44] sm:$0xf] }
  0x10   : > { %330 = vmatpush.bf16.msra.mxu0 %v738_v2  ;;  %471 = vmatpush.bf16.msra.mxu2 %v713_v9  ;;  %v697_v15 = vor.u32 %v758_v14, %v696_v13  ;;  %v698_v17 = vld [vmem:[%s975_s2 + $0x50] sm:$0xf0]  ;;  %v736_v19 = vld [vmem:[%s974_s1 + $0x20] sm:$0xff]  ;;  %v735_v21 = vld [vmem:[%s974_s1 + $0x18] sm:$0xff]  ;;  %vm530_vm3 = vcmask 1041408  }
  0x11   : > { %343 = vmatpush.bf16.msra.mxu1 %v746_v3  ;;  %484 = vmatpush.bf16.msra.mxu3 %v717_v12  ;;  %v701_v18 = vor.u32 %v756_v16, %v698_v17  ;;  %v744_v20 = vld [vmem:[%s974_s1 + $0x60] sm:$0xff]  ;;  %v743_v22 = vld [vmem:[%s974_s1 + $0x58] sm:$0xff]  ;;  %v734_v23 = vld [vmem:[%s974_s1 + $0x10] sm:$0xff] }
  0x12   : > { %v742_v24 = vld [vmem:[%s974_s1 + $0x50] sm:$0xff]  ;;  %v733_v25 = vld [vmem:[%s974_s1 + $0x8] sm:$0xff]  ;;  %v732_v27 = vld [vmem:[%s974_s1] sm:$0xff] }
  0x13   : > { %v741_v26 = vld [vmem:[%s974_s1 + $0x48] sm:$0xff]  ;;  %v740_v28 = vld [vmem:[%s974_s1 + $0x40] sm:$0xff]  ;;  %v754_v32 = vld [vmem:[%s975_s2 + $0x2c] sm:$0xf0] }
  0x14   : > { %331 = vmatpush.bf16.msra.mxu0 %v737_v4  ;;  %472 = vmatpush.bf16.msra.mxu2 %v697_v15  ;;  %v680_v31 = vld [vmem:[%s975_s2 + $0x20] sm:$0xf]  ;;  %v752_v33 = vld [vmem:[%s975_s2 + $0x24] sm:$0xf]  ;;  %v682_v35 = vld [vmem:[%s975_s2 + $0x30] sm:$0xf0] }
  0x15   : > { %344 = vmatpush.bf16.msra.mxu1 %v745_v5  ;;  %485 = vmatpush.bf16.msra.mxu3 %v701_v18  ;;  %v681_v34 = vor.u32 %v754_v32, %v680_v31  ;;  %v685_v36 = vor.u32 %v752_v33, %v682_v35  ;;  %v664_v37 = vld [vmem:[%s975_s2] sm:$0xf]  ;;  %v750_v38 = vld [vmem:[%s975_s2 + $0xc] sm:$0xf0]  ;;  %v748_v39 = vld [vmem:[%s975_s2 + $0x4] sm:$0xf] }
  0x16   : > { %v229_v29 = vld [vmem:[#allocation1] sm:$0xff]  ;;  %v230_v30 = vld [vmem:[#allocation1 + $0x9] sm:$0xff]  ;;  %v665_v40 = vor.u32 %v750_v38, %v664_v37  ;;  %v666_v41 = vld [vmem:[%s975_s2 + $0x10] sm:$0xf0] }
  0x17   : > { %v669_v42 = vor.u32 %v748_v39, %v666_v41  ;;  %v720_v43 = vld [vmem:[%s975_s2 + $0x68] sm:$0xf]  ;;  %v763_v44 = vld [vmem:[%s975_s2 + $0x74] sm:$0xf0]  ;;  %v761_v46 = vld [vmem:[%s975_s2 + $0x6c] sm:$0xf] }
  0x18   : > { %332 = vmatpush.bf16.msra.mxu0 %v736_v19  ;;  %473 = vmatpush.bf16.msra.mxu2 %v681_v34  ;;  %v721_v45 = vor.u32 %v763_v44, %v720_v43  ;;  %v722_v47 = vld [vmem:[%s975_s2 + $0x78] sm:$0xf0]  ;;  %v704_v49 = vld [vmem:[%s975_s2 + $0x48] sm:$0xf]  ;;  %v759_v50 = vld [vmem:[%s975_s2 + $0x54] sm:$0xf0] }
  0x19   : > { %345 = vmatpush.bf16.msra.mxu1 %v744_v20  ;;  %486 = vmatpush.bf16.msra.mxu3 %v685_v36  ;;  %v725_v48 = vor.u32 %v761_v46, %v722_v47  ;;  %v757_v51 = vld [vmem:[%s975_s2 + $0x4c] sm:$0xf]  ;;  %v705_v52 = vor.u32 %v759_v50, %v704_v49  ;;  %v706_v53 = vld [vmem:[%s975_s2 + $0x58] sm:$0xf0]  ;;  %v688_v54 = vld [vmem:[%s975_s2 + $0x28] sm:$0xf] }
  0x1a   : > { %v755_v55 = vld [vmem:[%s975_s2 + $0x34] sm:$0xf0]  ;;  %v709_v56 = vor.u32 %v757_v51, %v706_v53  ;;  %v753_v57 = vld [vmem:[%s975_s2 + $0x2c] sm:$0xf]  ;;  %v690_v58 = vld [vmem:[%s975_s2 + $0x38] sm:$0xf0] }
  0x1b   : > { %v689_v59 = vor.u32 %v755_v55, %v688_v54  ;;  %v693_v60 = vor.u32 %v753_v57, %v690_v58  ;;  %v672_v61 = vld [vmem:[%s975_s2 + $0x8] sm:$0xf]  ;;  %v751_v62 = vld [vmem:[%s975_s2 + $0x14] sm:$0xf0]  ;;  %v749_v63 = vld [vmem:[%s975_s2 + $0xc] sm:$0xf] }
  0x1c   : > { %333 = vmatpush.bf16.msra.mxu0 %v735_v21  ;;  %474 = vmatpush.bf16.msra.mxu2 %v665_v40  ;;  %v674_v0 = vld [vmem:[%s975_s2 + $0x18] sm:$0xf0]  ;;  %v673_v1 = vor.u32 %v751_v62, %v672_v61  ;;  %v373_v12 = vld [vmem:[%s976_s3] sm:$0xf] }
  0x1d   : > { %346 = vmatpush.bf16.msra.mxu1 %v743_v22  ;;  %487 = vmatpush.bf16.msra.mxu3 %v669_v42  ;;  %v677_v2 = vor.u32 %v749_v63, %v674_v0  ;;  %v456_v15 = vperm.slane %v373_v12, 1  ;;  %v457_v17 = vperm.slane %v373_v12, 2  ;;  %v458_v18 = vperm.slane %v373_v12, 3 }
  0x1e   : > { %v455_v19 = vperm.slane %v373_v12, 0  ;;  %v533_v22 = vlaneseq }
  0x20   : > { %334 = vmatpush.bf16.msra.mxu0 %v734_v23  ;;  %497 = vmatpush.bf16.msrb.mxu2 %v721_v45  ;;  %vm535_vm4 = vcmp.lt.s32.totalorder %v533_v22, 512 }
  0x21   : > { %347 = vmatpush.bf16.msra.mxu1 %v742_v24  ;;  %510 = vmatpush.bf16.msrb.mxu3 %v725_v48 }
  0x24   : > { %335 = vmatpush.bf16.msra.mxu0 %v733_v25  ;;  %498 = vmatpush.bf16.msrb.mxu2 %v705_v52 }
  0x25   : > { %348 = vmatpush.bf16.msra.mxu1 %v741_v26  ;;  %511 = vmatpush.bf16.msrb.mxu3 %v709_v56 }
  0x28   : > { %336 = vmatpush.bf16.msra.mxu0 %v732_v27  ;;  %499 = vmatpush.bf16.msrb.mxu2 %v689_v59 }
  0x29   : > { %349 = vmatpush.bf16.msra.mxu1 %v740_v28  ;;  %512 = vmatpush.bf16.msrb.mxu3 %v693_v60 }
  0x2b   : > { %337 = vmatmul.bf16.vlgmr.msra.gmra.mxu0 %v229_v29 }
  0x2c   : > { %350 = vmatmul.bf16.vlgmr.msra.gmra.mxu1 %v230_v30  ;;  %500 = vmatpush.bf16.msrb.mxu2 %v673_v1 }
  0x2d   : > { %513 = vmatpush.bf16.msrb.mxu3 %v677_v2 }
  0xa8   : > { %v338_v3 = vpop.f32.mrf.mxu0 }
  0xa9   : > { %v351_v4 = vpop.f32.mrf.mxu1 }
  0xaa   : > { %v352_v5 = vadd.f32 %v351_v4, %v338_v3 }
  0xac   : > { %v355_v6 = vmax.f32 %v352_v5, 0.0 }
  0xae   : > { %v356_v7 = vpack.c.bf16 %v355_v6, %v355_v6 }
  0xb0   : > { %726 = vmatmul.msk.bf16.vlgmr.msra.gmra.mxu2 %vm463_vm0, %v356_v7  ;;  %727 = vmatmul.msk.bf16.vlgmr.msra.gmra.mxu3 %vm463_vm0, %v356_v7  ;;  %v340_v8 = vpop.f32.mrf.mxu0 }
  0xb1   : > { %v353_v9 = vpop.f32.mrf.mxu1 }
  0xc0   : > { %728 = vmatmul.msk.bf16.vlgmr.msrb.gmra.mxu2 %vm463_vm0, %v356_v7  ;;  %729 = vmatmul.msk.bf16.vlgmr.msrb.gmra.mxu3 %vm463_vm0, %v356_v7 }
 0x133   : > { %v476_v10 = vpop.f32.mrf.mxu2  ;;  %v489_v11 = vpop.f32.mrf.mxu3 }
 0x134   : > { %v490_v16 = vadd.f32 %v489_v11, %v456_v15  ;;  %v477_v26 = vadd.f32 %v476_v10, %v455_v19 }
 0x136   : > { %v523_v23 = vrot.slane %v490_v16, 7 }
 0x138   : > { %v527_v29 = vsel %vm526_vm1, %v477_v26, %v523_v23 }
 0x13b   : > { %v478_v13 = vpop.f32.mrf.mxu2  ;;  %v491_v14 = vpop.f32.mrf.mxu3 }
 0x143   : > { %v502_v20 = vpop.f32.mrf.mxu2  ;;  %v515_v21 = vpop.f32.mrf.mxu3 }
 0x144   : > { %v503_v24 = vadd.f32 %v502_v20, %v457_v17  ;;  %v516_v25 = vadd.f32 %v515_v21, %v458_v18 }
 0x146   : > { %v524_v27 = vrot.slane %v503_v24, 6  ;;  %v525_v28 = vrot.slane %v516_v25, 5 }
 0x148   : > { %v529_v30 = vsel %vm528_vm2, %v524_v27, %v525_v28 }
 0x149   : > { %v531_v31 = vsel %vm530_vm3, %v527_v29, %v529_v30 }
 0x14a   : > { %537 = vst.msk [vmem:[%s192_s26] sm:$0xf] %vm535_vm4, %v531_v31 }
 0x14b   : > { %v504_v32 = vpop.f32.mrf.mxu2  ;;  %v517_v33 = vpop.f32.mrf.mxu3 }
 0x14c PF: > { %s14_s15 = sadd.s32 1, %s778_s15  }
 0x14d   : > { %p11_p4 = scmp.ge.s32.totalorder %s14_s15, 4  }
 0x14f   :  { %13 = sbr.rel (!%p11_p4) target bundleno = 1 (0x1), region = 66 }

// kernel: forward.22
= control target key start
LH: loop header
LB: loop body
LE: loop exit
PB: predicated region body
PF: predicated region fallthrough
CT: control target
= control target key end

     0   :  { %s1181_s18 = smov 0   ;;  %s1183_s19 = smov 0   ;;  %s1297_s0 = inlined_call_operand.vmem [shape: bf16[2,4,4,512], index: 0, kind: input, shape index: {}]   ;;  %s1298_s1 = inlined_call_operand.vmem [shape: bf16[4,512,64], index: 1, kind: input, shape index: {}]   ;;  %s1299_s2 = inlined_call_operand.vmem [shape: f32[1,64], index: 2, kind: input, shape index: {}]   ;;  %s1300_s3 = inlined_call_operand.vmem [shape: bf16[2,4,4,64], index: 3, kind: output, shape index: {0}]   ;;  %s1301_s4 = inlined_call_operand.vmem [shape: f32[8,1,64], index: 4, kind: output, shape index: {1}]   ;;  %s1302_s5 = inlined_call_operand.vmem [shape: f32[8,1,64], index: 5, kind: output, shape index: {2}]  }
   0x1   :  { %s1185_s20 = smov 0   ;;  %s1187_s21 = smov 0  }
   0x2   :  { %s1189_s22 = smov 0  }
   0x3 LB: > { %s31_s23 = sadd.s32 1, %s1141_s20  ;;  %s35_s24 = sadd.s32 1, %s1145_s21  ;;  %s1149_s22 = sphi %s1189_s22, %s16_s22   ;;  %s1145_s21 = sphi %s1187_s21, %s1306_s21   ;;  %s1141_s20 = sphi %s1185_s20, %s1305_s20   ;;  %s1137_s19 = sphi %s1183_s19, %s1304_s19   ;;  %s1133_s18 = sphi %s1181_s18, %s1303_s18  }
   0x4   : > { %p33_p0 = scmp.ge.s32.totalorder %s31_s23, 4  ;;  %p897_p1 = scmp.ge.s32.totalorder %s1149_s22, 1 }
   0x5   : > { %p249_p2 = scmp.lt.s32.totalorder %s1149_s22, 9 }
   0x6   : > { %s1308_s23 = smov (%p33_p0, %s31_s23), 0  ;;  %s1310_s24 = smov (!%p33_p0, %s35_s24), %s1145_s21 }
   0x7   : > { %p250_p3 = pnand %p897_p1, %p249_p2  ;;  %p37_p4 = scmp.ge.s32.totalorder %s1310_s24, 2 }
   0x8   : > { %p310_p5 = scmp.lt.s32.totalorder (!%p250_p3), %s1133_s18, 3  ;;  %p308_p6 = scmp.lt.s32.totalorder (!%p250_p3), %s1137_s19, 1 }
   0x9   : > { %s1312_s24 = smov (%p37_p4, %s1310_s24), 0  ;;  %253 = sbr.rel (%p250_p3) target bundleno = 204 (0xcc), region = 32 }
   0xe   : > { %s1218_s25 = scalar_select %p310_p5, %s1133_s18, 3  ;;  %v1110_v37 = vld [vmem:[%s1299_s2] ss:$0 sm:$0xff]  ;;  %vm678_vm0 = vcmask 519168   ;;  %vm698_vm1 = vcmask 517120   ;;  %vm686_vm2 = vcmask 516096  }
   0xf   : > { %s1221_s26 = scalar_select %p308_p6, %s1137_s19, 1 }
  0x10   : > { %s1037_s27 = sshll.u32 %s1218_s25, 8  ;;  %s898_s28 = sshll.u32 %s1218_s25, 2 }
  0x11   : > { %s1228_s6 = scalar_lea.vmem %s1298_s1, %s1037_s27  ;;  %s899_s7 = sshll.u32 %s1221_s26, 4 }
  0x12   : > { %v1045_v0 = vld [vmem:[%s1228_s6 + $0x38] sm:$0xff]  ;;  %s318_s8 = sadd.s32 %s899_s7, %s898_s28  ;;  %v1044_v4 = vld [vmem:[%s1228_s6 + $0x30] sm:$0xff]  ;;  %v1043_v8 = vld [vmem:[%s1228_s6 + $0x28] sm:$0xff]  ;;  %s903_s13 = sshll.u32 %s1221_s26, 2 }
  0x13   : > { %v1053_v1 = vld [vmem:[%s1228_s6 + $0x78] sm:$0xff]  ;;  %626 = vmatpush.bf16.msra.mxu0 %v1045_v0  ;;  %v1052_v5 = vld [vmem:[%s1228_s6 + $0x70] sm:$0xff]  ;;  %s900_s9 = sshll.u32 %s318_s8, 1  ;;  %v1051_v9 = vld [vmem:[%s1228_s6 + $0x68] sm:$0xff]  ;;  %s334_s14 = sadd.s32 %s903_s13, %s1218_s25 }
  0x14   : > { %v1061_v2 = vld [vmem:[%s1228_s6 + $0xb8] sm:$0xff]  ;;  %639 = vmatpush.bf16.msra.mxu1 %v1053_v1  ;;  %v1060_v6 = vld [vmem:[%s1228_s6 + $0xb0] sm:$0xff]  ;;  %v1059_v10 = vld [vmem:[%s1228_s6 + $0xa8] sm:$0xff]  ;;  %s320_s12 = scalar_lea.vmem %s1297_s0, %s900_s9  ;;  %s904_s17 = sshll.u32 %s334_s14, 1 }
  0x15   : > { %v1069_v3 = vld [vmem:[%s1228_s6 + $0xf8] sm:$0xff]  ;;  %652 = vmatpush.bf16.msra.mxu2 %v1061_v2  ;;  %v1068_v7 = vld [vmem:[%s1228_s6 + $0xf0] sm:$0xff]  ;;  %v1067_v11 = vld [vmem:[%s1228_s6 + $0xe8] sm:$0xff]  ;;  %s905_s27 = sshll.u32 %s1137_s19, 2  ;;  %s336_s28 = scalar_lea.vmem %s1300_s3, %s904_s17 }
  0x16   : > { %665 = vmatpush.bf16.msra.mxu3 %v1069_v3  ;;  %v1042_v12 = vld [vmem:[%s1228_s6 + $0x20] sm:$0xff]  ;;  %v1041_v17 = vld [vmem:[%s1228_s6 + $0x18] sm:$0xff]  ;;  %v1040_v21 = vld [vmem:[%s1228_s6 + $0x10] sm:$0xff]  ;;  %s338_s29 = sadd.s32 %s1133_s18, %s905_s27 }
  0x17   : > { %627 = vmatpush.bf16.msra.mxu0 %v1044_v4  ;;  %v1050_v13 = vld [vmem:[%s1228_s6 + $0x60] sm:$0xff]  ;;  %v1049_v18 = vld [vmem:[%s1228_s6 + $0x58] sm:$0xff]  ;;  %v1048_v22 = vld [vmem:[%s1228_s6 + $0x50] sm:$0xff]  ;;  %p340_p7 = scmp.lt.s32.totalorder %s338_s29, 7 }
  0x18   : > { %640 = vmatpush.bf16.msra.mxu1 %v1052_v5  ;;  %v355_v14 = vld [vmem:[%s320_s12] sm:$0xff]  ;;  %v1057_v19 = vld [vmem:[%s1228_s6 + $0x98] sm:$0xff]  ;;  %v1056_v23 = vld [vmem:[%s1228_s6 + $0x90] sm:$0xff] }
  0x19   : > { %653 = vmatpush.bf16.msra.mxu2 %v1060_v6  ;;  %v1058_v15 = vld [vmem:[%s1228_s6 + $0xa0] sm:$0xff]  ;;  %425 = vst [vmem:[#allocation1] ss:$4 sm:$0xff] %v355_v14  ;;  %v1065_v20 = vld [vmem:[%s1228_s6 + $0xd8] sm:$0xff]  ;;  %v1064_v24 = vld [vmem:[%s1228_s6 + $0xd0] sm:$0xff]  ;;  %s1314_s29 = smov (!%p340_p7, %s338_s29), 7 }
  0x1a   : > { %666 = vmatpush.bf16.msra.mxu3 %v1068_v7  ;;  %v1066_v16 = vld [vmem:[%s1228_s6 + $0xe0] sm:$0xff]  ;;  %v1039_v25 = vld [vmem:[%s1228_s6 + $0x8] sm:$0xff]  ;;  %s342_s30 = scalar_lea.vmem %s1301_s4, %s1314_s29  ;;  %s351_s8 = scalar_lea.vmem %s1302_s5, %s1314_s29 }
  0x1b   : > { %628 = vmatpush.bf16.msra.mxu0 %v1043_v8  ;;  %v1047_v26 = vld [vmem:[%s1228_s6 + $0x48] sm:$0xff]  ;;  %v1038_v29 = vld [vmem:[%s1228_s6] sm:$0xff] }
  0x1c   : > { %641 = vmatpush.bf16.msra.mxu1 %v1051_v9  ;;  %v1055_v27 = vld [vmem:[%s1228_s6 + $0x88] sm:$0xff]  ;;  %v1046_v30 = vld [vmem:[%s1228_s6 + $0x40] sm:$0xff] }
  0x1d   : > { %654 = vmatpush.bf16.msra.mxu2 %v1059_v10  ;;  %v1063_v28 = vld [vmem:[%s1228_s6 + $0xc8] sm:$0xff]  ;;  %v1054_v31 = vld [vmem:[%s1228_s6 + $0x80] sm:$0xff] }
  0x1e   : > { %667 = vmatpush.bf16.msra.mxu3 %v1067_v11  ;;  %v1062_v32 = vld [vmem:[%s1228_s6 + $0xc0] sm:$0xff] }
  0x1f   : > { %629 = vmatpush.bf16.msra.mxu0 %v1042_v12 }
  0x20   : > { %642 = vmatpush.bf16.msra.mxu1 %v1050_v13  ;;  %v426_v33 = vld.sshfl [vmem:[#allocation1] sm:$0xff pattern:$0x73625140]  ;;  %v427_v34 = vld.sshfl [vmem:[#allocation1 + $0x8] sm:$0xff pattern:$0x73625140] }
  0x21   : > { %655 = vmatpush.bf16.msra.mxu2 %v1058_v15  ;;  %v428_v35 = vld.sshfl [vmem:[#allocation1 + $0x10] sm:$0xff pattern:$0x73625140]  ;;  %v429_v36 = vld.sshfl [vmem:[#allocation1 + $0x18] sm:$0xff pattern:$0x73625140] }
  0x22   : > { %668 = vmatpush.bf16.msra.mxu3 %v1066_v16 }
  0x23   : > { %630 = vmatpush.bf16.msra.mxu0 %v1041_v17 }
  0x24   : > { %643 = vmatpush.bf16.msra.mxu1 %v1049_v18 }
  0x25   : > { %656 = vmatpush.bf16.msra.mxu2 %v1057_v19 }
  0x26   : > { %669 = vmatpush.bf16.msra.mxu3 %v1065_v20 }
  0x27   : > { %631 = vmatpush.bf16.msra.mxu0 %v1040_v21 }
  0x28   : > { %644 = vmatpush.bf16.msra.mxu1 %v1048_v22 }
  0x29   : > { %657 = vmatpush.bf16.msra.mxu2 %v1056_v23 }
  0x2a   : > { %670 = vmatpush.bf16.msra.mxu3 %v1064_v24 }
  0x2b   : > { %632 = vmatpush.bf16.msra.mxu0 %v1039_v25 }
  0x2c   : > { %645 = vmatpush.bf16.msra.mxu1 %v1047_v26 }
  0x2d   : > { %658 = vmatpush.bf16.msra.mxu2 %v1055_v27 }
  0x2e   : > { %671 = vmatpush.bf16.msra.mxu3 %v1063_v28 }
  0x2f   : > { %633 = vmatpush.bf16.msra.mxu0 %v1038_v29 }
  0x30   : > { %646 = vmatpush.bf16.msra.mxu1 %v1046_v30 }
  0x31   : > { %659 = vmatpush.bf16.msra.mxu2 %v1054_v31 }
  0x32   : > { %672 = vmatpush.bf16.msra.mxu3 %v1062_v32  ;;  %634 = vmatmul.bf16.vlgmr.msra.gmra.mxu0 %v426_v33 }
  0x33   : > { %647 = vmatmul.bf16.vlgmr.msra.gmra.mxu1 %v427_v34 }
  0x34   : > { %660 = vmatmul.bf16.vlgmr.msra.gmra.mxu2 %v428_v35 }
  0x35   : > { %673 = vmatmul.bf16.vlgmr.msra.gmra.mxu3 %v429_v36 }
  0xaf   : > { %v635_v38 = vpop.f32.mrf.mxu0 }
  0xb0   : > { %v648_v39 = vpop.f32.mrf.mxu1  ;;  %v636_v40 = vadd.f32 %v1110_v37, %v635_v38 }
  0xb2   : > { %v649_v41 = vadd.f32 %v648_v39, %v636_v40 }
  0xb7   : > { %v661_v42 = vpop.f32.mrf.mxu2  ;;  %v637_v45 = vpop.f32.mrf.mxu0 }
  0xb8   : > { %v674_v43 = vpop.f32.mrf.mxu3  ;;  %v662_v44 = vadd.f32 %v661_v42, %v649_v41  ;;  %v650_v46 = vpop.f32.mrf.mxu1 }
  0xba   : > { %v675_v47 = vadd.f32 %v674_v43, %v662_v44 }
  0xbc   : > { %v679_v48 = vsel %vm678_vm0, %v675_v47, 0.0  ;;  %v688_v49 = vmul.f32 %v675_v47, %v675_v47  ;;  %v697_v50 = vpack.c.bf16 %v675_v47, %v675_v47 }
  0xbd   : > { %v680_v51 = vrot.slane %v679_v48, 4 }
  0xbe   : > { %v689_v52 = vsel %vm678_vm0, %v688_v49, 0.0  ;;  %699 = vst.msk [vmem:[%s336_s28] sm:$0x3] %vm698_vm1, %v697_v50 }
  0xbf   : > { %v681_v53 = vadd.f32 %v680_v51, %v679_v48  ;;  %v690_v54 = vrot.slane %v689_v52, 4  ;;  %v663_v55 = vpop.f32.mrf.mxu2 }
  0xc0   : > { %v676_v56 = vpop.f32.mrf.mxu3 }
  0xc1   : > { %v682_v57 = vrot.slane %v681_v53, 2  ;;  %v691_v58 = vadd.f32 %v690_v54, %v689_v52 }
  0xc3   : > { %v683_v59 = vadd.f32 %v682_v57, %v681_v53  ;;  %v692_v60 = vrot.slane %v691_v58, 2 }
  0xc5   : > { %v684_v61 = vrot.slane %v683_v59, 1  ;;  %v693_v62 = vadd.f32 %v692_v60, %v691_v58 }
  0xc7   : > { %v685_v63 = vadd.f32 %v684_v61, %v683_v59  ;;  %v694_v0 = vrot.slane %v693_v62, 1 }
  0xc9   : > { %687 = vst.msk [vmem:[%s342_s30] sm:$0x1] %vm686_vm2, %v685_v63  ;;  %v695_v1 = vadd.f32 %v694_v0, %v693_v62 }
  0xcb   : > { %696 = vst.msk [vmem:[%s351_s8] sm:$0x1] %vm686_vm2, %v695_v1 }
  0xcc PF: > { %s16_s22 = sadd.s32 1, %s1149_s22   ;;  %s1303_s18 = smov %s1141_s20 }
  0xcd   : > { %p13_p8 = scmp.ge.s32.totalorder %s16_s22, 10   ;;  %s1304_s19 = smov %s1145_s21 }
  0xce   : > { %s1305_s20 = smov %s1308_s23  ;;  %s1306_s21 = smov %s1312_s24 }
  0xcf   :  { %15 = sbr.rel (!%p13_p8) target bundleno = 3 (0x3), region = 89 }

// kernel: forward.23
= control target key start
LH: loop header
LB: loop body
LE: loop exit
PB: predicated region body
PF: predicated region fallthrough
CT: control target
= control target key end

     0   :  { %s1245_s18 = smov 0   ;;  %s1247_s19 = smov 0   ;;  %s1363_s0 = inlined_call_operand.vmem [shape: bf16[2,4,16,512], index: 0, kind: input, shape index: {}]   ;;  %s1364_s1 = inlined_call_operand.vmem [shape: bf16[4,512,32], index: 1, kind: input, shape index: {}]   ;;  %s1365_s2 = inlined_call_operand.vmem [shape: f32[1,32], index: 2, kind: input, shape index: {}]   ;;  %s1366_s3 = inlined_call_operand.vmem [shape: bf16[2,4,16,32], index: 3, kind: output, shape index: {0}]   ;;  %s1367_s4 = inlined_call_operand.vmem [shape: f32[8,1,32], index: 4, kind: output, shape index: {1}]   ;;  %s1368_s5 = inlined_call_operand.vmem [shape: f32[8,1,32], index: 5, kind: output, shape index: {2}]  }
   0x1   :  { %s1249_s20 = smov 0   ;;  %s1251_s21 = smov 0  }
   0x2   :  { %s1253_s22 = smov 0  }
   0x3 LB: > { %s31_s23 = sadd.s32 1, %s1205_s20  ;;  %s35_s24 = sadd.s32 1, %s1209_s21  ;;  %s1213_s22 = sphi %s1253_s22, %s16_s22   ;;  %s1209_s21 = sphi %s1251_s21, %s1372_s21   ;;  %s1205_s20 = sphi %s1249_s20, %s1371_s20   ;;  %s1201_s19 = sphi %s1247_s19, %s1370_s19   ;;  %s1197_s18 = sphi %s1245_s18, %s1369_s18  }
   0x4   : > { %p33_p0 = scmp.ge.s32.totalorder %s31_s23, 4  ;;  %p940_p1 = scmp.ge.s32.totalorder %s1213_s22, 1 }
   0x5   : > { %p251_p2 = scmp.lt.s32.totalorder %s1213_s22, 9 }
   0x6   : > { %s1374_s23 = smov (%p33_p0, %s31_s23), 0  ;;  %s1376_s24 = smov (!%p33_p0, %s35_s24), %s1209_s21 }
   0x7   : > { %p252_p3 = pnand %p940_p1, %p251_p2  ;;  %p37_p4 = scmp.ge.s32.totalorder %s1376_s24, 2 }
   0x8   : > { %p316_p5 = scmp.lt.s32.totalorder (!%p252_p3), %s1197_s18, 3  ;;  %p314_p6 = scmp.lt.s32.totalorder (!%p252_p3), %s1201_s19, 1 }
   0x9   : > { %s1378_s24 = smov (%p37_p4, %s1376_s24), 0  ;;  %255 = sbr.rel (%p252_p3) target bundleno = 214 (0xd6), region = 32 }
   0xe   : > { %s1281_s25 = scalar_select %p316_p5, %s1197_s18, 3  ;;  %v1174_v44 = vld [vmem:[%s1365_s2] ss:$0 sm:$0xff]  ;;  %vm731_vm0 = vcmask 257024   ;;  %vm705_vm1 = vcmask 261120   ;;  %vm715_vm2 = vcmask 253952  }
   0xf   : > { %s1303_s30 = scalar_select %p314_p6, %s1201_s19, 1 }
  0x10   : > { %s1097_s26 = sshll.u32 %s1281_s25, 8  ;;  %s941_s6 = sshll.u32 %s1281_s25, 3 }
  0x11   : > { %s1287_s29 = scalar_lea.vmem %s1364_s1, %s1097_s26  ;;  %s942_s7 = sshll.u32 %s1303_s30, 5 }
  0x12   : > { %v1109_v0 = vld [vmem:[%s1287_s29 + $0x38] sm:$0xff]  ;;  %v1108_v4 = vld [vmem:[%s1287_s29 + $0x30] sm:$0xff]  ;;  %v1107_v8 = vld [vmem:[%s1287_s29 + $0x28] sm:$0xff]  ;;  %s324_s8 = sadd.s32 %s942_s7, %s941_s6  ;;  %s946_s13 = sshll.u32 %s1281_s25, 1 }
  0x13   : > { %v1117_v1 = vld [vmem:[%s1287_s29 + $0x78] sm:$0xff]  ;;  %649 = vmatpush.bf16.msra.mxu0 %v1109_v0  ;;  %v1116_v5 = vld [vmem:[%s1287_s29 + $0x70] sm:$0xff]  ;;  %v1115_v9 = vld [vmem:[%s1287_s29 + $0x68] sm:$0xff]  ;;  %s943_s9 = sshll.u32 %s324_s8, 2  ;;  %s947_s14 = sshll.u32 %s1303_s30, 3 }
  0x14   : > { %v1125_v2 = vld [vmem:[%s1287_s29 + $0xb8] sm:$0xff]  ;;  %663 = vmatpush.bf16.msra.mxu1 %v1117_v1  ;;  %v1124_v6 = vld [vmem:[%s1287_s29 + $0xb0] sm:$0xff]  ;;  %v1123_v10 = vld [vmem:[%s1287_s29 + $0xa8] sm:$0xff]  ;;  %s326_s12 = scalar_lea.vmem %s1363_s0, %s943_s9  ;;  %s343_s15 = sadd.s32 %s947_s14, %s946_s13 }
  0x15   : > { %v1133_v3 = vld [vmem:[%s1287_s29 + $0xf8] sm:$0xff]  ;;  %677 = vmatpush.bf16.msra.mxu2 %v1125_v2  ;;  %v1132_v7 = vld [vmem:[%s1287_s29 + $0xf0] sm:$0xff]  ;;  %v1131_v11 = vld [vmem:[%s1287_s29 + $0xe8] sm:$0xff]  ;;  %s948_s26 = sshll.u32 %s343_s15, 2 }
  0x16   : > { %691 = vmatpush.bf16.msra.mxu3 %v1133_v3  ;;  %v1106_v12 = vld [vmem:[%s1287_s29 + $0x20] sm:$0xff]  ;;  %v1105_v16 = vld [vmem:[%s1287_s29 + $0x18] sm:$0xff]  ;;  %v1104_v20 = vld [vmem:[%s1287_s29 + $0x10] sm:$0xff]  ;;  %s345_s28 = scalar_lea.vmem %s1366_s3, %s948_s26 }
  0x17   : > { %650 = vmatpush.bf16.msra.mxu0 %v1108_v4  ;;  %v1114_v13 = vld [vmem:[%s1287_s29 + $0x60] sm:$0xff]  ;;  %v1113_v17 = vld [vmem:[%s1287_s29 + $0x58] sm:$0xff]  ;;  %v1112_v21 = vld [vmem:[%s1287_s29 + $0x50] sm:$0xff] }
  0x18   : > { %664 = vmatpush.bf16.msra.mxu1 %v1116_v5  ;;  %v1122_v14 = vld [vmem:[%s1287_s29 + $0xa0] sm:$0xff]  ;;  %v1121_v18 = vld [vmem:[%s1287_s29 + $0x98] sm:$0xff]  ;;  %v1120_v22 = vld [vmem:[%s1287_s29 + $0x90] sm:$0xff] }
  0x19   : > { %678 = vmatpush.bf16.msra.mxu2 %v1124_v6  ;;  %v1130_v15 = vld [vmem:[%s1287_s29 + $0xe0] sm:$0xff]  ;;  %v1129_v19 = vld [vmem:[%s1287_s29 + $0xd8] sm:$0xff]  ;;  %v1128_v23 = vld [vmem:[%s1287_s29 + $0xd0] sm:$0xff] }
  0x1a   : > { %692 = vmatpush.bf16.msra.mxu3 %v1132_v7  ;;  %v1103_v24 = vld [vmem:[%s1287_s29 + $0x8] sm:$0xff]  ;;  %v1102_v28 = vld [vmem:[%s1287_s29] sm:$0xff]  ;;  %v1100_v33 = vld [vmem:[%s326_s12 + $0xc] sm:$0xf0] }
  0x1b   : > { %651 = vmatpush.bf16.msra.mxu0 %v1107_v8  ;;  %v1111_v25 = vld [vmem:[%s1287_s29 + $0x48] sm:$0xff]  ;;  %v1110_v29 = vld [vmem:[%s1287_s29 + $0x40] sm:$0xff]  ;;  %v955_v35 = vld [vmem:[%s326_s12 + $0x10] sm:$0xf0] }
  0x1c   : > { %665 = vmatpush.bf16.msra.mxu1 %v1115_v9  ;;  %v1119_v26 = vld [vmem:[%s1287_s29 + $0x88] sm:$0xff]  ;;  %v1118_v30 = vld [vmem:[%s1287_s29 + $0x80] sm:$0xff]  ;;  %v1101_v37 = vld [vmem:[%s326_s12 + $0x14] sm:$0xf0] }
  0x1d   : > { %679 = vmatpush.bf16.msra.mxu2 %v1123_v10  ;;  %v1127_v27 = vld [vmem:[%s1287_s29 + $0xc8] sm:$0xff]  ;;  %v1126_v31 = vld [vmem:[%s1287_s29 + $0xc0] sm:$0xff]  ;;  %v963_v39 = vld [vmem:[%s326_s12 + $0x18] sm:$0xf0]  ;;  %s949_s29 = sshll.u32 %s1201_s19, 2 }
  0x1e   : > { %693 = vmatpush.bf16.msra.mxu3 %v1131_v11  ;;  %v953_v32 = vld [vmem:[%s326_s12] sm:$0xf]  ;;  %v1098_v34 = vld [vmem:[%s326_s12 + $0x4] sm:$0xf]  ;;  %v961_v36 = vld [vmem:[%s326_s12 + $0x8] sm:$0xf]  ;;  %s348_s30 = sadd.s32 %s1197_s18, %s949_s29 }
  0x1f   : > { %652 = vmatpush.bf16.msra.mxu0 %v1106_v12  ;;  %v1099_v38 = vld [vmem:[%s326_s12 + $0xc] sm:$0xf]  ;;  %v954_v40 = vor.u32 %v1100_v33, %v953_v32  ;;  %v958_v41 = vor.u32 %v1098_v34, %v955_v35  ;;  %v962_v42 = vor.u32 %v1101_v37, %v961_v36  ;;  %p350_p7 = scmp.lt.s32.totalorder %s348_s30, 7 }
  0x20   : > { %666 = vmatpush.bf16.msra.mxu1 %v1114_v13  ;;  %v966_v43 = vor.u32 %v1099_v38, %v963_v39 }
  0x21   : > { %680 = vmatpush.bf16.msra.mxu2 %v1122_v14  ;;  %s1380_s30 = smov (!%p350_p7, %s348_s30), 7 }
  0x22   : > { %694 = vmatpush.bf16.msra.mxu3 %v1130_v15  ;;  %s352_s18 = scalar_lea.vmem %s1367_s4, %s1380_s30  ;;  %s361_s9 = scalar_lea.vmem %s1368_s5, %s1380_s30 }
  0x23   : > { %653 = vmatpush.bf16.msra.mxu0 %v1105_v16 }
  0x24   : > { %667 = vmatpush.bf16.msra.mxu1 %v1113_v17 }
  0x25   : > { %681 = vmatpush.bf16.msra.mxu2 %v1121_v18 }
  0x26   : > { %695 = vmatpush.bf16.msra.mxu3 %v1129_v19 }
  0x27   : > { %654 = vmatpush.bf16.msra.mxu0 %v1104_v20 }
  0x28   : > { %668 = vmatpush.bf16.msra.mxu1 %v1112_v21 }
  0x29   : > { %682 = vmatpush.bf16.msra.mxu2 %v1120_v22 }
  0x2a   : > { %696 = vmatpush.bf16.msra.mxu3 %v1128_v23 }
  0x2b   : > { %655 = vmatpush.bf16.msra.mxu0 %v1103_v24 }
  0x2c   : > { %669 = vmatpush.bf16.msra.mxu1 %v1111_v25 }
  0x2d   : > { %683 = vmatpush.bf16.msra.mxu2 %v1119_v26 }
  0x2e   : > { %697 = vmatpush.bf16.msra.mxu3 %v1127_v27 }
  0x2f   : > { %656 = vmatpush.bf16.msra.mxu0 %v1102_v28 }
  0x30   : > { %670 = vmatpush.bf16.msra.mxu1 %v1110_v29 }
  0x31   : > { %684 = vmatpush.bf16.msra.mxu2 %v1118_v30 }
  0x32   : > { %698 = vmatpush.bf16.msra.mxu3 %v1126_v31  ;;  %657 = vmatmul.bf16.vlgmr.msra.gmra.mxu0 %v954_v40 }
  0x33   : > { %671 = vmatmul.bf16.vlgmr.msra.gmra.mxu1 %v958_v41 }
  0x34   : > { %685 = vmatmul.bf16.vlgmr.msra.gmra.mxu2 %v962_v42 }
  0x35   : > { %699 = vmatmul.bf16.vlgmr.msra.gmra.mxu3 %v966_v43 }
  0xaf   : > { %v658_v45 = vpop.f32.mrf.mxu0 }
  0xb0   : > { %v659_v46 = vadd.f32 %v1174_v44, %v658_v45  ;;  %v672_v47 = vpop.f32.mrf.mxu1 }
  0xb2   : > { %v673_v48 = vadd.f32 %v672_v47, %v659_v46 }
  0xb7   : > { %v686_v49 = vpop.f32.mrf.mxu2  ;;  %v660_v52 = vpop.f32.mrf.mxu0 }
  0xb8   : > { %v700_v50 = vpop.f32.mrf.mxu3  ;;  %v687_v51 = vadd.f32 %v686_v49, %v673_v48  ;;  %v661_v54 = vadd.f32 %v1174_v44, %v660_v52  ;;  %v674_v56 = vpop.f32.mrf.mxu1 }
  0xba   : > { %v701_v53 = vadd.f32 %v700_v50, %v687_v51  ;;  %v675_v57 = vadd.f32 %v674_v56, %v661_v54 }
  0xbc   : > { %v729_v55 = vpack.c.bf16 %v701_v53, %v701_v53  ;;  %v717_v61 = vmul.f32 %v701_v53, %v701_v53  ;;  %v706_v63 = vsel %vm705_vm1, %v701_v53, 0.0 }
  0xbe   : > { %732 = vst.msk [vmem:[%s345_s28] sm:$0xf] %vm731_vm0, %v729_v55  ;;  %v719_v4 = vsel %vm705_vm1, %v717_v61, 0.0 }
  0xbf   : > { %v688_v58 = vpop.f32.mrf.mxu2 }
  0xc0   : > { %v689_v59 = vadd.f32 %v688_v58, %v675_v57  ;;  %v702_v60 = vpop.f32.mrf.mxu3 }
  0xc2   : > { %v703_v62 = vadd.f32 %v702_v60, %v689_v59 }
  0xc4   : > { %v707_v0 = vsel %vm705_vm1, %v703_v62, 0.0  ;;  %v718_v1 = vmul.f32 %v703_v62, %v703_v62  ;;  %v730_v2 = vpack.c.bf16 %v703_v62, %v703_v62 }
  0xc5   : > { %v708_v3 = vadd.f32 %v707_v0, %v706_v63 }
  0xc6   : > { %v720_v5 = vsel %vm705_vm1, %v718_v1, 0.0  ;;  %733 = vst.msk [vmem:[%s345_s28 + $0x4] sm:$0xf] %vm731_vm0, %v730_v2 }
  0xc7   : > { %v709_v6 = vrot.slane %v708_v3, 4  ;;  %v721_v7 = vadd.f32 %v720_v5, %v719_v4 }
  0xc9   : > { %v710_v8 = vadd.f32 %v709_v6, %v708_v3  ;;  %v722_v9 = vrot.slane %v721_v7, 4 }
  0xcb   : > { %v711_v10 = vrot.slane %v710_v8, 2  ;;  %v723_v11 = vadd.f32 %v722_v9, %v721_v7 }
  0xcd   : > { %v712_v12 = vadd.f32 %v711_v10, %v710_v8  ;;  %v724_v13 = vrot.slane %v723_v11, 2 }
  0xcf   : > { %v713_v14 = vrot.slane %v712_v12, 1  ;;  %v725_v15 = vadd.f32 %v724_v13, %v723_v11 }
  0xd1   : > { %v714_v16 = vadd.f32 %v713_v14, %v712_v12  ;;  %v726_v17 = vrot.slane %v725_v15, 1 }
  0xd3   : > { %716 = vst.msk [vmem:[%s352_s18] sm:$0x1] %vm715_vm2, %v714_v16  ;;  %v727_v18 = vadd.f32 %v726_v17, %v725_v15 }
  0xd5   : > { %728 = vst.msk [vmem:[%s361_s9] sm:$0x1] %vm715_vm2, %v727_v18 }
  0xd6 PF: > { %s16_s22 = sadd.s32 1, %s1213_s22   ;;  %s1369_s18 = smov %s1205_s20 }
  0xd7   : > { %p13_p8 = scmp.ge.s32.totalorder %s16_s22, 10   ;;  %s1370_s19 = smov %s1209_s21 }
  0xd8   : > { %s1371_s20 = smov %s1374_s23  ;;  %s1372_s21 = smov %s1378_s24 }
  0xd9   :  { %15 = sbr.rel (!%p13_p8) target bundleno = 3 (0x3), region = 89 }

// kernel: forward.24
= control target key start
LH: loop header
LB: loop body
LE: loop exit
PB: predicated region body
PF: predicated region fallthrough
CT: control target
= control target key end

     0   :  { %s1141_s18 = smov 0   ;;  %s1143_s19 = smov 0   ;;  %s1303_s0 = inlined_call_operand.vmem [shape: bf16[2,4,64,256], index: 0, kind: input, shape index: {}]   ;;  %s1304_s1 = inlined_call_operand.vmem [shape: bf16[4,256,16], index: 1, kind: input, shape index: {}]   ;;  %s1305_s2 = inlined_call_operand.vmem [shape: f32[1,16], index: 2, kind: input, shape index: {}]   ;;  %s1306_s3 = inlined_call_operand.vmem [shape: bf16[2,4,64,16], index: 3, kind: output, shape index: {0}]   ;;  %s1307_s4 = inlined_call_operand.vmem [shape: f32[8,1,16], index: 4, kind: output, shape index: {1}]   ;;  %s1308_s5 = inlined_call_operand.vmem [shape: f32[8,1,16], index: 5, kind: output, shape index: {2}]  }
   0x1   :  { %s1145_s20 = smov 0   ;;  %s1147_s21 = smov 0  }
   0x2   :  { %s1149_s22 = smov 0  }
   0x3 LB: > { %s31_s23 = sadd.s32 1, %s1101_s20  ;;  %s35_s24 = sadd.s32 1, %s1105_s21  ;;  %s1109_s22 = sphi %s1149_s22, %s16_s22   ;;  %s1105_s21 = sphi %s1147_s21, %s1312_s21   ;;  %s1101_s20 = sphi %s1145_s20, %s1311_s20   ;;  %s1097_s19 = sphi %s1143_s19, %s1310_s19   ;;  %s1093_s18 = sphi %s1141_s18, %s1309_s18  }
   0x4   : > { %p33_p0 = scmp.ge.s32.totalorder %s31_s23, 4  ;;  %p880_p1 = scmp.ge.s32.totalorder %s1109_s22, 1 }
   0x5   : > { %p251_p2 = scmp.lt.s32.totalorder %s1109_s22, 9 }
   0x6   : > { %s1314_s23 = smov (%p33_p0, %s31_s23), 0  ;;  %s1316_s24 = smov (!%p33_p0, %s35_s24), %s1105_s21 }
   0x7   : > { %p252_p3 = pnand %p880_p1, %p251_p2  ;;  %p37_p4 = scmp.ge.s32.totalorder %s1316_s24, 2 }
   0x8   : > { %p316_p5 = scmp.lt.s32.totalorder (!%p252_p3), %s1093_s18, 3  ;;  %p314_p6 = scmp.lt.s32.totalorder (!%p252_p3), %s1097_s19, 1 }
   0x9   : > { %s1318_s24 = smov (%p37_p4, %s1316_s24), 0  ;;  %255 = sbr.rel (%p252_p3) target bundleno = 230 (0xe6), region = 32 }
   0xe   : > { %s1177_s25 = scalar_select %p316_p5, %s1093_s18, 3  ;;  %v1233_v40 = vld [vmem:[%s1305_s2] ss:$0 sm:$0xff]  ;;  %vm665_vm0 = vcmask 125952   ;;  %vm603_vm1 = vcmask 130048   ;;  %vm625_vm2 = vcmask 122880  }
   0xf   : > { %s1193_s30 = scalar_select %p314_p6, %s1097_s19, 1 }
  0x10   : > { %s989_s26 = sshll.u32 %s1177_s25, 7  ;;  %s881_s6 = sshll.u32 %s1177_s25, 4 }
  0x11   : > { %s1183_s29 = scalar_lea.vmem %s1304_s1, %s989_s26  ;;  %s882_s7 = sshll.u32 %s1193_s30, 6 }
  0x12   : > { %v1005_v0 = vld [vmem:[%s1183_s29 + $0x38] sm:$0xff]  ;;  %v1004_v2 = vld [vmem:[%s1183_s29 + $0x30] sm:$0xff]  ;;  %v1003_v4 = vld [vmem:[%s1183_s29 + $0x28] sm:$0xff]  ;;  %s324_s8 = sadd.s32 %s882_s7, %s881_s6  ;;  %s886_s13 = sshll.u32 %s1177_s25, 3 }
  0x13   : > { %v1013_v1 = vld [vmem:[%s1183_s29 + $0x78] sm:$0xff]  ;;  %545 = vmatpush.bf16.msra.mxu0 %v1005_v0  ;;  %1014 = vmatpush.bf16.msra.mxu2 %v1005_v0  ;;  %v1012_v3 = vld [vmem:[%s1183_s29 + $0x70] sm:$0xff]  ;;  %v1011_v5 = vld [vmem:[%s1183_s29 + $0x68] sm:$0xff]  ;;  %s883_s9 = sshll.u32 %s324_s8, 2  ;;  %s887_s14 = sshll.u32 %s1193_s30, 5 }
  0x14   : > { %574 = vmatpush.bf16.msra.mxu1 %v1013_v1  ;;  %1022 = vmatpush.bf16.msra.mxu3 %v1013_v1  ;;  %v1002_v6 = vld [vmem:[%s1183_s29 + $0x20] sm:$0xff]  ;;  %v1001_v8 = vld [vmem:[%s1183_s29 + $0x18] sm:$0xff]  ;;  %v1000_v10 = vld [vmem:[%s1183_s29 + $0x10] sm:$0xff]  ;;  %s1207_s12 = scalar_lea.vmem %s1303_s0, %s883_s9  ;;  %s343_s15 = sadd.s32 %s887_s14, %s886_s13 }
  0x15   : > { %v1010_v7 = vld [vmem:[%s1183_s29 + $0x60] sm:$0xff]  ;;  %v1009_v9 = vld [vmem:[%s1183_s29 + $0x58] sm:$0xff]  ;;  %v1008_v11 = vld [vmem:[%s1183_s29 + $0x50] sm:$0xff]  ;;  %s888_s25 = sshll.u32 %s343_s15, 2 }
  0x16   : > { %v999_v12 = vld [vmem:[%s1183_s29 + $0x8] sm:$0xff]  ;;  %v998_v14 = vld [vmem:[%s1183_s29] sm:$0xff]  ;;  %v901_v28 = vld [vmem:[%s1207_s12 + $0x10] sm:$0xf]  ;;  %s1239_s28 = scalar_lea.vmem %s1306_s3, %s888_s25 }
  0x17   : > { %546 = vmatpush.bf16.msra.mxu0 %v1004_v2  ;;  %1015 = vmatpush.bf16.msra.mxu2 %v1004_v2  ;;  %v1007_v13 = vld [vmem:[%s1183_s29 + $0x48] sm:$0xff]  ;;  %v1006_v15 = vld [vmem:[%s1183_s29 + $0x40] sm:$0xff]  ;;  %v993_v29 = vld [vmem:[%s1207_s12 + $0x14] sm:$0xf0]  ;;  %s889_s29 = sshll.u32 %s1097_s19, 2 }
  0x18   : > { %575 = vmatpush.bf16.msra.mxu1 %v1012_v3  ;;  %1023 = vmatpush.bf16.msra.mxu3 %v1012_v3  ;;  %v893_v16 = vld [vmem:[%s1207_s12] sm:$0xf]  ;;  %v991_v17 = vld [vmem:[%s1207_s12 + $0x4] sm:$0xf0]  ;;  %v990_v20 = vld [vmem:[%s1207_s12 + $0x4] sm:$0xf]  ;;  %v902_v36 = vor.u32 %v993_v29, %v901_v28  ;;  %s348_s30 = sadd.s32 %s1093_s18, %s889_s29 }
  0x19   : > { %v909_v18 = vld [vmem:[%s1207_s12 + $0x20] sm:$0xf]  ;;  %v995_v19 = vld [vmem:[%s1207_s12 + $0x24] sm:$0xf0]  ;;  %v895_v21 = vld [vmem:[%s1207_s12 + $0x8] sm:$0xf0]  ;;  %v894_v24 = vor.u32 %v991_v17, %v893_v16 }
  0x1a   : > { %v994_v22 = vld [vmem:[%s1207_s12 + $0x24] sm:$0xf]  ;;  %v911_v23 = vld [vmem:[%s1207_s12 + $0x28] sm:$0xf0]  ;;  %v910_v25 = vor.u32 %v995_v19, %v909_v18  ;;  %v898_v26 = vor.u32 %v990_v20, %v895_v21  ;;  %v917_v30 = vld [vmem:[%s1207_s12 + $0x30] sm:$0xf] }
  0x1b   : > { %547 = vmatpush.bf16.msra.mxu0 %v1003_v4  ;;  %1016 = vmatpush.bf16.msra.mxu2 %v1003_v4  ;;  %v914_v27 = vor.u32 %v994_v22, %v911_v23  ;;  %v997_v31 = vld [vmem:[%s1207_s12 + $0x34] sm:$0xf0]  ;;  %v992_v32 = vld [vmem:[%s1207_s12 + $0x14] sm:$0xf]  ;;  %v903_v33 = vld [vmem:[%s1207_s12 + $0x18] sm:$0xf0] }
  0x1c   : > { %576 = vmatpush.bf16.msra.mxu1 %v1011_v5  ;;  %1024 = vmatpush.bf16.msra.mxu3 %v1011_v5  ;;  %v996_v34 = vld [vmem:[%s1207_s12 + $0x34] sm:$0xf]  ;;  %v919_v35 = vld [vmem:[%s1207_s12 + $0x38] sm:$0xf0]  ;;  %v918_v37 = vor.u32 %v997_v31, %v917_v30  ;;  %v906_v38 = vor.u32 %v992_v32, %v903_v33  ;;  %p350_p7 = scmp.lt.s32.totalorder %s348_s30, 7 }
  0x1d   : > { %v922_v39 = vor.u32 %v996_v34, %v919_v35 }
  0x1e   : > { %s1320_s30 = smov (!%p350_p7, %s348_s30), 7 }
  0x1f   : > { %548 = vmatpush.bf16.msra.mxu0 %v1002_v6  ;;  %1017 = vmatpush.bf16.msra.mxu2 %v1002_v6  ;;  %s352_s18 = scalar_lea.vmem %s1307_s4, %s1320_s30  ;;  %s361_s9 = scalar_lea.vmem %s1308_s5, %s1320_s30 }
  0x20   : > { %577 = vmatpush.bf16.msra.mxu1 %v1010_v7  ;;  %1025 = vmatpush.bf16.msra.mxu3 %v1010_v7 }
  0x23   : > { %549 = vmatpush.bf16.msra.mxu0 %v1001_v8  ;;  %1018 = vmatpush.bf16.msra.mxu2 %v1001_v8 }
  0x24   : > { %578 = vmatpush.bf16.msra.mxu1 %v1009_v9  ;;  %1026 = vmatpush.bf16.msra.mxu3 %v1009_v9 }
  0x27   : > { %550 = vmatpush.bf16.msra.mxu0 %v1000_v10  ;;  %1019 = vmatpush.bf16.msra.mxu2 %v1000_v10 }
  0x28   : > { %579 = vmatpush.bf16.msra.mxu1 %v1008_v11  ;;  %1027 = vmatpush.bf16.msra.mxu3 %v1008_v11 }
  0x2b   : > { %551 = vmatpush.bf16.msra.mxu0 %v999_v12  ;;  %1020 = vmatpush.bf16.msra.mxu2 %v999_v12 }
  0x2c   : > { %580 = vmatpush.bf16.msra.mxu1 %v1007_v13  ;;  %1028 = vmatpush.bf16.msra.mxu3 %v1007_v13 }
  0x2f   : > { %552 = vmatpush.bf16.msra.mxu0 %v998_v14  ;;  %1021 = vmatpush.bf16.msra.mxu2 %v998_v14 }
  0x30   : > { %581 = vmatpush.bf16.msra.mxu1 %v1006_v15  ;;  %1029 = vmatpush.bf16.msra.mxu3 %v1006_v15 }
  0x32   : > { %553 = vmatmul.bf16.vlgmr.msra.gmra.mxu0 %v894_v24  ;;  %563 = vmatmul.bf16.vlgmr.msra.gmra.mxu2 %v910_v25 }
  0x33   : > { %582 = vmatmul.bf16.vlgmr.msra.gmra.mxu1 %v898_v26  ;;  %592 = vmatmul.bf16.vlgmr.msra.gmra.mxu3 %v914_v27 }
  0x42   : > { %558 = vmatmul.bf16.gmra.mxu0 %v902_v36  ;;  %568 = vmatmul.bf16.gmra.mxu2 %v918_v37 }
  0x43   : > { %587 = vmatmul.bf16.gmra.mxu1 %v906_v38  ;;  %597 = vmatmul.bf16.gmra.mxu3 %v922_v39 }
  0xaf   : > { %v554_v41 = vpop.f32.mrf.mxu0 }
  0xb0   : > { %v555_v42 = vadd.f32 %v1233_v40, %v554_v41  ;;  %v583_v43 = vpop.f32.mrf.mxu1 }
  0xb2   : > { %v584_v44 = vadd.f32 %v583_v43, %v555_v42 }
  0xb4   : > { %v657_v45 = vpack.c.bf16 %v584_v44, %v584_v44  ;;  %v627_v4 = vmul.f32 %v584_v44, %v584_v44  ;;  %v604_v9 = vsel %vm603_vm1, %v584_v44, 0.0 }
  0xb5   : > { %v564_v46 = vpop.f32.mrf.mxu2 }
  0xb6   : > { %666 = vst.msk [vmem:[%s1239_s28] sm:$0xf] %vm665_vm0, %v657_v45  ;;  %v565_v47 = vadd.f32 %v1233_v40, %v564_v46  ;;  %v593_v48 = vpop.f32.mrf.mxu3  ;;  %v635_v17 = vsel %vm603_vm1, %v627_v4, 0.0 }
  0xb7   : > { %v556_v49 = vpop.f32.mrf.mxu0 }
  0xb8   : > { %v594_v50 = vadd.f32 %v593_v48, %v565_v47  ;;  %v557_v51 = vadd.f32 %v1233_v40, %v556_v49  ;;  %v585_v52 = vpop.f32.mrf.mxu1 }
  0xba   : > { %v661_v53 = vpack.c.bf16 %v594_v50, %v594_v50  ;;  %v586_v54 = vadd.f32 %v585_v52, %v557_v51  ;;  %v631_v23 = vmul.f32 %v594_v50, %v594_v50  ;;  %v611_v30 = vsel %vm603_vm1, %v594_v50, 0.0 }
  0xbc   : > { %670 = vst.msk [vmem:[%s1239_s28 + $0x10] sm:$0xf] %vm665_vm0, %v661_v53  ;;  %v658_v55 = vpack.c.bf16 %v586_v54, %v586_v54  ;;  %v628_v1 = vmul.f32 %v586_v54, %v586_v54  ;;  %v605_v5 = vsel %vm603_vm1, %v586_v54, 0.0  ;;  %v642_v37 = vsel %vm603_vm1, %v631_v23, 0.0 }
  0xbd   : > { %v566_v56 = vpop.f32.mrf.mxu2  ;;  %v606_v15 = vadd.f32 %v605_v5, %v604_v9 }
  0xbe   : > { %667 = vst.msk [vmem:[%s1239_s28 + $0x4] sm:$0xf] %vm665_vm0, %v658_v55  ;;  %v567_v57 = vadd.f32 %v1233_v40, %v566_v56  ;;  %v595_v58 = vpop.f32.mrf.mxu3  ;;  %v636_v11 = vsel %vm603_vm1, %v628_v1, 0.0 }
  0xbf   : > { %v559_v59 = vpop.f32.mrf.mxu0  ;;  %v637_v21 = vadd.f32 %v636_v11, %v635_v17 }
  0xc0   : > { %v596_v60 = vadd.f32 %v595_v58, %v567_v57  ;;  %v560_v61 = vadd.f32 %v1233_v40, %v559_v59  ;;  %v588_v62 = vpop.f32.mrf.mxu1 }
  0xc2   : > { %v662_v63 = vpack.c.bf16 %v596_v60, %v596_v60  ;;  %v589_v0 = vadd.f32 %v588_v62, %v560_v61  ;;  %v632_v31 = vmul.f32 %v596_v60, %v596_v60  ;;  %v613_v38 = vsel %vm603_vm1, %v596_v60, 0.0 }
  0xc4   : > { %671 = vst.msk [vmem:[%s1239_s28 + $0x14] sm:$0xf] %vm665_vm0, %v662_v63  ;;  %v659_v2 = vpack.c.bf16 %v589_v0, %v589_v0  ;;  %v629_v6 = vmul.f32 %v589_v0, %v589_v0  ;;  %v607_v12 = vsel %vm603_vm1, %v589_v0, 0.0  ;;  %v644_v44 = vsel %vm603_vm1, %v632_v31, 0.0 }
  0xc5   : > { %v569_v3 = vpop.f32.mrf.mxu2  ;;  %v608_v22 = vadd.f32 %v607_v12, %v606_v15 }
  0xc6   : > { %668 = vst.msk [vmem:[%s1239_s28 + $0x8] sm:$0xf] %vm665_vm0, %v659_v2  ;;  %v570_v7 = vadd.f32 %v1233_v40, %v569_v3  ;;  %v598_v8 = vpop.f32.mrf.mxu3  ;;  %v638_v18 = vsel %vm603_vm1, %v629_v6, 0.0 }
  0xc7   : > { %v561_v10 = vpop.f32.mrf.mxu0  ;;  %v639_v27 = vadd.f32 %v638_v18, %v637_v21 }
  0xc8   : > { %v599_v13 = vadd.f32 %v598_v8, %v570_v7  ;;  %v562_v14 = vadd.f32 %v1233_v40, %v561_v10  ;;  %v590_v16 = vpop.f32.mrf.mxu1 }
  0xca   : > { %v663_v19 = vpack.c.bf16 %v599_v13, %v599_v13  ;;  %v591_v20 = vadd.f32 %v590_v16, %v562_v14  ;;  %v633_v39 = vmul.f32 %v599_v13, %v599_v13  ;;  %v615_v45 = vsel %vm603_vm1, %v599_v13, 0.0 }
  0xcc   : > { %672 = vst.msk [vmem:[%s1239_s28 + $0x18] sm:$0xf] %vm665_vm0, %v663_v19  ;;  %v609_v24 = vsel %vm603_vm1, %v591_v20, 0.0  ;;  %v630_v25 = vmul.f32 %v591_v20, %v591_v20  ;;  %v660_v26 = vpack.c.bf16 %v591_v20, %v591_v20  ;;  %v646_v49 = vsel %vm603_vm1, %v633_v39, 0.0 }
  0xcd   : > { %v610_v28 = vadd.f32 %v609_v24, %v608_v22  ;;  %v571_v29 = vpop.f32.mrf.mxu2 }
  0xce   : > { %v640_v32 = vsel %vm603_vm1, %v630_v25, 0.0  ;;  %669 = vst.msk [vmem:[%s1239_s28 + $0xc] sm:$0xf] %vm665_vm0, %v660_v26  ;;  %v572_v33 = vadd.f32 %v1233_v40, %v571_v29  ;;  %v600_v36 = vpop.f32.mrf.mxu3 }
  0xcf   : > { %v612_v34 = vadd.f32 %v611_v30, %v610_v28  ;;  %v641_v35 = vadd.f32 %v640_v32, %v639_v27 }
  0xd0   : > { %v601_v41 = vadd.f32 %v600_v36, %v572_v33 }
  0xd1   : > { %v643_v42 = vadd.f32 %v642_v37, %v641_v35  ;;  %v614_v43 = vadd.f32 %v613_v38, %v612_v34 }
  0xd2   : > { %v634_v46 = vmul.f32 %v601_v41, %v601_v41  ;;  %v664_v40 = vpack.c.bf16 %v601_v41, %v601_v41  ;;  %v617_v50 = vsel %vm603_vm1, %v601_v41, 0.0 }
  0xd3   : > { %v616_v47 = vadd.f32 %v615_v45, %v614_v43  ;;  %v645_v48 = vadd.f32 %v644_v44, %v643_v42 }
  0xd4   : > { %673 = vst.msk [vmem:[%s1239_s28 + $0x1c] sm:$0xf] %vm665_vm0, %v664_v40  ;;  %v648_v53 = vsel %vm603_vm1, %v634_v46, 0.0 }
  0xd5   : > { %v618_v51 = vadd.f32 %v617_v50, %v616_v47  ;;  %v647_v52 = vadd.f32 %v646_v49, %v645_v48 }
  0xd7   : > { %v619_v54 = vrot.slane %v618_v51, 4  ;;  %v649_v55 = vadd.f32 %v648_v53, %v647_v52 }
  0xd9   : > { %v620_v56 = vadd.f32 %v619_v54, %v618_v51  ;;  %v650_v57 = vrot.slane %v649_v55, 4 }
  0xdb   : > { %v621_v58 = vrot.slane %v620_v56, 2  ;;  %v651_v59 = vadd.f32 %v650_v57, %v649_v55 }
  0xdd   : > { %v622_v60 = vadd.f32 %v621_v58, %v620_v56  ;;  %v652_v61 = vrot.slane %v651_v59, 2 }
  0xdf   : > { %v623_v62 = vrot.slane %v622_v60, 1  ;;  %v653_v63 = vadd.f32 %v652_v61, %v651_v59 }
  0xe1   : > { %v624_v0 = vadd.f32 %v623_v62, %v622_v60  ;;  %v654_v1 = vrot.slane %v653_v63, 1 }
  0xe3   : > { %626 = vst.msk [vmem:[%s352_s18] sm:$0x1] %vm625_vm2, %v624_v0  ;;  %v655_v2 = vadd.f32 %v654_v1, %v653_v63 }
  0xe5   : > { %656 = vst.msk [vmem:[%s361_s9] sm:$0x1] %vm625_vm2, %v655_v2 }
  0xe6 PF: > { %s16_s22 = sadd.s32 1, %s1109_s22   ;;  %s1309_s18 = smov %s1101_s20 }
  0xe7   : > { %p13_p8 = scmp.ge.s32.totalorder %s16_s22, 10   ;;  %s1310_s19 = smov %s1105_s21 }
  0xe8   : > { %s1311_s20 = smov %s1314_s23  ;;  %s1312_s21 = smov %s1318_s24 }
  0xe9   :  { %15 = sbr.rel (!%p13_p8) target bundleno = 3 (0x3), region = 89 }

// kernel: forward.25
= control target key start
LH: loop header
LB: loop body
LE: loop exit
PB: predicated region body
PF: predicated region fallthrough
CT: control target
= control target key end

     0   :  { %s1358_s18 = smov 0   ;;  %s1360_s19 = smov 0   ;;  %s1823_s0 = inlined_call_operand.vmem [shape: bf16[2,4,256,128], index: 0, kind: input, shape index: {}]   ;;  %s1824_s1 = inlined_call_operand.vmem [shape: bf16[4,128,8], index: 1, kind: input, shape index: {}]   ;;  %s1825_s2 = inlined_call_operand.vmem [shape: f32[1,8], index: 2, kind: input, shape index: {}]   ;;  %s1826_s3 = inlined_call_operand.vmem [shape: bf16[2,4,256,8], index: 3, kind: output, shape index: {0}]   ;;  %s1827_s4 = inlined_call_operand.vmem [shape: f32[8,1,8], index: 4, kind: output, shape index: {1}]   ;;  %s1828_s5 = inlined_call_operand.vmem [shape: f32[8,1,8], index: 5, kind: output, shape index: {2}]  }
   0x1   :  { %s1362_s20 = smov 0   ;;  %s1364_s21 = smov 0  }
   0x2   :  { %s1366_s22 = smov 0  }
   0x3 LB: > { %s31_s23 = sadd.s32 1, %s1318_s20  ;;  %s35_s24 = sadd.s32 1, %s1322_s21  ;;  %s1326_s22 = sphi %s1366_s22, %s16_s22   ;;  %s1322_s21 = sphi %s1364_s21, %s1832_s21   ;;  %s1318_s20 = sphi %s1362_s20, %s1831_s20   ;;  %s1314_s19 = sphi %s1360_s19, %s1830_s19   ;;  %s1310_s18 = sphi %s1358_s18, %s1829_s18  }
   0x4   : > { %p33_p0 = scmp.ge.s32.totalorder %s31_s23, 4  ;;  %p1089_p1 = scmp.ge.s32.totalorder %s1326_s22, 1 }
   0x5   : > { %p250_p2 = scmp.lt.s32.totalorder %s1326_s22, 9 }
   0x6   : > { %s1834_s23 = smov (%p33_p0, %s31_s23), 0  ;;  %s1836_s24 = smov (!%p33_p0, %s35_s24), %s1322_s21 }
   0x7   : > { %p251_p3 = pnand %p1089_p1, %p250_p2  ;;  %p37_p4 = scmp.ge.s32.totalorder %s1836_s24, 2 }
   0x8   : > { %p314_p5 = scmp.lt.s32.totalorder (!%p251_p3), %s1310_s18, 3  ;;  %p312_p6 = scmp.lt.s32.totalorder (!%p251_p3), %s1314_s19, 1 }
   0x9   : > { %s1838_s24 = smov (%p37_p4, %s1836_s24), 0  ;;  %254 = sbr.rel (%p251_p3) target bundleno = 300 (0x12c), region = 32 }
   0xe   : > { %s1394_s25 = scalar_select %p314_p5, %s1310_s18, 3  ;;  %v1442_v24 = vld [vmem:[%s1825_s2] ss:$0 sm:$0xff]  ;;  %vm853_vm0 = vcmask 60416   ;;  %vm647_vm1 = vcmask 64512   ;;  %vm717_vm2 = vcmask 57344  }
   0xf   : > { %s313_s30 = scalar_select %p312_p6, %s1314_s19, 1 }
  0x10   : > { %s1198_s26 = sshll.u32 %s1394_s25, 6  ;;  %s1090_s6 = sshll.u32 %s1394_s25, 5 }
  0x11   : > { %s1400_s29 = scalar_lea.vmem %s1824_s1, %s1198_s26  ;;  %s1091_s7 = sshll.u32 %s313_s30, 7 }
  0x12   : > { %v1222_v0 = vld [vmem:[%s1400_s29 + $0x38] sm:$0xff]  ;;  %v1221_v1 = vld [vmem:[%s1400_s29 + $0x30] sm:$0xff]  ;;  %v1220_v2 = vld [vmem:[%s1400_s29 + $0x28] sm:$0xff]  ;;  %s1411_s8 = sadd.s32 %s1091_s7, %s1090_s6  ;;  %s1098_s25 = sshll.u32 %s1314_s19, 2 }
  0x13   : > { %558 = vmatpush.bf16.msra.mxu0 %v1222_v0  ;;  %1223 = vmatpush.bf16.msra.mxu1 %v1222_v0  ;;  %v1219_v3 = vld [vmem:[%s1400_s29 + $0x20] sm:$0xff]  ;;  %v1218_v4 = vld [vmem:[%s1400_s29 + $0x18] sm:$0xff]  ;;  %v1217_v5 = vld [vmem:[%s1400_s29 + $0x10] sm:$0xff]  ;;  %s1092_s9 = sshll.u32 %s1411_s8, 2  ;;  %s345_s26 = sadd.s32 %s1310_s18, %s1098_s25 }
  0x14   : > { %1224 = vmatpush.bf16.msra.mxu2 %v1222_v0  ;;  %1225 = vmatpush.bf16.msra.mxu3 %v1222_v0  ;;  %v1216_v6 = vld [vmem:[%s1400_s29 + $0x8] sm:$0xff]  ;;  %s1420_s12 = scalar_lea.vmem %s1823_s0, %s1092_s9  ;;  %v1215_v7 = vld [vmem:[%s1400_s29] sm:$0xff]  ;;  %s1455_s17 = scalar_lea.vmem %s1826_s3, %s1092_s9 }
  0x15   : > { %v1199_v8 = vld [vmem:[%s1420_s12] sm:$0xff]  ;;  %v1200_v12 = vld [vmem:[%s1420_s12 + $0x8] sm:$0xff]  ;;  %v1201_v16 = vld [vmem:[%s1420_s12 + $0x10] sm:$0xff]  ;;  %p347_p7 = scmp.lt.s32.totalorder %s345_s26, 7 }
  0x16   : > { %v1203_v9 = vld [vmem:[%s1420_s12 + $0x20] sm:$0xff]  ;;  %v1204_v13 = vld [vmem:[%s1420_s12 + $0x28] sm:$0xff]  ;;  %v1205_v17 = vld [vmem:[%s1420_s12 + $0x30] sm:$0xff] }
  0x17   : > { %559 = vmatpush.bf16.msra.mxu0 %v1221_v1  ;;  %1226 = vmatpush.bf16.msra.mxu1 %v1221_v1  ;;  %v1207_v10 = vld [vmem:[%s1420_s12 + $0x40] sm:$0xff]  ;;  %v1208_v14 = vld [vmem:[%s1420_s12 + $0x48] sm:$0xff]  ;;  %v1209_v18 = vld [vmem:[%s1420_s12 + $0x50] sm:$0xff]  ;;  %s1840_s26 = smov (!%p347_p7, %s345_s26), 7 }
  0x18   : > { %1227 = vmatpush.bf16.msra.mxu2 %v1221_v1  ;;  %1228 = vmatpush.bf16.msra.mxu3 %v1221_v1  ;;  %v1211_v11 = vld [vmem:[%s1420_s12 + $0x60] sm:$0xff]  ;;  %v1212_v15 = vld [vmem:[%s1420_s12 + $0x68] sm:$0xff]  ;;  %v1213_v19 = vld [vmem:[%s1420_s12 + $0x70] sm:$0xff]  ;;  %s349_s28 = scalar_lea.vmem %s1827_s4, %s1840_s26  ;;  %s358_s30 = scalar_lea.vmem %s1828_s5, %s1840_s26 }
  0x19   : > { %v1202_v20 = vld [vmem:[%s1420_s12 + $0x18] sm:$0xff] }
  0x1a   : > { %v1206_v21 = vld [vmem:[%s1420_s12 + $0x38] sm:$0xff] }
  0x1b   : > { %560 = vmatpush.bf16.msra.mxu0 %v1220_v2  ;;  %1229 = vmatpush.bf16.msra.mxu1 %v1220_v2  ;;  %v1210_v22 = vld [vmem:[%s1420_s12 + $0x58] sm:$0xff] }
  0x1c   : > { %1230 = vmatpush.bf16.msra.mxu2 %v1220_v2  ;;  %1231 = vmatpush.bf16.msra.mxu3 %v1220_v2  ;;  %v1214_v23 = vld [vmem:[%s1420_s12 + $0x78] sm:$0xff] }
  0x1f   : > { %561 = vmatpush.bf16.msra.mxu0 %v1219_v3  ;;  %1232 = vmatpush.bf16.msra.mxu1 %v1219_v3 }
  0x20   : > { %1233 = vmatpush.bf16.msra.mxu2 %v1219_v3  ;;  %1234 = vmatpush.bf16.msra.mxu3 %v1219_v3 }
  0x23   : > { %562 = vmatpush.bf16.msra.mxu0 %v1218_v4  ;;  %1235 = vmatpush.bf16.msra.mxu1 %v1218_v4 }
  0x24   : > { %1236 = vmatpush.bf16.msra.mxu2 %v1218_v4  ;;  %1237 = vmatpush.bf16.msra.mxu3 %v1218_v4 }
  0x27   : > { %563 = vmatpush.bf16.msra.mxu0 %v1217_v5  ;;  %1238 = vmatpush.bf16.msra.mxu1 %v1217_v5 }
  0x28   : > { %1239 = vmatpush.bf16.msra.mxu2 %v1217_v5  ;;  %1240 = vmatpush.bf16.msra.mxu3 %v1217_v5 }
  0x2b   : > { %564 = vmatpush.bf16.msra.mxu0 %v1216_v6  ;;  %1241 = vmatpush.bf16.msra.mxu1 %v1216_v6 }
  0x2c   : > { %1242 = vmatpush.bf16.msra.mxu2 %v1216_v6  ;;  %1243 = vmatpush.bf16.msra.mxu3 %v1216_v6 }
  0x2f   : > { %565 = vmatpush.bf16.msra.mxu0 %v1215_v7  ;;  %1244 = vmatpush.bf16.msra.mxu1 %v1215_v7 }
  0x30   : > { %1245 = vmatpush.bf16.msra.mxu2 %v1215_v7  ;;  %1246 = vmatpush.bf16.msra.mxu3 %v1215_v7 }
  0x32   : > { %566 = vmatmul.bf16.vlgmr.msra.gmra.mxu0 %v1199_v8  ;;  %586 = vmatmul.bf16.vlgmr.msra.gmra.mxu1 %v1203_v9 }
  0x33   : > { %606 = vmatmul.bf16.vlgmr.msra.gmra.mxu2 %v1207_v10  ;;  %626 = vmatmul.bf16.vlgmr.msra.gmra.mxu3 %v1211_v11 }
  0x42   : > { %571 = vmatmul.bf16.gmra.mxu0 %v1200_v12  ;;  %591 = vmatmul.bf16.gmra.mxu1 %v1204_v13 }
  0x43   : > { %611 = vmatmul.bf16.gmra.mxu2 %v1208_v14  ;;  %631 = vmatmul.bf16.gmra.mxu3 %v1212_v15 }
  0x52   : > { %576 = vmatmul.bf16.gmra.mxu0 %v1201_v16  ;;  %596 = vmatmul.bf16.gmra.mxu1 %v1205_v17 }
  0x53   : > { %616 = vmatmul.bf16.gmra.mxu2 %v1209_v18  ;;  %636 = vmatmul.bf16.gmra.mxu3 %v1213_v19 }
  0x62   : > { %581 = vmatmul.bf16.gmra.mxu0 %v1202_v20  ;;  %601 = vmatmul.bf16.gmra.mxu1 %v1206_v21 }
  0x63   : > { %621 = vmatmul.bf16.gmra.mxu2 %v1210_v22  ;;  %641 = vmatmul.bf16.gmra.mxu3 %v1214_v23 }
  0xaf   : > { %v567_v25 = vpop.f32.mrf.mxu0  ;;  %v587_v26 = vpop.f32.mrf.mxu1 }
  0xb0   : > { %v1445_v27 = vadd.f32 %v1442_v24, %v567_v25  ;;  %v1448_v28 = vadd.f32 %v1442_v24, %v587_v26 }
  0xb2   : > { %v821_v29 = vpack.c.bf16 %v1445_v27, %v1445_v27  ;;  %v829_v30 = vpack.c.bf16 %v1448_v28, %v1448_v28  ;;  %v719_v23 = vmul.f32 %v1445_v27, %v1445_v27 }
  0xb4   : > { %854 = vst.msk [vmem:[%s1455_s17] sm:$0xf] %vm853_vm0, %v821_v29 }
  0xb5   : > { %862 = vst.msk [vmem:[%s1455_s17 + $0x20] sm:$0xf] %vm853_vm0, %v829_v30 }
  0xb6   : > { %v607_v31 = vpop.f32.mrf.mxu2  ;;  %v627_v37 = vpop.f32.mrf.mxu3 }
  0xb7   : > { %v569_v32 = vpop.f32.mrf.mxu0  ;;  %v589_v33 = vpop.f32.mrf.mxu1  ;;  %v1466_v34 = vadd.f32 %v1442_v24, %v607_v31  ;;  %v1487_v41 = vadd.f32 %v1442_v24, %v627_v37  ;;  %v751_v37 = vsel %vm647_vm1, %v719_v23, 0.0 }
  0xb8   : > { %v1469_v35 = vadd.f32 %v1442_v24, %v569_v32  ;;  %v1472_v36 = vadd.f32 %v1442_v24, %v589_v33  ;;  %v648_v33 = vsel %vm647_vm1, %v1445_v27, 0.0 }
  0xb9   : > { %v837_v38 = vpack.c.bf16 %v1466_v34, %v1466_v34  ;;  %v845_v46 = vpack.c.bf16 %v1487_v41, %v1487_v41 }
  0xba   : > { %v822_v39 = vpack.c.bf16 %v1469_v35, %v1469_v35  ;;  %v830_v40 = vpack.c.bf16 %v1472_v36, %v1472_v36  ;;  %v720_v25 = vmul.f32 %v1469_v35, %v1469_v35  ;;  %v649_v31 = vsel %vm647_vm1, %v1469_v35, 0.0 }
  0xbb   : > { %870 = vst.msk [vmem:[%s1455_s17 + $0x40] sm:$0xf] %vm853_vm0, %v837_v38 }
  0xbc   : > { %855 = vst.msk [vmem:[%s1455_s17 + $0x4] sm:$0xf] %vm853_vm0, %v822_v39  ;;  %v752_v38 = vsel %vm647_vm1, %v720_v25, 0.0 }
  0xbd   : > { %863 = vst.msk [vmem:[%s1455_s17 + $0x24] sm:$0xf] %vm853_vm0, %v830_v40 }
  0xbe   : > { %v609_v42 = vpop.f32.mrf.mxu2  ;;  %v629_v49 = vpop.f32.mrf.mxu3  ;;  %878 = vst.msk [vmem:[%s1455_s17 + $0x60] sm:$0xf] %vm853_vm0, %v845_v46 }
  0xbf   : > { %v572_v43 = vpop.f32.mrf.mxu0  ;;  %v592_v44 = vpop.f32.mrf.mxu1  ;;  %v1490_v45 = vadd.f32 %v1442_v24, %v609_v42  ;;  %v1513_v53 = vadd.f32 %v1442_v24, %v629_v49  ;;  %v650_v42 = vadd.f32 %v649_v31, %v648_v33 }
  0xc0   : > { %v1495_v47 = vadd.f32 %v1442_v24, %v572_v43  ;;  %v1498_v48 = vadd.f32 %v1442_v24, %v592_v44 }
  0xc1   : > { %v838_v50 = vpack.c.bf16 %v1490_v45, %v1490_v45  ;;  %v846_v55 = vpack.c.bf16 %v1513_v53, %v1513_v53 }
  0xc2   : > { %v823_v51 = vpack.c.bf16 %v1495_v47, %v1495_v47  ;;  %v831_v52 = vpack.c.bf16 %v1498_v48, %v1498_v48  ;;  %v721_v29 = vmul.f32 %v1495_v47, %v1495_v47  ;;  %v651_v39 = vsel %vm647_vm1, %v1495_v47, 0.0 }
  0xc3   : > { %871 = vst.msk [vmem:[%s1455_s17 + $0x44] sm:$0xf] %vm853_vm0, %v838_v50 }
  0xc4   : > { %856 = vst.msk [vmem:[%s1455_s17 + $0x8] sm:$0xf] %vm853_vm0, %v823_v51  ;;  %v754_v43 = vsel %vm647_vm1, %v721_v29, 0.0 }
  0xc5   : > { %864 = vst.msk [vmem:[%s1455_s17 + $0x28] sm:$0xf] %vm853_vm0, %v831_v52 }
  0xc6   : > { %v612_v54 = vpop.f32.mrf.mxu2  ;;  %879 = vst.msk [vmem:[%s1455_s17 + $0x64] sm:$0xf] %vm853_vm0, %v846_v55  ;;  %v632_v61 = vpop.f32.mrf.mxu3  ;;  %v652_v55 = vadd.f32 %v651_v39, %v650_v42 }
  0xc7   : > { %v574_v56 = vpop.f32.mrf.mxu0  ;;  %v594_v57 = vpop.f32.mrf.mxu1  ;;  %v1520_v58 = vadd.f32 %v1442_v24, %v612_v54  ;;  %v1546_v7 = vadd.f32 %v1442_v24, %v632_v61  ;;  %v753_v54 = vadd.f32 %v752_v38, %v751_v37  ;;  %v727_v37 = vmul.f32 %v1448_v28, %v1448_v28 }
  0xc8   : > { %v575_v59 = vadd.f32 %v1442_v24, %v574_v56  ;;  %v1524_v60 = vadd.f32 %v1442_v24, %v594_v57 }
  0xc9   : > { %v839_v62 = vpack.c.bf16 %v1520_v58, %v1520_v58  ;;  %v847_v13 = vpack.c.bf16 %v1546_v7, %v1546_v7 }
  0xca   : > { %v824_v63 = vpack.c.bf16 %v575_v59, %v575_v59  ;;  %v832_v0 = vpack.c.bf16 %v1524_v60, %v1524_v60  ;;  %v722_v32 = vmul.f32 %v575_v59, %v575_v59  ;;  %v653_v35 = vsel %vm647_vm1, %v575_v59, 0.0 }
  0xcb   : > { %872 = vst.msk [vmem:[%s1455_s17 + $0x48] sm:$0xf] %vm853_vm0, %v839_v62 }
  0xcc   : > { %857 = vst.msk [vmem:[%s1455_s17 + $0xc] sm:$0xf] %vm853_vm0, %v824_v63  ;;  %v756_v56 = vsel %vm647_vm1, %v722_v32, 0.0 }
  0xcd   : > { %865 = vst.msk [vmem:[%s1455_s17 + $0x2c] sm:$0xf] %vm853_vm0, %v832_v0  ;;  %v755_v0 = vadd.f32 %v754_v43, %v753_v54 }
  0xce   : > { %v614_v1 = vpop.f32.mrf.mxu2  ;;  %v634_v8 = vpop.f32.mrf.mxu3  ;;  %880 = vst.msk [vmem:[%s1455_s17 + $0x68] sm:$0xf] %vm853_vm0, %v847_v13 }
  0xcf   : > { %v577_v2 = vpop.f32.mrf.mxu0  ;;  %v597_v3 = vpop.f32.mrf.mxu1  ;;  %v1539_v4 = vadd.f32 %v1442_v24, %v614_v1  ;;  %v1551_v11 = vadd.f32 %v1442_v24, %v634_v8  ;;  %v654_v1 = vadd.f32 %v653_v35, %v652_v55  ;;  %v766_v55 = vsel %vm647_vm1, %v727_v37, 0.0 }
  0xd0   : > { %v578_v5 = vadd.f32 %v1442_v24, %v577_v2  ;;  %v1543_v6 = vadd.f32 %v1442_v24, %v597_v3 }
  0xd1   : > { %v840_v9 = vpack.c.bf16 %v1539_v4, %v1539_v4  ;;  %v848_v15 = vpack.c.bf16 %v1551_v11, %v1551_v11 }
  0xd2   : > { %v825_v10 = vpack.c.bf16 %v578_v5, %v578_v5  ;;  %v833_v12 = vpack.c.bf16 %v1543_v6, %v1543_v6  ;;  %v723_v50 = vmul.f32 %v578_v5, %v578_v5  ;;  %v655_v59 = vsel %vm647_vm1, %v578_v5, 0.0 }
  0xd3   : > { %873 = vst.msk [vmem:[%s1455_s17 + $0x4c] sm:$0xf] %vm853_vm0, %v840_v9 }
  0xd4   : > { %858 = vst.msk [vmem:[%s1455_s17 + $0x10] sm:$0xf] %vm853_vm0, %v825_v10  ;;  %v758_v3 = vsel %vm647_vm1, %v723_v50, 0.0  ;;  %v757_v10 = vadd.f32 %v756_v56, %v755_v0  ;;  %v665_v56 = vsel %vm647_vm1, %v1472_v36, 0.0  ;;  %v667_v0 = vsel %vm647_vm1, %v1498_v48, 0.0 }
  0xd5   : > { %866 = vst.msk [vmem:[%s1455_s17 + $0x30] sm:$0xf] %vm853_vm0, %v833_v12  ;;  %v656_v12 = vadd.f32 %v655_v59, %v654_v1  ;;  %v730_v1 = vmul.f32 %v1524_v60, %v1524_v60 }
  0xd6   : > { %v617_v14 = vpop.f32.mrf.mxu2  ;;  %881 = vst.msk [vmem:[%s1455_s17 + $0x6c] sm:$0xf] %vm853_vm0, %v848_v15  ;;  %v637_v21 = vpop.f32.mrf.mxu3 }
  0xd7   : > { %v579_v16 = vpop.f32.mrf.mxu0  ;;  %v599_v17 = vpop.f32.mrf.mxu1  ;;  %v1568_v18 = vadd.f32 %v1442_v24, %v617_v14  ;;  %v1610_v47 = vadd.f32 %v1442_v24, %v637_v21 }
  0xd8   : > { %v580_v19 = vadd.f32 %v1442_v24, %v579_v16  ;;  %v1572_v20 = vadd.f32 %v1442_v24, %v599_v17  ;;  %v759_v17 = vadd.f32 %v758_v3, %v757_v10  ;;  %v731_v10 = vmul.f32 %v1543_v6, %v1543_v6 }
  0xd9   : > { %v841_v22 = vpack.c.bf16 %v1568_v18, %v1568_v18  ;;  %v849_v5 = vpack.c.bf16 %v1610_v47, %v1610_v47 }
  0xda   : > { %v826_v26 = vpack.c.bf16 %v580_v19, %v580_v19  ;;  %v834_v30 = vpack.c.bf16 %v1572_v20, %v1572_v20  ;;  %v724_v61 = vmul.f32 %v580_v19, %v580_v19  ;;  %v657_v8 = vsel %vm647_vm1, %v580_v19, 0.0 }
  0xdb   : > { %874 = vst.msk [vmem:[%s1455_s17 + $0x50] sm:$0xf] %vm853_vm0, %v841_v22  ;;  %v658_v19 = vadd.f32 %v657_v8, %v656_v12 }
  0xdc   : > { %859 = vst.msk [vmem:[%s1455_s17 + $0x14] sm:$0xf] %vm853_vm0, %v826_v26  ;;  %v760_v13 = vsel %vm647_vm1, %v724_v61, 0.0 }
  0xdd   : > { %867 = vst.msk [vmem:[%s1455_s17 + $0x34] sm:$0xf] %vm853_vm0, %v834_v30  ;;  %v761_v31 = vadd.f32 %v760_v13, %v759_v17  ;;  %v732_v17 = vmul.f32 %v1572_v20, %v1572_v20 }
  0xde   : > { %v619_v40 = vpop.f32.mrf.mxu2  ;;  %v639_v52 = vpop.f32.mrf.mxu3  ;;  %882 = vst.msk [vmem:[%s1455_s17 + $0x70] sm:$0xf] %vm853_vm0, %v849_v5  ;;  %v669_v5 = vsel %vm647_vm1, %v1524_v60, 0.0  ;;  %v671_v60 = vsel %vm647_vm1, %v1543_v6, 0.0 }
  0xdf   : > { %v582_v44 = vpop.f32.mrf.mxu0  ;;  %v602_v46 = vpop.f32.mrf.mxu1  ;;  %v1603_v49 = vadd.f32 %v1442_v24, %v619_v40  ;;  %v1617_v63 = vadd.f32 %v1442_v24, %v639_v52 }
  0xe0   : > { %v583_v27 = vadd.f32 %v1442_v24, %v582_v44  ;;  %v1607_v51 = vadd.f32 %v1442_v24, %v602_v46  ;;  %v663_v44 = vsel %vm647_vm1, %v1448_v28, 0.0  ;;  %v728_v46 = vmul.f32 %v1472_v36, %v1472_v36 }
  0xe1   : > { %v842_v57 = vpack.c.bf16 %v1603_v49, %v1603_v49  ;;  %v850_v16 = vpack.c.bf16 %v1617_v63, %v1617_v63 }
  0xe2   : > { %v827_v62 = vpack.c.bf16 %v583_v27, %v583_v27  ;;  %v835_v2 = vpack.c.bf16 %v1607_v51, %v1607_v51  ;;  %v725_v9 = vmul.f32 %v583_v27, %v583_v27  ;;  %v659_v14 = vsel %vm647_vm1, %v583_v27, 0.0 }
  0xe3   : > { %875 = vst.msk [vmem:[%s1455_s17 + $0x54] sm:$0xf] %vm853_vm0, %v842_v57  ;;  %v660_v32 = vadd.f32 %v659_v14, %v658_v19  ;;  %v729_v27 = vmul.f32 %v1498_v48, %v1498_v48 }
  0xe4   : > { %860 = vst.msk [vmem:[%s1455_s17 + $0x18] sm:$0xf] %vm853_vm0, %v827_v62  ;;  %v762_v25 = vsel %vm647_vm1, %v725_v9, 0.0  ;;  %v768_v62 = vsel %vm647_vm1, %v728_v46, 0.0 }
  0xe5   : > { %868 = vst.msk [vmem:[%s1455_s17 + $0x38] sm:$0xf] %vm853_vm0, %v835_v2  ;;  %v763_v42 = vadd.f32 %v762_v25, %v761_v31  ;;  %v770_v36 = vsel %vm647_vm1, %v729_v27, 0.0  ;;  %v733_v25 = vmul.f32 %v1607_v51, %v1607_v51  ;;  %v776_v31 = vsel %vm647_vm1, %v732_v17, 0.0 }
  0xe6   : > { %v622_v15 = vpop.f32.mrf.mxu2  ;;  %883 = vst.msk [vmem:[%s1455_s17 + $0x74] sm:$0xf] %vm853_vm0, %v850_v16  ;;  %v642_v30 = vpop.f32.mrf.mxu3  ;;  %v772_v16 = vsel %vm647_vm1, %v730_v1, 0.0 }
  0xe7   : > { %v584_v21 = vpop.f32.mrf.mxu0  ;;  %v604_v22 = vpop.f32.mrf.mxu1  ;;  %v1638_v23 = vadd.f32 %v1442_v24, %v622_v15  ;;  %v1679_v2 = vadd.f32 %v1442_v24, %v642_v30 }
  0xe8   : > { %v585_v26 = vadd.f32 %v1442_v24, %v584_v21  ;;  %v1643_v29 = vadd.f32 %v1442_v24, %v604_v22  ;;  %v774_v22 = vsel %vm647_vm1, %v731_v10, 0.0 }
  0xe9   : > { %v843_v33 = vpack.c.bf16 %v1638_v23, %v1638_v23  ;;  %v851_v12 = vpack.c.bf16 %v1679_v2, %v1679_v2 }
  0xea   : > { %v661_v38 = vsel %vm647_vm1, %v585_v26, 0.0  ;;  %v726_v39 = vmul.f32 %v585_v26, %v585_v26  ;;  %v828_v40 = vpack.c.bf16 %v585_v26, %v585_v26  ;;  %v836_v35 = vpack.c.bf16 %v1643_v29, %v1643_v29 }
  0xeb   : > { %v662_v43 = vadd.f32 %v661_v38, %v660_v32  ;;  %876 = vst.msk [vmem:[%s1455_s17 + $0x58] sm:$0xf] %vm853_vm0, %v843_v33  ;;  %v675_v32 = vsel %vm647_vm1, %v1607_v51, 0.0  ;;  %v734_v33 = vmul.f32 %v1643_v29, %v1643_v29  ;;  %v735_v38 = vmul.f32 %v1466_v34, %v1466_v34 }
  0xec   : > { %v764_v50 = vsel %vm647_vm1, %v726_v39, 0.0  ;;  %861 = vst.msk [vmem:[%s1455_s17 + $0x1c] sm:$0xf] %vm853_vm0, %v828_v40  ;;  %v778_v39 = vsel %vm647_vm1, %v733_v25, 0.0  ;;  %v677_v40 = vsel %vm647_vm1, %v1643_v29, 0.0  ;;  %v679_v51 = vsel %vm647_vm1, %v1466_v34, 0.0 }
  0xed   : > { %v664_v52 = vadd.f32 %v663_v44, %v662_v43  ;;  %v765_v54 = vadd.f32 %v764_v50, %v763_v42  ;;  %869 = vst.msk [vmem:[%s1455_s17 + $0x3c] sm:$0xf] %vm853_vm0, %v836_v35  ;;  %v736_v35 = vmul.f32 %v1490_v45, %v1490_v45  ;;  %v780_v44 = vsel %vm647_vm1, %v734_v33, 0.0 }
  0xee   : > { %v624_v28 = vpop.f32.mrf.mxu2  ;;  %v644_v3 = vpop.f32.mrf.mxu3  ;;  %884 = vst.msk [vmem:[%s1455_s17 + $0x78] sm:$0xf] %vm853_vm0, %v851_v12  ;;  %v782_v27 = vsel %vm647_vm1, %v735_v38, 0.0  ;;  %v737_v29 = vmul.f32 %v1520_v58, %v1520_v58  ;;  %v683_v34 = vsel %vm647_vm1, %v1520_v58, 0.0  ;;  %v687_v58 = vsel %vm647_vm1, %v1568_v18, 0.0 }
  0xef   : > { %v666_v57 = vadd.f32 %v665_v56, %v664_v52  ;;  %v767_v59 = vadd.f32 %v766_v55, %v765_v54  ;;  %v1671_v61 = vadd.f32 %v1442_v24, %v624_v28  ;;  %v1691_v15 = vadd.f32 %v1442_v24, %v644_v3 }
  0xf0   : > { %v673_v24 = vsel %vm647_vm1, %v1572_v20, 0.0  ;;  %v681_v52 = vsel %vm647_vm1, %v1490_v45, 0.0  ;;  %v784_v56 = vsel %vm647_vm1, %v736_v35, 0.0  ;;  %v738_v28 = vmul.f32 %v1539_v4, %v1539_v4 }
  0xf1   : > { %v668_v8 = vadd.f32 %v667_v0, %v666_v57  ;;  %v769_v9 = vadd.f32 %v768_v62, %v767_v59  ;;  %v844_v48 = vpack.c.bf16 %v1671_v61, %v1671_v61  ;;  %v852_v6 = vpack.c.bf16 %v1691_v15, %v1691_v15 }
  0xf2   : > { %v786_v62 = vsel %vm647_vm1, %v737_v29, 0.0  ;;  %v685_v45 = vsel %vm647_vm1, %v1539_v4, 0.0  ;;  %v739_v0 = vmul.f32 %v1568_v18, %v1568_v18  ;;  %v689_v4 = vsel %vm647_vm1, %v1603_v49, 0.0 }
  0xf3   : > { %v771_v13 = vadd.f32 %v770_v36, %v769_v9  ;;  %v670_v14 = vadd.f32 %v669_v5, %v668_v8  ;;  %877 = vst.msk [vmem:[%s1455_s17 + $0x5c] sm:$0xf] %vm853_vm0, %v844_v48  ;;  %v788_v36 = vsel %vm647_vm1, %v738_v28, 0.0  ;;  %v740_v8 = vmul.f32 %v1603_v49, %v1603_v49 }
  0xf4   : > { %885 = vst.msk [vmem:[%s1455_s17 + $0x7c] sm:$0xf] %vm853_vm0, %v852_v6  ;;  %v790_v10 = vsel %vm647_vm1, %v739_v0, 0.0  ;;  %v741_v48 = vmul.f32 %v1638_v23, %v1638_v23  ;;  %v691_v18 = vsel %vm647_vm1, %v1638_v23, 0.0  ;;  %v695_v25 = vsel %vm647_vm1, %v1487_v41, 0.0 }
  0xf5   : > { %v672_v19 = vadd.f32 %v671_v60, %v670_v14  ;;  %v773_v21 = vadd.f32 %v772_v16, %v771_v13  ;;  %v792_v14 = vsel %vm647_vm1, %v740_v8, 0.0  ;;  %v742_v16 = vmul.f32 %v1671_v61, %v1671_v61 }
  0xf6   : > { %v794_v49 = vsel %vm647_vm1, %v741_v48, 0.0  ;;  %v744_v23 = vmul.f32 %v1513_v53, %v1513_v53  ;;  %v746_v38 = vmul.f32 %v1551_v11, %v1551_v11  ;;  %v749_v29 = vmul.f32 %v1679_v2, %v1679_v2 }
  0xf7   : > { %v674_v26 = vadd.f32 %v673_v24, %v672_v19  ;;  %v775_v30 = vadd.f32 %v774_v22, %v773_v21  ;;  %v743_v19 = vmul.f32 %v1487_v41, %v1487_v41  ;;  %v693_v21 = vsel %vm647_vm1, %v1671_v61, 0.0 }
  0xf8   : > { %v796_v6 = vsel %vm647_vm1, %v742_v16, 0.0  ;;  %v745_v61 = vmul.f32 %v1546_v7, %v1546_v7  ;;  %v699_v41 = vsel %vm647_vm1, %v1546_v7, 0.0  ;;  %v703_v7 = vsel %vm647_vm1, %v1610_v47, 0.0 }
  0xf9   : > { %v676_v37 = vadd.f32 %v675_v32, %v674_v26  ;;  %v777_v20 = vadd.f32 %v776_v31, %v775_v30  ;;  %v798_v31 = vsel %vm647_vm1, %v743_v19, 0.0  ;;  %v697_v32 = vsel %vm647_vm1, %v1513_v53, 0.0 }
  0xfa   : > { %v701_v53 = vsel %vm647_vm1, %v1551_v11, 0.0  ;;  %v705_v11 = vsel %vm647_vm1, %v1617_v63, 0.0 }
  0xfb   : > { %v779_v42 = vadd.f32 %v778_v39, %v777_v20  ;;  %v678_v43 = vadd.f32 %v677_v40, %v676_v37  ;;  %v800_v20 = vsel %vm647_vm1, %v744_v23, 0.0 }
  0xfd   : > { %v680_v46 = vadd.f32 %v679_v51, %v678_v43  ;;  %v781_v50 = vadd.f32 %v780_v44, %v779_v42  ;;  %v802_v42 = vsel %vm647_vm1, %v745_v61, 0.0  ;;  %v747_v43 = vmul.f32 %v1610_v47, %v1610_v47 }
  0xfe   : > { %v804_v44 = vsel %vm647_vm1, %v746_v38, 0.0  ;;  %v707_v47 = vsel %vm647_vm1, %v1679_v2, 0.0 }
  0xff   : > { %v682_v54 = vadd.f32 %v681_v52, %v680_v46  ;;  %v783_v55 = vadd.f32 %v782_v27, %v781_v50  ;;  %v748_v46 = vmul.f32 %v1617_v63, %v1617_v63  ;;  %v806_v52 = vsel %vm647_vm1, %v747_v43, 0.0 }
 0x100   : > { %v709_v63 = vsel %vm647_vm1, %v1691_v15, 0.0 }
 0x101   : > { %v785_v57 = vadd.f32 %v784_v56, %v783_v55  ;;  %v684_v59 = vadd.f32 %v683_v34, %v682_v54  ;;  %v808_v56 = vsel %vm647_vm1, %v748_v46, 0.0  ;;  %v750_v34 = vmul.f32 %v1691_v15, %v1691_v15 }
 0x103   : > { %v686_v1 = vadd.f32 %v685_v45, %v684_v59  ;;  %v787_v3 = vadd.f32 %v786_v62, %v785_v57  ;;  %v810_v59 = vsel %vm647_vm1, %v749_v29, 0.0  ;;  %v812_v0 = vsel %vm647_vm1, %v750_v34, 0.0 }
 0x105   : > { %v688_v9 = vadd.f32 %v687_v58, %v686_v1  ;;  %v789_v5 = vadd.f32 %v788_v36, %v787_v3 }
 0x107   : > { %v690_v12 = vadd.f32 %v689_v4, %v688_v9  ;;  %v791_v13 = vadd.f32 %v790_v10, %v789_v5 }
 0x109   : > { %v793_v60 = vadd.f32 %v792_v14, %v791_v13  ;;  %v692_v17 = vadd.f32 %v691_v18, %v690_v12 }
 0x10b   : > { %v795_v22 = vadd.f32 %v794_v49, %v793_v60  ;;  %v694_v24 = vadd.f32 %v693_v21, %v692_v17 }
 0x10d   : > { %v696_v26 = vadd.f32 %v695_v25, %v694_v24  ;;  %v797_v30 = vadd.f32 %v796_v6, %v795_v22 }
 0x10f   : > { %v698_v33 = vadd.f32 %v697_v32, %v696_v26  ;;  %v799_v37 = vadd.f32 %v798_v31, %v797_v30 }
 0x111   : > { %v801_v39 = vadd.f32 %v800_v20, %v799_v37  ;;  %v700_v40 = vadd.f32 %v699_v41, %v698_v33 }
 0x113   : > { %v702_v51 = vadd.f32 %v701_v53, %v700_v40  ;;  %v803_v35 = vadd.f32 %v802_v42, %v801_v39 }
 0x115   : > { %v704_v50 = vadd.f32 %v703_v7, %v702_v51  ;;  %v805_v27 = vadd.f32 %v804_v44, %v803_v35 }
 0x117   : > { %v706_v54 = vadd.f32 %v705_v11, %v704_v50  ;;  %v807_v55 = vadd.f32 %v806_v52, %v805_v27 }
 0x119   : > { %v809_v28 = vadd.f32 %v808_v56, %v807_v55  ;;  %v708_v57 = vadd.f32 %v707_v47, %v706_v54 }
 0x11b   : > { %v811_v62 = vadd.f32 %v810_v59, %v809_v28  ;;  %v710_v45 = vadd.f32 %v709_v63, %v708_v57 }
 0x11d   : > { %v711_v1 = vrot.slane %v710_v45, 4  ;;  %v813_v3 = vadd.f32 %v812_v0, %v811_v62 }
 0x11f   : > { %v712_v2 = vadd.f32 %v711_v1, %v710_v45  ;;  %v814_v36 = vrot.slane %v813_v3, 4 }
 0x121   : > { %v713_v58 = vrot.slane %v712_v2, 2  ;;  %v815_v8 = vadd.f32 %v814_v36, %v813_v3 }
 0x123   : > { %v714_v9 = vadd.f32 %v713_v58, %v712_v2  ;;  %v816_v5 = vrot.slane %v815_v8, 2 }
 0x125   : > { %v715_v10 = vrot.slane %v714_v9, 1  ;;  %v817_v4 = vadd.f32 %v816_v5, %v815_v8 }
 0x127   : > { %v716_v15 = vadd.f32 %v715_v10, %v714_v9  ;;  %v818_v48 = vrot.slane %v817_v4, 1 }
 0x129   : > { %718 = vst.msk [vmem:[%s349_s28] sm:$0x1] %vm717_vm2, %v716_v15  ;;  %v819_v12 = vadd.f32 %v818_v48, %v817_v4 }
 0x12b   : > { %820 = vst.msk [vmem:[%s358_s30] sm:$0x1] %vm717_vm2, %v819_v12 }
 0x12c PF: > { %s16_s22 = sadd.s32 1, %s1326_s22   ;;  %s1829_s18 = smov %s1318_s20 }
 0x12d   : > { %p13_p8 = scmp.ge.s32.totalorder %s16_s22, 10   ;;  %s1830_s19 = smov %s1322_s21 }
 0x12e   : > { %s1831_s20 = smov %s1834_s23  ;;  %s1832_s21 = smov %s1838_s24 }
 0x12f   :  { %15 = sbr.rel (!%p13_p8) target bundleno = 3 (0x3), region = 89 }

// kernel: forward.26
= control target key start
LH: loop header
LB: loop body
LE: loop exit
PB: predicated region body
PF: predicated region fallthrough
CT: control target
= control target key end

     0   :  { %s1085_s12 = smov 0   ;;  %s1087_s13 = smov 0   ;;  %s1266_s0 = inlined_call_operand.vmem [shape: bf16[2,4,1024,64], index: 0, kind: input, shape index: {}]   ;;  %s1267_s1 = inlined_call_operand.vmem [shape: bf16[4,64,128], index: 1, kind: input, shape index: {}]   ;;  %s1268_s2 = inlined_call_operand.vmem [shape: f32[1,128], index: 2, kind: input, shape index: {}]   ;;  %s1269_s3 = inlined_call_operand.vmem [shape: f32[2,4,1024,128], index: 3, kind: output, shape index: {}]  }
   0x1   :  { %s1089_s14 = smov 0   ;;  %s1091_s15 = smov 0  }
   0x2   :  { %s1093_s16 = smov 0   ;;  %s1095_s17 = smov 0  }
   0x3   :  { %s1097_s18 = smov 0  }
   0x4 LB: > { %s25_s19 = sadd.s32 1, %s1051_s15  ;;  %s28_s20 = sadd.s32 1, %s1055_s16  ;;  %s1063_s18 = sphi %s1097_s18, %s13_s18   ;;  %s1059_s17 = sphi %s1095_s17, %s1275_s17   ;;  %s1055_s16 = sphi %s1093_s16, %s1274_s16   ;;  %s1051_s15 = sphi %s1091_s15, %s1273_s15   ;;  %s1047_s14 = sphi %s1089_s14, %s1272_s14   ;;  %s1043_s13 = sphi %s1087_s13, %s1271_s13   ;;  %s1039_s12 = sphi %s1085_s12, %s1270_s12  }
   0x5   : > { %p26_p0 = scmp.ge.s32.totalorder %s25_s19, 4  ;;  %p746_p1 = scmp.ge.s32.totalorder %s1063_s18, 1 }
   0x6   : > { %p183_p2 = scmp.lt.s32.totalorder %s1063_s18, 33  ;;  %s32_s21 = sadd.s32 1, %s1059_s17 }
   0x7   : > { %s1277_s19 = smov (%p26_p0, %s25_s19), 0  ;;  %s1279_s20 = smov (!%p26_p0, %s28_s20), %s1055_s16 }
   0x8   : > { %p184_p3 = pnand %p746_p1, %p183_p2  ;;  %p30_p4 = scmp.ge.s32.totalorder %s1279_s20, 4 }
   0x9   : > { %s747_s22 = sshll.u32 (!%p184_p3), %s1039_s12, 5  ;;  %p229_p6 = scmp.lt.s32.totalorder (!%p184_p3), %s1047_s14, 1 }
   0xa   : > { %s1281_s20 = smov (%p30_p4, %s1279_s20), 0  ;;  %s1283_s21 = smov (!%p30_p4, %s32_s21), %s1059_s17 }
   0xb   : > { %p34_p5 = scmp.ge.s32.totalorder %s1283_s21, 2  ;;  %187 = sbr.rel (%p184_p3) target bundleno = 236 (0xec), region = 32 }
   0xc   : > { %p231_p7 = scmp.lt.s32.totalorder (!%p184_p3), %s1043_s13, 3  ;;  %p233_p8 = scmp.lt.s32.totalorder (!%p184_p3), %s747_s22, 127 }
   0xd   : > { %s1285_s21 = smov (%p34_p5, %s1283_s21), 0 }
  0x10   : > { %s1287_s13 = smov (!%p231_p7, %s1043_s13), 3  ;;  %s1289_s14 = smov (!%p229_p6, %s1047_s14), 1  ;;  %vm410_vm0 = vcmask 523264   ;;  %v1173_v20 = vld [vmem:[%s1268_s2] ss:$0 sm:$0xff] }
  0x11   : > { %s1291_s22 = smov (!%p233_p8, %s747_s22), 127  ;;  %s748_s23 = sshll.u32 %s1287_s13, 7 }
  0x12   : > { %s855_s24 = sshll.u32 %s1287_s13, 5  ;;  %s236_s28 = sadd.s32 %s748_s23, %s1291_s22 }
  0x13   : > { %s246_s27 = scalar_lea.vmem %s1267_s1, %s855_s24  ;;  %s749_s29 = sshll.u32 %s1289_s14, 9 }
  0x14   : > { %v875_v0 = vld [vmem:[%s246_s27 + $0x18] sm:$0xff]  ;;  %v874_v1 = vld [vmem:[%s246_s27 + $0x10] sm:$0xff]  ;;  %s1130_s30 = sadd.s32 %s749_s29, %s236_s28  ;;  %v873_v2 = vld [vmem:[%s246_s27 + $0x8] sm:$0xff] }
  0x15   : > { %463 = vmatpush.bf16.msra.mxu0 %v875_v0  ;;  %876 = vmatpush.bf16.msra.mxu1 %v875_v0  ;;  %s750_s4 = sshll.u32 %s1130_s30, 2  ;;  %v872_v3 = vld [vmem:[%s246_s27] sm:$0xff]  ;;  %s756_s10 = sshll.u32 %s1130_s30, 3 }
  0x16   : > { %877 = vmatpush.bf16.msra.mxu2 %v875_v0  ;;  %878 = vmatpush.bf16.msra.mxu3 %v875_v0  ;;  %s1136_s7 = scalar_lea.vmem %s1266_s0, %s750_s4  ;;  %s1181_s13 = scalar_lea.vmem %s1269_s3, %s756_s10 }
  0x17   : > { %v856_v4 = vld [vmem:[%s1136_s7] sm:$0xff]  ;;  %v857_v8 = vld [vmem:[%s1136_s7 + $0x8] sm:$0xff]  ;;  %v858_v12 = vld [vmem:[%s1136_s7 + $0x10] sm:$0xff] }
  0x18   : > { %v860_v5 = vld [vmem:[%s1136_s7 + $0x20] sm:$0xff]  ;;  %v861_v9 = vld [vmem:[%s1136_s7 + $0x28] sm:$0xff]  ;;  %v862_v13 = vld [vmem:[%s1136_s7 + $0x30] sm:$0xff] }
  0x19   : > { %464 = vmatpush.bf16.msra.mxu0 %v874_v1  ;;  %879 = vmatpush.bf16.msra.mxu1 %v874_v1  ;;  %v864_v6 = vld [vmem:[%s1136_s7 + $0x40] sm:$0xff]  ;;  %v865_v10 = vld [vmem:[%s1136_s7 + $0x48] sm:$0xff]  ;;  %v866_v14 = vld [vmem:[%s1136_s7 + $0x50] sm:$0xff] }
  0x1a   : > { %880 = vmatpush.bf16.msra.mxu2 %v874_v1  ;;  %881 = vmatpush.bf16.msra.mxu3 %v874_v1  ;;  %v868_v7 = vld [vmem:[%s1136_s7 + $0x60] sm:$0xff]  ;;  %v869_v11 = vld [vmem:[%s1136_s7 + $0x68] sm:$0xff]  ;;  %v870_v15 = vld [vmem:[%s1136_s7 + $0x70] sm:$0xff] }
  0x1b   : > { %v859_v16 = vld [vmem:[%s1136_s7 + $0x18] sm:$0xff] }
  0x1c   : > { %v863_v17 = vld [vmem:[%s1136_s7 + $0x38] sm:$0xff] }
  0x1d   : > { %465 = vmatpush.bf16.msra.mxu0 %v873_v2  ;;  %882 = vmatpush.bf16.msra.mxu1 %v873_v2  ;;  %v867_v18 = vld [vmem:[%s1136_s7 + $0x58] sm:$0xff] }
  0x1e   : > { %883 = vmatpush.bf16.msra.mxu2 %v873_v2  ;;  %884 = vmatpush.bf16.msra.mxu3 %v873_v2  ;;  %v871_v19 = vld [vmem:[%s1136_s7 + $0x78] sm:$0xff] }
  0x21   : > { %466 = vmatpush.bf16.msra.mxu0 %v872_v3  ;;  %885 = vmatpush.bf16.msra.mxu1 %v872_v3 }
  0x22   : > { %886 = vmatpush.bf16.msra.mxu2 %v872_v3  ;;  %887 = vmatpush.bf16.msra.mxu3 %v872_v3 }
  0x24   : > { %837 = vmatmul.msk.bf16.vlgmr.msra.gmra.mxu0 %vm410_vm0, %v856_v4  ;;  %841 = vmatmul.msk.bf16.vlgmr.msra.gmra.mxu1 %vm410_vm0, %v860_v5 }
  0x25   : > { %845 = vmatmul.msk.bf16.vlgmr.msra.gmra.mxu2 %vm410_vm0, %v864_v6  ;;  %849 = vmatmul.msk.bf16.vlgmr.msra.gmra.mxu3 %vm410_vm0, %v868_v7 }
  0x34   : > { %838 = vmatmul.msk.bf16.gmra.mxu0 %vm410_vm0, %v857_v8  ;;  %842 = vmatmul.msk.bf16.gmra.mxu1 %vm410_vm0, %v861_v9 }
  0x35   : > { %846 = vmatmul.msk.bf16.gmra.mxu2 %vm410_vm0, %v865_v10  ;;  %850 = vmatmul.msk.bf16.gmra.mxu3 %vm410_vm0, %v869_v11 }
  0x44   : > { %839 = vmatmul.msk.bf16.gmra.mxu0 %vm410_vm0, %v858_v12  ;;  %843 = vmatmul.msk.bf16.gmra.mxu1 %vm410_vm0, %v862_v13 }
  0x45   : > { %847 = vmatmul.msk.bf16.gmra.mxu2 %vm410_vm0, %v866_v14  ;;  %851 = vmatmul.msk.bf16.gmra.mxu3 %vm410_vm0, %v870_v15 }
  0x54   : > { %840 = vmatmul.msk.bf16.gmra.mxu0 %vm410_vm0, %v859_v16  ;;  %844 = vmatmul.msk.bf16.gmra.mxu1 %vm410_vm0, %v863_v17 }
  0x55   : > { %848 = vmatmul.msk.bf16.gmra.mxu2 %vm410_vm0, %v867_v18  ;;  %852 = vmatmul.msk.bf16.gmra.mxu3 %vm410_vm0, %v871_v19 }
  0xa1   : > { %v468_v21 = vpop.f32.mrf.mxu0  ;;  %v488_v22 = vpop.f32.mrf.mxu1 }
  0xa2   : > { %v469_v23 = vadd.f32 %v1173_v20, %v468_v21  ;;  %v489_v24 = vadd.f32 %v1173_v20, %v488_v22 }
  0xa4   : > { %945 = vtanh.f32 %v469_v23 }
  0xa5   : > { %947 = vtanh.f32 %v489_v24 }
  0xa8   : > { %v508_v25 = vpop.f32.mrf.mxu2  ;;  %v528_v26 = vpop.f32.mrf.mxu3 }
  0xa9   : > { %v509_v27 = vadd.f32 %v1173_v20, %v508_v25  ;;  %v529_v28 = vadd.f32 %v1173_v20, %v528_v26  ;;  %v470_v29 = vpop.f32.mrf.mxu0  ;;  %v490_v30 = vpop.f32.mrf.mxu1 }
  0xaa   : > { %v946_v31 = vpop.eup %945  ;;  %v471_v32 = vadd.f32 %v1173_v20, %v470_v29  ;;  %v491_v33 = vadd.f32 %v1173_v20, %v490_v30 }
  0xab   : > { %v948_v34 = vpop.eup %947  ;;  %580 = vst [vmem:[%s1181_s13] sm:$0xff] %v946_v31  ;;  %949 = vtanh.f32 %v509_v27 }
  0xac   : > { %588 = vst [vmem:[%s1181_s13 + $0x40] sm:$0xff] %v948_v34  ;;  %951 = vtanh.f32 %v529_v28 }
  0xad   : > { %953 = vtanh.f32 %v471_v32 }
  0xae   : > { %955 = vtanh.f32 %v491_v33 }
  0xb0   : > { %v510_v35 = vpop.f32.mrf.mxu2  ;;  %v530_v36 = vpop.f32.mrf.mxu3 }
  0xb1   : > { %v950_v37 = vpop.eup %949  ;;  %v511_v38 = vadd.f32 %v1173_v20, %v510_v35  ;;  %v531_v39 = vadd.f32 %v1173_v20, %v530_v36  ;;  %v473_v40 = vpop.f32.mrf.mxu0 }
  0xb2   : > { %v493_v41 = vpop.f32.mrf.mxu1  ;;  %v952_v42 = vpop.eup %951  ;;  %596 = vst [vmem:[%s1181_s13 + $0x80] sm:$0xff] %v950_v37  ;;  %v474_v43 = vadd.f32 %v1173_v20, %v473_v40 }
  0xb3   : > { %v494_v44 = vadd.f32 %v1173_v20, %v493_v41  ;;  %v954_v45 = vpop.eup %953  ;;  %604 = vst [vmem:[%s1181_s13 + $0xc0] sm:$0xff] %v952_v42  ;;  %957 = vtanh.f32 %v511_v38 }
  0xb4   : > { %v956_v46 = vpop.eup %955  ;;  %581 = vst [vmem:[%s1181_s13 + $0x8] sm:$0xff] %v954_v45  ;;  %959 = vtanh.f32 %v531_v39 }
  0xb5   : > { %589 = vst [vmem:[%s1181_s13 + $0x48] sm:$0xff] %v956_v46  ;;  %961 = vtanh.f32 %v474_v43 }
  0xb6   : > { %963 = vtanh.f32 %v494_v44 }
  0xb8   : > { %v513_v47 = vpop.f32.mrf.mxu2  ;;  %v533_v48 = vpop.f32.mrf.mxu3 }
  0xb9   : > { %v958_v49 = vpop.eup %957  ;;  %v514_v50 = vadd.f32 %v1173_v20, %v513_v47  ;;  %v534_v51 = vadd.f32 %v1173_v20, %v533_v48  ;;  %v475_v52 = vpop.f32.mrf.mxu0 }
  0xba   : > { %v495_v53 = vpop.f32.mrf.mxu1  ;;  %v960_v54 = vpop.eup %959  ;;  %597 = vst [vmem:[%s1181_s13 + $0x88] sm:$0xff] %v958_v49  ;;  %v476_v55 = vadd.f32 %v1173_v20, %v475_v52 }
  0xbb   : > { %v496_v56 = vadd.f32 %v1173_v20, %v495_v53  ;;  %v962_v57 = vpop.eup %961  ;;  %605 = vst [vmem:[%s1181_s13 + $0xc8] sm:$0xff] %v960_v54  ;;  %965 = vtanh.f32 %v514_v50 }
  0xbc   : > { %v964_v58 = vpop.eup %963  ;;  %582 = vst [vmem:[%s1181_s13 + $0x10] sm:$0xff] %v962_v57  ;;  %967 = vtanh.f32 %v534_v51 }
  0xbd   : > { %590 = vst [vmem:[%s1181_s13 + $0x50] sm:$0xff] %v964_v58  ;;  %969 = vtanh.f32 %v476_v55 }
  0xbe   : > { %971 = vtanh.f32 %v496_v56 }
  0xc0   : > { %v515_v59 = vpop.f32.mrf.mxu2  ;;  %v535_v60 = vpop.f32.mrf.mxu3 }
  0xc1   : > { %v966_v61 = vpop.eup %965  ;;  %v516_v62 = vadd.f32 %v1173_v20, %v515_v59  ;;  %v536_v63 = vadd.f32 %v1173_v20, %v535_v60  ;;  %v478_v0 = vpop.f32.mrf.mxu0 }
  0xc2   : > { %v498_v1 = vpop.f32.mrf.mxu1  ;;  %v968_v2 = vpop.eup %967  ;;  %598 = vst [vmem:[%s1181_s13 + $0x90] sm:$0xff] %v966_v61  ;;  %v479_v3 = vadd.f32 %v1173_v20, %v478_v0 }
  0xc3   : > { %v499_v4 = vadd.f32 %v1173_v20, %v498_v1  ;;  %v970_v5 = vpop.eup %969  ;;  %606 = vst [vmem:[%s1181_s13 + $0xd0] sm:$0xff] %v968_v2  ;;  %973 = vtanh.f32 %v516_v62 }
  0xc4   : > { %v972_v6 = vpop.eup %971  ;;  %583 = vst [vmem:[%s1181_s13 + $0x18] sm:$0xff] %v970_v5  ;;  %975 = vtanh.f32 %v536_v63 }
  0xc5   : > { %591 = vst [vmem:[%s1181_s13 + $0x58] sm:$0xff] %v972_v6  ;;  %977 = vtanh.f32 %v479_v3 }
  0xc6   : > { %979 = vtanh.f32 %v499_v4 }
  0xc8   : > { %v518_v7 = vpop.f32.mrf.mxu2  ;;  %v538_v8 = vpop.f32.mrf.mxu3 }
  0xc9   : > { %v974_v9 = vpop.eup %973  ;;  %v519_v10 = vadd.f32 %v1173_v20, %v518_v7  ;;  %v539_v11 = vadd.f32 %v1173_v20, %v538_v8  ;;  %v480_v12 = vpop.f32.mrf.mxu0 }
  0xca   : > { %v500_v13 = vpop.f32.mrf.mxu1  ;;  %v976_v14 = vpop.eup %975  ;;  %599 = vst [vmem:[%s1181_s13 + $0x98] sm:$0xff] %v974_v9  ;;  %v481_v15 = vadd.f32 %v1173_v20, %v480_v12 }
  0xcb   : > { %v501_v16 = vadd.f32 %v1173_v20, %v500_v13  ;;  %v978_v17 = vpop.eup %977  ;;  %607 = vst [vmem:[%s1181_s13 + $0xd8] sm:$0xff] %v976_v14  ;;  %981 = vtanh.f32 %v519_v10 }
  0xcc   : > { %v980_v18 = vpop.eup %979  ;;  %584 = vst [vmem:[%s1181_s13 + $0x20] sm:$0xff] %v978_v17  ;;  %983 = vtanh.f32 %v539_v11 }
  0xcd   : > { %592 = vst [vmem:[%s1181_s13 + $0x60] sm:$0xff] %v980_v18  ;;  %985 = vtanh.f32 %v481_v15 }
  0xce   : > { %987 = vtanh.f32 %v501_v16 }
  0xd0   : > { %v520_v19 = vpop.f32.mrf.mxu2  ;;  %v540_v21 = vpop.f32.mrf.mxu3 }
  0xd1   : > { %v982_v22 = vpop.eup %981  ;;  %v521_v23 = vadd.f32 %v1173_v20, %v520_v19  ;;  %v541_v24 = vadd.f32 %v1173_v20, %v540_v21  ;;  %v483_v25 = vpop.f32.mrf.mxu0 }
  0xd2   : > { %v503_v26 = vpop.f32.mrf.mxu1  ;;  %v984_v27 = vpop.eup %983  ;;  %600 = vst [vmem:[%s1181_s13 + $0xa0] sm:$0xff] %v982_v22  ;;  %v484_v28 = vadd.f32 %v1173_v20, %v483_v25 }
  0xd3   : > { %v504_v29 = vadd.f32 %v1173_v20, %v503_v26  ;;  %v986_v30 = vpop.eup %985  ;;  %608 = vst [vmem:[%s1181_s13 + $0xe0] sm:$0xff] %v984_v27  ;;  %989 = vtanh.f32 %v521_v23 }
  0xd4   : > { %v988_v31 = vpop.eup %987  ;;  %585 = vst [vmem:[%s1181_s13 + $0x28] sm:$0xff] %v986_v30  ;;  %991 = vtanh.f32 %v541_v24 }
  0xd5   : > { %593 = vst [vmem:[%s1181_s13 + $0x68] sm:$0xff] %v988_v31  ;;  %993 = vtanh.f32 %v484_v28 }
  0xd6   : > { %995 = vtanh.f32 %v504_v29 }
  0xd8   : > { %v523_v32 = vpop.f32.mrf.mxu2  ;;  %v543_v33 = vpop.f32.mrf.mxu3 }
  0xd9   : > { %v990_v34 = vpop.eup %989  ;;  %v524_v35 = vadd.f32 %v1173_v20, %v523_v32  ;;  %v544_v36 = vadd.f32 %v1173_v20, %v543_v33  ;;  %v485_v37 = vpop.f32.mrf.mxu0 }
  0xda   : > { %v505_v38 = vpop.f32.mrf.mxu1  ;;  %v992_v39 = vpop.eup %991  ;;  %601 = vst [vmem:[%s1181_s13 + $0xa8] sm:$0xff] %v990_v34  ;;  %v486_v40 = vadd.f32 %v1173_v20, %v485_v37 }
  0xdb   : > { %v506_v41 = vadd.f32 %v1173_v20, %v505_v38  ;;  %v994_v42 = vpop.eup %993  ;;  %609 = vst [vmem:[%s1181_s13 + $0xe8] sm:$0xff] %v992_v39  ;;  %997 = vtanh.f32 %v524_v35 }
  0xdc   : > { %v996_v43 = vpop.eup %995  ;;  %586 = vst [vmem:[%s1181_s13 + $0x30] sm:$0xff] %v994_v42  ;;  %999 = vtanh.f32 %v544_v36 }
  0xdd   : > { %594 = vst [vmem:[%s1181_s13 + $0x70] sm:$0xff] %v996_v43  ;;  %1001 = vtanh.f32 %v486_v40 }
  0xde   : > { %1003 = vtanh.f32 %v506_v41 }
  0xe0   : > { %v525_v44 = vpop.f32.mrf.mxu2  ;;  %v545_v45 = vpop.f32.mrf.mxu3 }
  0xe1   : > { %v998_v46 = vpop.eup %997  ;;  %v526_v47 = vadd.f32 %v1173_v20, %v525_v44  ;;  %v546_v48 = vadd.f32 %v1173_v20, %v545_v45 }
  0xe2   : > { %v1000_v49 = vpop.eup %999  ;;  %602 = vst [vmem:[%s1181_s13 + $0xb0] sm:$0xff] %v998_v46 }
  0xe3   : > { %v1002_v50 = vpop.eup %1001  ;;  %610 = vst [vmem:[%s1181_s13 + $0xf0] sm:$0xff] %v1000_v49  ;;  %1005 = vtanh.f32 %v526_v47 }
  0xe4   : > { %v1004_v51 = vpop.eup %1003  ;;  %587 = vst [vmem:[%s1181_s13 + $0x38] sm:$0xff] %v1002_v50  ;;  %1007 = vtanh.f32 %v546_v48 }
  0xe5   : > { %595 = vst [vmem:[%s1181_s13 + $0x78] sm:$0xff] %v1004_v51 }
  0xe9   : > { %v1006_v52 = vpop.eup %1005 }
  0xea   : > { %v1008_v53 = vpop.eup %1007  ;;  %603 = vst [vmem:[%s1181_s13 + $0xb8] sm:$0xff] %v1006_v52 }
  0xeb   : > { %611 = vst [vmem:[%s1181_s13 + $0xf8] sm:$0xff] %v1008_v53 }
  0xec PF: > { %s13_s18 = sadd.s32 1, %s1063_s18   ;;  %s1270_s12 = smov %s1051_s15 }
  0xed   : > { %p10_p9 = scmp.ge.s32.totalorder %s13_s18, 34   ;;  %s1271_s13 = smov %s1055_s16 }
  0xee   : > { %s1272_s14 = smov %s1059_s17  ;;  %s1273_s15 = smov %s1277_s19 }
  0xef   : > { %s1274_s16 = smov %s1281_s20  ;;  %s1275_s17 = smov %s1285_s21 }
  0xf0   :  { %12 = sbr.rel (!%p10_p9) target bundleno = 4 (0x4), region = 65 }

</bundles_post_ra>
